<compile_context>
chip_gen: v5e
topology: v5e:2x2
jax: 0.10.0
libtpu: 0.0.40
codegen_flags: <defaults>
</compile_context>

<pallas_src>
import functools
import math

import jax
import jax.numpy as jnp
import numpy as np
from jax.experimental import pallas as pl
from jax.experimental.pallas import tpu as pltpu


def _layernorm(x, gamma, beta, eps):
    mean = jnp.mean(x, axis=-1, keepdims=True)
    var = jnp.mean((x - mean) ** 2, axis=-1, keepdims=True)
    return (x - mean) * jax.lax.rsqrt(var + eps) * gamma + beta


def block_kernel(x_full_ref, x_ref, mask_ref,
                 wq_ref, bq_ref, wkv_ref, bkv_ref, wo_ref, bo_ref,
                 g1_ref, be1_ref, w1_ref, b1_ref, w2_ref, b2_ref,
                 g2_ref, be2_ref,
                 out_ref, attn_out_ref, score_ref,
                 kv_ref,
                 *, num_heads, head_dim, ln1_eps, ln2_eps, use_bf16_matmul):
    f32 = jnp.float32
    cast = (lambda a: a.astype(jnp.bfloat16)) if use_bf16_matmul else (lambda a: a)
    H = num_heads * head_dim

    # ---- K/V for the whole sequence: ONE lane-dense (S,H)@(H,2H) matmul per batch element,
    # ---- computed at query-tile 0 and kept in VMEM scratch for all query tiles.
    @pl.when(pl.program_id(1) == 0)
    def _():
        kv_ref[...] = (jnp.dot(cast(x_full_ref[0]), cast(wkv_ref[...]),
                               preferred_element_type=f32) + bkv_ref[...])

    x = x_ref[0]                                    # (tq, H) f32
    mask = mask_ref[0]                              # (1, S) additive mask (broadcast over queries)

    # ---- Q projection: single lane-dense (tq,H)@(H,H) matmul (1/sqrt(d) pre-folded into Wq/bq).
    q = jnp.dot(cast(x), cast(wq_ref[...]), preferred_element_type=f32) + bq_ref[...]

    # ---- Per-head attention.  Static (unrolled) head loop of 2-D matmuls:
    # scores are lane-dense (tq,S); the output projection (tq,d)@(d,H) is full-width (N=H) and is
    # accumulated head-by-head into one (tq,H) f32 value — no (nh,tq,H) intermediate, no x copies.
    attn = jnp.zeros((x.shape[0], H), f32)
    for h in range(num_heads):
        lo = h * head_dim
        hi = lo + head_dim
        q_h = q[:, lo:hi]                           # (tq, d)
        k_h = kv_ref[:, lo:hi]                      # (S, d)   VMEM slice load
        v_h = kv_ref[:, H + lo:H + hi]              # (S, d)
        s = jax.lax.dot_general(cast(q_h), cast(k_h),
                                (((1,), (1,)), ((), ())),
                                preferred_element_type=f32)      # (tq, S) = q_h @ k_h^T
        s = s + mask
        s = s - jnp.max(s, axis=-1, keepdims=True)
        p = jnp.exp(s)
        p = p * (1.0 / jnp.sum(p, axis=-1, keepdims=True))       # softmax probabilities (f32)
        score_ref[0, h] = p.astype(score_ref.dtype)
        ctx = jnp.dot(cast(p), cast(v_h), preferred_element_type=f32)            # (tq, d)
        attn = attn + jnp.dot(cast(ctx), cast(wo_ref[lo:hi, :]),
                              preferred_element_type=f32)                        # (tq, H)

    attn = attn + bo_ref[...]
    attn_out = _layernorm(x + attn, g1_ref[...], be1_ref[...], ln1_eps)
    attn_out_ref[0] = attn_out

    # ---- FFN: dense1 (active DynamicLinear slice) -> exact erf GELU -> dense2 -> residual + LN.
    h1 = jnp.dot(cast(attn_out), cast(w1_ref[...]), preferred_element_type=f32) + b1_ref[...]
    h1 = 0.5 * h1 * (1.0 + jax.lax.erf(h1 * 0.7071067811865476))
    y = jnp.dot(cast(h1), cast(w2_ref[...]), preferred_element_type=f32) + b2_ref[...]
    out_ref[0] = _layernorm(attn_out + y, g2_ref[...], be2_ref[...], ln2_eps)


def supernet_block_forward(x, attn_mask_add, params, *, num_heads,
                           ln1_eps=1e-12, ln2_eps=1e-5,
                           use_bf16_matmul=False, score_dtype=jnp.float32,
                           q_tile=None):
    """Equivalent of MySupernetTransformerBlock.forward(hidden_states, attn_mask).

    Returns (output, attn_output, attn_score, one_cka, one_pca).
    """
    B, S, H = x.shape
    assert H % num_heads == 0, "hidden_size must be divisible by num_attention_heads"
    head_dim = H // num_heads
    F_active = params["w1"].shape[1]

    if q_tile is None:
        q_tile = S if S <= 128 else 128
    assert S % q_tile == 0, "seq_len must be divisible by q_tile"
    nq = S // q_tile

    # Fold the 1/sqrt(head_dim) score scale into the Q projection (zero in-kernel cost) and
    # pre-cast matmul weights to bf16 in the wrapper when requested (biases / LN params stay f32).
    scale = 1.0 / math.sqrt(head_dim)
    wdt = jnp.bfloat16 if use_bf16_matmul else jnp.float32
    wq = (params["wq"] * scale).astype(wdt)
    bq = params["bq"] * scale
    wkv = jnp.concatenate([params["wk"], params["wv"]], axis=1).astype(wdt)   # (H, 2H)
    bkv = jnp.concatenate([params["bk"], params["bv"]], axis=1)               # (1, 2H)
    wo = params["wo"].astype(wdt)
    w1 = params["w1"].astype(wdt)
    w2 = params["w2"].astype(wdt)

    kernel = functools.partial(block_kernel, num_heads=num_heads, head_dim=head_dim,
                               ln1_eps=ln1_eps, ln2_eps=ln2_eps,
                               use_bf16_matmul=use_bf16_matmul)

    # VMEM budget estimate -> scoped vmem limit (never below the 32 MiB default).
    def _bytes(shape, dtype):
        return int(math.prod(shape)) * jnp.dtype(dtype).itemsize

    weight_args = (wq, bq, wkv, bkv, wo, params["bo"], params["ln1_g"], params["ln1_b"],
                   w1, params["b1"], w2, params["b2"], params["ln2_g"], params["ln2_b"])
    w_bytes = sum(_bytes(a.shape, a.dtype) for a in weight_args)
    io_bytes = 2 * (_bytes((1, S, H), jnp.float32) + 3 * _bytes((1, q_tile, H), jnp.float32)
                    + _bytes((1, 1, S), jnp.float32)
                    + _bytes((1, num_heads, q_tile, S), score_dtype))
    est = 2 * w_bytes + io_bytes + _bytes((S, 2 * H), jnp.float32)
    vmem_limit = int(min(max(2 * est + (8 << 20), 32 << 20), 100 << 20))

    def run(single_buffer_weights):
        def wfull(shape):
            n = len(shape)
            idx = lambda b, qi, _n=n: (0,) * _n
            if single_buffer_weights:
                # Constant block index across the whole grid -> one VMEM buffer is enough.
                return pl.BlockSpec(shape, idx, pipeline_mode=pl.Buffered(1))
            return pl.BlockSpec(shape, idx)

        in_specs = [
            pl.BlockSpec((1, S, H), lambda b, qi: (b, 0, 0)),        # x (full seq, K/V source)
            pl.BlockSpec((1, q_tile, H), lambda b, qi: (b, qi, 0)),  # x (current query tile)
            pl.BlockSpec((1, 1, S), lambda b, qi: (b, 0, 0)),        # additive attention mask
            wfull((H, H)), wfull((1, H)),                            # Wq (scaled), bq (scaled)
            wfull((H, 2 * H)), wfull((1, 2 * H)),                    # Wkv, bkv
            wfull((H, H)), wfull((1, H)),                            # Wo, bo
            wfull((1, H)), wfull((1, H)),                            # LN1 gamma/beta
            wfull((H, F_active)), wfull((1, F_active)),              # dense1 (active slice)
            wfull((F_active, H)), wfull((1, H)),                     # dense2 (active slice)
            wfull((1, H)), wfull((1, H)),                            # LN2 gamma/beta
        ]
        out_specs = (
            pl.BlockSpec((1, q_tile, H), lambda b, qi: (b, qi, 0)),
            pl.BlockSpec((1, q_tile, H), lambda b, qi: (b, qi, 0)),
            pl.BlockSpec((1, num_heads, q_tile, S), lambda b, qi: (b, 0, qi, 0)),
        )
        fn = pl.pallas_call(
            kernel,
            out_shape=(jax.ShapeDtypeStruct((B, S, H), jnp.float32),
                       jax.ShapeDtypeStruct((B, S, H), jnp.float32),
                       jax.ShapeDtypeStruct((B, num_heads, S, S), score_dtype)),
            grid=(B, nq),
            in_specs=in_specs,
            out_specs=out_specs,
            scratch_shapes=[pltpu.VMEM((S, 2 * H), jnp.float32)],    # per-batch K/V cache
            compiler_params=pltpu.CompilerParams(
                dimension_semantics=("parallel", "arbitrary"),
                vmem_limit_bytes=vmem_limit),
        )
        return fn(x, x, attn_mask_add,
                  wq, bq, wkv, bkv, wo, params["bo"],
                  params["ln1_g"], params["ln1_b"],
                  w1, params["b1"], w2, params["b2"],
                  params["ln2_g"], params["ln2_b"])

    try:
        out, attn_out, attn_score = run(single_buffer_weights=True)
    except Exception:
        # pipeline_mode=pl.Buffered(1) not supported by this jax version -> default buffering.
        out, attn_out, attn_score = run(single_buffer_weights=False)

    one_cka = jnp.float32(0.0)   # TODO(synk): CKA stat (is_calc_pca_cka=True path) not computed
    one_pca = jnp.float32(0.0)   # TODO(synk): pca_torch stat not computed
    return out, attn_out, attn_score, one_cka, one_pca


def reference_forward(x, mask, params, *, num_heads, ln1_eps=1e-12, ln2_eps=1e-5):
    """Pure-JAX reference mirroring the PyTorch forward (eval mode, no pca/cka)."""
    B, S, H = x.shape
    d = H // num_heads

    def ln(v, g, b, eps):
        m = jnp.mean(v, axis=-1, keepdims=True)
        var = jnp.mean((v - m) ** 2, axis=-1, keepdims=True)
        return (v - m) * jax.lax.rsqrt(var + eps) * g + b

    q = x @ params["wq"] + params["bq"]
    k = x @ params["wk"] + params["bk"]
    v = x @ params["wv"] + params["bv"]
    split = lambda t: t.reshape(B, S, num_heads, d).transpose(0, 2, 1, 3)
    qh, kh, vh = split(q), split(k), split(v)
    s = jnp.einsum('bhqd,bhkd->bhqk', qh, kh) / math.sqrt(d) + mask[:, None, :, :]
    p = jax.nn.softmax(s, axis=-1)
    ctx = jnp.einsum('bhqk,bhkd->bhqd', p, vh).transpose(0, 2, 1, 3).reshape(B, S, H)
    attn_out = ln(x + ctx @ params["wo"] + params["bo"],
                  params["ln1_g"], params["ln1_b"], ln1_eps)
    h1 = attn_out @ params["w1"] + params["b1"]
    h1 = 0.5 * h1 * (1.0 + jax.lax.erf(h1 * 0.7071067811865476))
    out = ln(attn_out + h1 @ params["w2"] + params["b2"],
             params["ln2_g"], params["ln2_b"], ln2_eps)
    return out, attn_out, p


if __name__ == "__main__":
    # config: hidden_size=32, num_attention_heads=4, init_hidden_size=32,
    #         hidden_size_increment=32, max_ffn_hidden_size=128, block index j=1
    B, S, H = 2, 8, 32
    num_heads = 4
    init_hidden_size = 32
    j = 1
    ffn_active = init_hidden_size * (j + 1)   # dense1 out / dense2 in active width = 64

    key = jax.random.PRNGKey(0)
    ks = jax.random.split(key, 16)
    std = 0.02

    def lin(kw, kb, din, dout):
        return (jax.random.normal(kw, (din, dout), jnp.float32) * std,
                jax.random.normal(kb, (1, dout), jnp.float32) * std)

    params = {}
    params["wq"], params["bq"] = lin(ks[0], ks[1], H, H)
    params["wk"], params["bk"] = lin(ks[2], ks[3], H, H)
    params["wv"], params["bv"] = lin(ks[4], ks[5], H, H)
    params["wo"], params["bo"] = lin(ks[6], ks[7], H, H)
    params["w1"], params["b1"] = lin(ks[8], ks[9], H, ffn_active)
    params["w2"], params["b2"] = lin(ks[10], ks[11], ffn_active, H)
    params["ln1_g"] = jnp.ones((1, H), jnp.float32)
    params["ln1_b"] = jnp.zeros((1, H), jnp.float32)
    params["ln2_g"] = jnp.ones((1, H), jnp.float32)
    params["ln2_b"] = jnp.zeros((1, H), jnp.float32)

    x = jax.random.normal(ks[12], (B, S, H), jnp.float32)

    # BERT-style additive attention mask: (B, 1, S), 0 for valid tokens, -10000 for padding.
    lengths = jnp.array([S, S - 2], jnp.int32)
    pos = jnp.arange(S)[None, None, :]
    attn_mask_add = jnp.where(pos < lengths[:, None, None], 0.0, -10000.0).astype(jnp.float32)

    # f32 path (exact semantics).
    out, attn_out, score, one_cka, one_pca = supernet_block_forward(
        x, attn_mask_add, params, num_heads=num_heads)
    jax.block_until_ready((out, attn_out, score))

    # Smoke-check against a pure-JAX reference (loose tolerance: MXU f32 accumulation order).
    ref_out, ref_attn_out, ref_p = reference_forward(x, attn_mask_add, params, num_heads=num_heads)
    assert np.max(np.abs(np.asarray(out) - np.asarray(ref_out))) < 5e-2
    assert np.max(np.abs(np.asarray(attn_out) - np.asarray(ref_attn_out))) < 5e-2
    assert np.max(np.abs(np.asarray(score) - np.asarray(ref_p))) < 5e-2

    # bf16 MXU-operand fast path (f32 accumulation; softmax/LN/GELU stay f32) — v6e/v7x.
    outs_bf16 = supernet_block_forward(x, attn_mask_add, params, num_heads=num_heads,
                                       use_bf16_matmul=True)
    jax.block_until_ready(outs_bf16[0])

    print("KERNEL_OK")
</pallas_src>

<mosaic_0001>
module attributes {stable_mosaic.version = 11 : i64} {
  func.func @block_kernel(%arg0: i32, %arg1: i32, %arg2: memref<1x8x32xf32, #tpu.memory_space<vmem>>, %arg3: memref<1x8x32xf32, #tpu.memory_space<vmem>>, %arg4: memref<1x1x8xf32, #tpu.memory_space<vmem>>, %arg5: memref<32x32xf32, #tpu.memory_space<vmem>>, %arg6: memref<1x32xf32, #tpu.memory_space<vmem>>, %arg7: memref<32x64xf32, #tpu.memory_space<vmem>>, %arg8: memref<1x64xf32, #tpu.memory_space<vmem>>, %arg9: memref<32x32xf32, #tpu.memory_space<vmem>>, %arg10: memref<1x32xf32, #tpu.memory_space<vmem>>, %arg11: memref<1x32xf32, #tpu.memory_space<vmem>>, %arg12: memref<1x32xf32, #tpu.memory_space<vmem>>, %arg13: memref<32x64xf32, #tpu.memory_space<vmem>>, %arg14: memref<1x64xf32, #tpu.memory_space<vmem>>, %arg15: memref<64x32xf32, #tpu.memory_space<vmem>>, %arg16: memref<1x32xf32, #tpu.memory_space<vmem>>, %arg17: memref<1x32xf32, #tpu.memory_space<vmem>>, %arg18: memref<1x32xf32, #tpu.memory_space<vmem>>, %arg19: memref<1x8x32xf32, #tpu.memory_space<vmem>>, %arg20: memref<1x8x32xf32, #tpu.memory_space<vmem>>, %arg21: memref<1x4x8x8xf32, #tpu.memory_space<vmem>>, %arg22: memref<8x64xf32, #tpu.memory_space<vmem>>) attributes {dimension_semantics = [#tpu.dimension_semantics<parallel>, #tpu.dimension_semantics<arbitrary>], iteration_bounds = array<i64: 2, 1>, scalar_prefetch = 0 : i64, scratch_operands = 1 : i64, tpu.core_type = #tpu.core_type<tc>, window_params = [{transform_indices = @transform_0, window_bounds = array<i64: 1, 8, 32>}, {transform_indices = @transform_1, window_bounds = array<i64: 1, 8, 32>}, {transform_indices = @transform_2, window_bounds = array<i64: 1, 1, 8>}, {pipeline_mode = #tpu.pipeline_mode<synchronous>, transform_indices = @transform_3, window_bounds = array<i64: 32, 32>}, {pipeline_mode = #tpu.pipeline_mode<synchronous>, transform_indices = @transform_4, window_bounds = array<i64: 1, 32>}, {pipeline_mode = #tpu.pipeline_mode<synchronous>, transform_indices = @transform_5, window_bounds = array<i64: 32, 64>}, {pipeline_mode = #tpu.pipeline_mode<synchronous>, transform_indices = @transform_6, window_bounds = array<i64: 1, 64>}, {pipeline_mode = #tpu.pipeline_mode<synchronous>, transform_indices = @transform_7, window_bounds = array<i64: 32, 32>}, {pipeline_mode = #tpu.pipeline_mode<synchronous>, transform_indices = @transform_8, window_bounds = array<i64: 1, 32>}, {pipeline_mode = #tpu.pipeline_mode<synchronous>, transform_indices = @transform_9, window_bounds = array<i64: 1, 32>}, {pipeline_mode = #tpu.pipeline_mode<synchronous>, transform_indices = @transform_10, window_bounds = array<i64: 1, 32>}, {pipeline_mode = #tpu.pipeline_mode<synchronous>, transform_indices = @transform_11, window_bounds = array<i64: 32, 64>}, {pipeline_mode = #tpu.pipeline_mode<synchronous>, transform_indices = @transform_12, window_bounds = array<i64: 1, 64>}, {pipeline_mode = #tpu.pipeline_mode<synchronous>, transform_indices = @transform_13, window_bounds = array<i64: 64, 32>}, {pipeline_mode = #tpu.pipeline_mode<synchronous>, transform_indices = @transform_14, window_bounds = array<i64: 1, 32>}, {pipeline_mode = #tpu.pipeline_mode<synchronous>, transform_indices = @transform_15, window_bounds = array<i64: 1, 32>}, {pipeline_mode = #tpu.pipeline_mode<synchronous>, transform_indices = @transform_16, window_bounds = array<i64: 1, 32>}, {transform_indices = @transform_17, window_bounds = array<i64: 1, 8, 32>}, {transform_indices = @transform_18, window_bounds = array<i64: 1, 8, 32>}, {transform_indices = @transform_19, window_bounds = array<i64: 1, 4, 8, 8>}]} {
    %c0_i32 = arith.constant 0 : i32
    %0 = arith.cmpi eq, %arg1, %c0_i32 : i32
    %1 = arith.extui %0 : i1 to i32
    %c0_i32_0 = arith.constant 0 : i32
    %2 = arith.cmpi ne, %1, %c0_i32_0 : i32
    scf.if %2 {
      %c0_104 = arith.constant 0 : index
      %c0_105 = arith.constant 0 : index
      %c0_106 = arith.constant 0 : index
      %186 = vector.load %arg2[%c0_104, %c0_105, %c0_106] : memref<1x8x32xf32, #tpu.memory_space<vmem>>, vector<1x8x32xf32>
      %187 = vector.shape_cast %186 : vector<1x8x32xf32> to vector<8x32xf32>
      %c0_107 = arith.constant 0 : index
      %c0_108 = arith.constant 0 : index
      %188 = vector.load %arg7[%c0_107, %c0_108] : memref<32x64xf32, #tpu.memory_space<vmem>>, vector<32x64xf32>
      %cst_109 = arith.constant dense<0.000000e+00> : vector<8x64xf32>
      %189 = tpu.matmul %187, %188, %cst_109 {dimension_numbers = #tpu.dot_dimension_numbers<[1], [0], [0], [1], [0, 0, 1, 1], [], []>} : vector<8x32xf32>, vector<32x64xf32>, vector<8x64xf32> -> vector<8x64xf32>
      %c0_110 = arith.constant 0 : index
      %c0_111 = arith.constant 0 : index
      %190 = vector.load %arg8[%c0_110, %c0_111] : memref<1x64xf32, #tpu.memory_space<vmem>>, vector<1x64xf32>
      %191 = vector.broadcast %190 : vector<1x64xf32> to vector<8x64xf32>
      %192 = arith.addf %189, %191 : vector<8x64xf32>
      %c0_112 = arith.constant 0 : index
      %c0_113 = arith.constant 0 : index
      %193 = vector.load %arg22[%c0_112, %c0_113] : memref<8x64xf32, #tpu.memory_space<vmem>>, vector<8x64xf32>
      tpu.vector_store %arg22[%c0_112, %c0_113], %192 {strides = array<i32>} : memref<8x64xf32, #tpu.memory_space<vmem>>, vector<8x64xf32>,
    } else {
    }
    %c0 = arith.constant 0 : index
    %c0_1 = arith.constant 0 : index
    %c0_2 = arith.constant 0 : index
    %3 = vector.load %arg3[%c0, %c0_1, %c0_2] : memref<1x8x32xf32, #tpu.memory_space<vmem>>, vector<1x8x32xf32>
    %4 = vector.shape_cast %3 : vector<1x8x32xf32> to vector<8x32xf32>
    %c0_3 = arith.constant 0 : index
    %c0_4 = arith.constant 0 : index
    %c0_5 = arith.constant 0 : index
    %5 = vector.load %arg4[%c0_3, %c0_4, %c0_5] : memref<1x1x8xf32, #tpu.memory_space<vmem>>, vector<1x1x8xf32>
    %6 = vector.shape_cast %5 : vector<1x1x8xf32> to vector<1x8xf32>
    %c0_6 = arith.constant 0 : index
    %c0_7 = arith.constant 0 : index
    %7 = vector.load %arg5[%c0_6, %c0_7] : memref<32x32xf32, #tpu.memory_space<vmem>>, vector<32x32xf32>
    %cst = arith.constant dense<0.000000e+00> : vector<8x32xf32>
    %8 = tpu.matmul %4, %7, %cst {dimension_numbers = #tpu.dot_dimension_numbers<[1], [0], [0], [1], [0, 0, 1, 1], [], []>} : vector<8x32xf32>, vector<32x32xf32>, vector<8x32xf32> -> vector<8x32xf32>
    %c0_8 = arith.constant 0 : index
    %c0_9 = arith.constant 0 : index
    %9 = vector.load %arg6[%c0_8, %c0_9] : memref<1x32xf32, #tpu.memory_space<vmem>>, vector<1x32xf32>
    %10 = vector.broadcast %9 : vector<1x32xf32> to vector<8x32xf32>
    %11 = arith.addf %8, %10 : vector<8x32xf32>
    %cst_10 = arith.constant 0.000000e+00 : f32
    %12 = vector.broadcast %cst_10 : f32 to vector<8x32xf32>
    %13 = vector.extract_strided_slice %11 {offsets = [0, 0], sizes = [8, 8], strides = [1, 1]} : vector<8x32xf32> to vector<8x8xf32>
    %c0_11 = arith.constant 0 : index
    %c0_12 = arith.constant 0 : index
    %14 = vector.load %arg22[%c0_11, %c0_12] : memref<8x64xf32, #tpu.memory_space<vmem>>, vector<8x8xf32>
    %c0_13 = arith.constant 0 : index
    %c32 = arith.constant 32 : index
    %15 = vector.load %arg22[%c0_13, %c32] : memref<8x64xf32, #tpu.memory_space<vmem>>, vector<8x8xf32>
    %cst_14 = arith.constant dense<0.000000e+00> : vector<8x8xf32>
    %16 = tpu.matmul %13, %14, %cst_14 {dimension_numbers = #tpu.dot_dimension_numbers<[1], [1], [0], [0], [0, 0, 1, 0], [], []>} : vector<8x8xf32>, vector<8x8xf32>, vector<8x8xf32> -> vector<8x8xf32>
    %17 = vector.broadcast %6 : vector<1x8xf32> to vector<8x8xf32>
    %18 = arith.addf %16, %17 : vector<8x8xf32>
    %cst_15 = arith.constant dense<0xFF800000> : vector<8xf32>
    %19 = vector.multi_reduction <maximumf>, %18, %cst_15 [1] : vector<8x8xf32> to vector<8xf32>
    %20 = vector.shape_cast %19 : vector<8xf32> to vector<8x1xf32>
    %21 = vector.broadcast %20 : vector<8x1xf32> to vector<8x8xf32>
    %22 = arith.subf %18, %21 : vector<8x8xf32>
    %23 = math.exp %22 : vector<8x8xf32>
    %cst_16 = arith.constant dense<0.000000e+00> : vector<8xf32>
    %24 = vector.multi_reduction <add>, %23, %cst_16 [1] : vector<8x8xf32> to vector<8xf32>
    %25 = vector.shape_cast %24 : vector<8xf32> to vector<8x1xf32>
    %cst_17 = arith.constant 1.000000e+00 : f32
    %26 = vector.broadcast %cst_17 : f32 to vector<8x1xf32>
    %27 = arith.divf %26, %25 : vector<8x1xf32>
    %28 = vector.broadcast %27 : vector<8x1xf32> to vector<8x8xf32>
    %29 = arith.mulf %23, %28 : vector<8x8xf32>
    %c0_18 = arith.constant 0 : index
    %c0_19 = arith.constant 0 : index
    %c0_20 = arith.constant 0 : index
    %c0_21 = arith.constant 0 : index
    %30 = vector.load %arg21[%c0_18, %c0_19, %c0_20, %c0_21] : memref<1x4x8x8xf32, #tpu.memory_space<vmem>>, vector<1x1x8x8xf32>
    %31 = vector.shape_cast %30 : vector<1x1x8x8xf32> to vector<8x8xf32>
    %32 = vector.shape_cast %29 : vector<8x8xf32> to vector<1x1x8x8xf32>
    tpu.vector_store %arg21[%c0_18, %c0_19, %c0_20, %c0_21], %32 {strides = array<i32>} : memref<1x4x8x8xf32, #tpu.memory_space<vmem>>, vector<1x1x8x8xf32>,
    %cst_22 = arith.constant dense<0.000000e+00> : vector<8x8xf32>
    %33 = tpu.matmul %29, %15, %cst_22 {dimension_numbers = #tpu.dot_dimension_numbers<[1], [0], [0], [1], [0, 0, 1, 1], [], []>} : vector<8x8xf32>, vector<8x8xf32>, vector<8x8xf32> -> vector<8x8xf32>
    %c0_23 = arith.constant 0 : index
    %c0_24 = arith.constant 0 : index
    %34 = vector.load %arg9[%c0_23, %c0_24] : memref<32x32xf32, #tpu.memory_space<vmem>>, vector<8x32xf32>
    %cst_25 = arith.constant dense<0.000000e+00> : vector<8x32xf32>
    %35 = tpu.matmul %33, %34, %cst_25 {dimension_numbers = #tpu.dot_dimension_numbers<[1], [0], [0], [1], [0, 0, 1, 1], [], []>} : vector<8x8xf32>, vector<8x32xf32>, vector<8x32xf32> -> vector<8x32xf32>
    %36 = arith.addf %12, %35 : vector<8x32xf32>
    %37 = vector.extract_strided_slice %11 {offsets = [0, 8], sizes = [8, 8], strides = [1, 1]} : vector<8x32xf32> to vector<8x8xf32>
    %c0_26 = arith.constant 0 : index
    %c8 = arith.constant 8 : index
    %38 = vector.load %arg22[%c0_26, %c8] : memref<8x64xf32, #tpu.memory_space<vmem>>, vector<8x8xf32>
    %c0_27 = arith.constant 0 : index
    %c40 = arith.constant 40 : index
    %39 = vector.load %arg22[%c0_27, %c40] : memref<8x64xf32, #tpu.memory_space<vmem>>, vector<8x8xf32>
    %cst_28 = arith.constant dense<0.000000e+00> : vector<8x8xf32>
    %40 = tpu.matmul %37, %38, %cst_28 {dimension_numbers = #tpu.dot_dimension_numbers<[1], [1], [0], [0], [0, 0, 1, 0], [], []>} : vector<8x8xf32>, vector<8x8xf32>, vector<8x8xf32> -> vector<8x8xf32>
    %41 = vector.broadcast %6 : vector<1x8xf32> to vector<8x8xf32>
    %42 = arith.addf %40, %41 : vector<8x8xf32>
    %cst_29 = arith.constant dense<0xFF800000> : vector<8xf32>
    %43 = vector.multi_reduction <maximumf>, %42, %cst_29 [1] : vector<8x8xf32> to vector<8xf32>
    %44 = vector.shape_cast %43 : vector<8xf32> to vector<8x1xf32>
    %45 = vector.broadcast %44 : vector<8x1xf32> to vector<8x8xf32>
    %46 = arith.subf %42, %45 : vector<8x8xf32>
    %47 = math.exp %46 : vector<8x8xf32>
    %cst_30 = arith.constant dense<0.000000e+00> : vector<8xf32>
    %48 = vector.multi_reduction <add>, %47, %cst_30 [1] : vector<8x8xf32> to vector<8xf32>
    %49 = vector.shape_cast %48 : vector<8xf32> to vector<8x1xf32>
    %cst_31 = arith.constant 1.000000e+00 : f32
    %50 = vector.broadcast %cst_31 : f32 to vector<8x1xf32>
    %51 = arith.divf %50, %49 : vector<8x1xf32>
    %52 = vector.broadcast %51 : vector<8x1xf32> to vector<8x8xf32>
    %53 = arith.mulf %47, %52 : vector<8x8xf32>
    %c0_32 = arith.constant 0 : index
    %c1 = arith.constant 1 : index
    %c0_33 = arith.constant 0 : index
    %c0_34 = arith.constant 0 : index
    %54 = vector.load %arg21[%c0_32, %c1, %c0_33, %c0_34] : memref<1x4x8x8xf32, #tpu.memory_space<vmem>>, vector<1x1x8x8xf32>
    %55 = vector.shape_cast %54 : vector<1x1x8x8xf32> to vector<8x8xf32>
    %56 = vector.shape_cast %53 : vector<8x8xf32> to vector<1x1x8x8xf32>
    tpu.vector_store %arg21[%c0_32, %c1, %c0_33, %c0_34], %56 {strides = array<i32>} : memref<1x4x8x8xf32, #tpu.memory_space<vmem>>, vector<1x1x8x8xf32>,
    %cst_35 = arith.constant dense<0.000000e+00> : vector<8x8xf32>
    %57 = tpu.matmul %53, %39, %cst_35 {dimension_numbers = #tpu.dot_dimension_numbers<[1], [0], [0], [1], [0, 0, 1, 1], [], []>} : vector<8x8xf32>, vector<8x8xf32>, vector<8x8xf32> -> vector<8x8xf32>
    %c8_36 = arith.constant 8 : index
    %c0_37 = arith.constant 0 : index
    %58 = vector.load %arg9[%c8_36, %c0_37] : memref<32x32xf32, #tpu.memory_space<vmem>>, vector<8x32xf32>
    %cst_38 = arith.constant dense<0.000000e+00> : vector<8x32xf32>
    %59 = tpu.matmul %57, %58, %cst_38 {dimension_numbers = #tpu.dot_dimension_numbers<[1], [0], [0], [1], [0, 0, 1, 1], [], []>} : vector<8x8xf32>, vector<8x32xf32>, vector<8x32xf32> -> vector<8x32xf32>
    %60 = arith.addf %36, %59 : vector<8x32xf32>
    %61 = vector.extract_strided_slice %11 {offsets = [0, 16], sizes = [8, 8], strides = [1, 1]} : vector<8x32xf32> to vector<8x8xf32>
    %c0_39 = arith.constant 0 : index
    %c16 = arith.constant 16 : index
    %62 = vector.load %arg22[%c0_39, %c16] : memref<8x64xf32, #tpu.memory_space<vmem>>, vector<8x8xf32>
    %c0_40 = arith.constant 0 : index
    %c48 = arith.constant 48 : index
    %63 = vector.load %arg22[%c0_40, %c48] : memref<8x64xf32, #tpu.memory_space<vmem>>, vector<8x8xf32>
    %cst_41 = arith.constant dense<0.000000e+00> : vector<8x8xf32>
    %64 = tpu.matmul %61, %62, %cst_41 {dimension_numbers = #tpu.dot_dimension_numbers<[1], [1], [0], [0], [0, 0, 1, 0], [], []>} : vector<8x8xf32>, vector<8x8xf32>, vector<8x8xf32> -> vector<8x8xf32>
    %65 = vector.broadcast %6 : vector<1x8xf32> to vector<8x8xf32>
    %66 = arith.addf %64, %65 : vector<8x8xf32>
    %cst_42 = arith.constant dense<0xFF800000> : vector<8xf32>
    %67 = vector.multi_reduction <maximumf>, %66, %cst_42 [1] : vector<8x8xf32> to vector<8xf32>
    %68 = vector.shape_cast %67 : vector<8xf32> to vector<8x1xf32>
    %69 = vector.broadcast %68 : vector<8x1xf32> to vector<8x8xf32>
    %70 = arith.subf %66, %69 : vector<8x8xf32>
    %71 = math.exp %70 : vector<8x8xf32>
    %cst_43 = arith.constant dense<0.000000e+00> : vector<8xf32>
    %72 = vector.multi_reduction <add>, %71, %cst_43 [1] : vector<8x8xf32> to vector<8xf32>
    %73 = vector.shape_cast %72 : vector<8xf32> to vector<8x1xf32>
    %cst_44 = arith.constant 1.000000e+00 : f32
    %74 = vector.broadcast %cst_44 : f32 to vector<8x1xf32>
    %75 = arith.divf %74, %73 : vector<8x1xf32>
    %76 = vector.broadcast %75 : vector<8x1xf32> to vector<8x8xf32>
    %77 = arith.mulf %71, %76 : vector<8x8xf32>
    %c0_45 = arith.constant 0 : index
    %c2 = arith.constant 2 : index
    %c0_46 = arith.constant 0 : index
    %c0_47 = arith.constant 0 : index
    %78 = vector.load %arg21[%c0_45, %c2, %c0_46, %c0_47] : memref<1x4x8x8xf32, #tpu.memory_space<vmem>>, vector<1x1x8x8xf32>
    %79 = vector.shape_cast %78 : vector<1x1x8x8xf32> to vector<8x8xf32>
    %80 = vector.shape_cast %77 : vector<8x8xf32> to vector<1x1x8x8xf32>
    tpu.vector_store %arg21[%c0_45, %c2, %c0_46, %c0_47], %80 {strides = array<i32>} : memref<1x4x8x8xf32, #tpu.memory_space<vmem>>, vector<1x1x8x8xf32>,
    %cst_48 = arith.constant dense<0.000000e+00> : vector<8x8xf32>
    %81 = tpu.matmul %77, %63, %cst_48 {dimension_numbers = #tpu.dot_dimension_numbers<[1], [0], [0], [1], [0, 0, 1, 1], [], []>} : vector<8x8xf32>, vector<8x8xf32>, vector<8x8xf32> -> vector<8x8xf32>
    %c16_49 = arith.constant 16 : index
    %c0_50 = arith.constant 0 : index
    %82 = vector.load %arg9[%c16_49, %c0_50] : memref<32x32xf32, #tpu.memory_space<vmem>>, vector<8x32xf32>
    %cst_51 = arith.constant dense<0.000000e+00> : vector<8x32xf32>
    %83 = tpu.matmul %81, %82, %cst_51 {dimension_numbers = #tpu.dot_dimension_numbers<[1], [0], [0], [1], [0, 0, 1, 1], [], []>} : vector<8x8xf32>, vector<8x32xf32>, vector<8x32xf32> -> vector<8x32xf32>
    %84 = arith.addf %60, %83 : vector<8x32xf32>
    %85 = vector.extract_strided_slice %11 {offsets = [0, 24], sizes = [8, 8], strides = [1, 1]} : vector<8x32xf32> to vector<8x8xf32>
    %c0_52 = arith.constant 0 : index
    %c24 = arith.constant 24 : index
    %86 = vector.load %arg22[%c0_52, %c24] : memref<8x64xf32, #tpu.memory_space<vmem>>, vector<8x8xf32>
    %c0_53 = arith.constant 0 : index
    %c56 = arith.constant 56 : index
    %87 = vector.load %arg22[%c0_53, %c56] : memref<8x64xf32, #tpu.memory_space<vmem>>, vector<8x8xf32>
    %cst_54 = arith.constant dense<0.000000e+00> : vector<8x8xf32>
    %88 = tpu.matmul %85, %86, %cst_54 {dimension_numbers = #tpu.dot_dimension_numbers<[1], [1], [0], [0], [0, 0, 1, 0], [], []>} : vector<8x8xf32>, vector<8x8xf32>, vector<8x8xf32> -> vector<8x8xf32>
    %89 = vector.broadcast %6 : vector<1x8xf32> to vector<8x8xf32>
    %90 = arith.addf %88, %89 : vector<8x8xf32>
    %cst_55 = arith.constant dense<0xFF800000> : vector<8xf32>
    %91 = vector.multi_reduction <maximumf>, %90, %cst_55 [1] : vector<8x8xf32> to vector<8xf32>
    %92 = vector.shape_cast %91 : vector<8xf32> to vector<8x1xf32>
    %93 = vector.broadcast %92 : vector<8x1xf32> to vector<8x8xf32>
    %94 = arith.subf %90, %93 : vector<8x8xf32>
    %95 = math.exp %94 : vector<8x8xf32>
    %cst_56 = arith.constant dense<0.000000e+00> : vector<8xf32>
    %96 = vector.multi_reduction <add>, %95, %cst_56 [1] : vector<8x8xf32> to vector<8xf32>
    %97 = vector.shape_cast %96 : vector<8xf32> to vector<8x1xf32>
    %cst_57 = arith.constant 1.000000e+00 : f32
    %98 = vector.broadcast %cst_57 : f32 to vector<8x1xf32>
    %99 = arith.divf %98, %97 : vector<8x1xf32>
    %100 = vector.broadcast %99 : vector<8x1xf32> to vector<8x8xf32>
    %101 = arith.mulf %95, %100 : vector<8x8xf32>
    %c0_58 = arith.constant 0 : index
    %c3 = arith.constant 3 : index
    %c0_59 = arith.constant 0 : index
    %c0_60 = arith.constant 0 : index
    %102 = vector.load %arg21[%c0_58, %c3, %c0_59, %c0_60] : memref<1x4x8x8xf32, #tpu.memory_space<vmem>>, vector<1x1x8x8xf32>
    %103 = vector.shape_cast %102 : vector<1x1x8x8xf32> to vector<8x8xf32>
    %104 = vector.shape_cast %101 : vector<8x8xf32> to vector<1x1x8x8xf32>
    tpu.vector_store %arg21[%c0_58, %c3, %c0_59, %c0_60], %104 {strides = array<i32>} : memref<1x4x8x8xf32, #tpu.memory_space<vmem>>, vector<1x1x8x8xf32>,
    %cst_61 = arith.constant dense<0.000000e+00> : vector<8x8xf32>
    %105 = tpu.matmul %101, %87, %cst_61 {dimension_numbers = #tpu.dot_dimension_numbers<[1], [0], [0], [1], [0, 0, 1, 1], [], []>} : vector<8x8xf32>, vector<8x8xf32>, vector<8x8xf32> -> vector<8x8xf32>
    %c24_62 = arith.constant 24 : index
    %c0_63 = arith.constant 0 : index
    %106 = vector.load %arg9[%c24_62, %c0_63] : memref<32x32xf32, #tpu.memory_space<vmem>>, vector<8x32xf32>
    %cst_64 = arith.constant dense<0.000000e+00> : vector<8x32xf32>
    %107 = tpu.matmul %105, %106, %cst_64 {dimension_numbers = #tpu.dot_dimension_numbers<[1], [0], [0], [1], [0, 0, 1, 1], [], []>} : vector<8x8xf32>, vector<8x32xf32>, vector<8x32xf32> -> vector<8x32xf32>
    %108 = arith.addf %84, %107 : vector<8x32xf32>
    %c0_65 = arith.constant 0 : index
    %c0_66 = arith.constant 0 : index
    %109 = vector.load %arg10[%c0_65, %c0_66] : memref<1x32xf32, #tpu.memory_space<vmem>>, vector<1x32xf32>
    %110 = vector.broadcast %109 : vector<1x32xf32> to vector<8x32xf32>
    %111 = arith.addf %108, %110 : vector<8x32xf32>
    %112 = arith.addf %4, %111 : vector<8x32xf32>
    %c0_67 = arith.constant 0 : index
    %c0_68 = arith.constant 0 : index
    %113 = vector.load %arg11[%c0_67, %c0_68] : memref<1x32xf32, #tpu.memory_space<vmem>>, vector<1x32xf32>
    %c0_69 = arith.constant 0 : index
    %c0_70 = arith.constant 0 : index
    %114 = vector.load %arg12[%c0_69, %c0_70] : memref<1x32xf32, #tpu.memory_space<vmem>>, vector<1x32xf32>
    %cst_71 = arith.constant dense<0.000000e+00> : vector<8xf32>
    %115 = vector.multi_reduction <add>, %112, %cst_71 [1] : vector<8x32xf32> to vector<8xf32>
    %116 = vector.shape_cast %115 : vector<8xf32> to vector<8x1xf32>
    %cst_72 = arith.constant 3.200000e+01 : f32
    %117 = vector.broadcast %cst_72 : f32 to vector<8x1xf32>
    %118 = arith.divf %116, %117 : vector<8x1xf32>
    %119 = vector.broadcast %118 : vector<8x1xf32> to vector<8x32xf32>
    %120 = arith.subf %112, %119 : vector<8x32xf32>
    %121 = arith.mulf %120, %120 : vector<8x32xf32>
    %cst_73 = arith.constant dense<0.000000e+00> : vector<8xf32>
    %122 = vector.multi_reduction <add>, %121, %cst_73 [1] : vector<8x32xf32> to vector<8xf32>
    %123 = vector.shape_cast %122 : vector<8xf32> to vector<8x1xf32>
    %cst_74 = arith.constant 3.200000e+01 : f32
    %124 = vector.broadcast %cst_74 : f32 to vector<8x1xf32>
    %125 = arith.divf %123, %124 : vector<8x1xf32>
    %126 = vector.broadcast %118 : vector<8x1xf32> to vector<8x32xf32>
    %127 = arith.subf %112, %126 : vector<8x32xf32>
    %cst_75 = arith.constant 9.99999996E-13 : f32
    %128 = vector.broadcast %cst_75 : f32 to vector<8x1xf32>
    %129 = arith.addf %125, %128 : vector<8x1xf32>
    %130 = math.rsqrt %129 : vector<8x1xf32>
    %131 = vector.broadcast %130 : vector<8x1xf32> to vector<8x32xf32>
    %132 = arith.mulf %127, %131 : vector<8x32xf32>
    %133 = vector.broadcast %113 : vector<1x32xf32> to vector<8x32xf32>
    %134 = arith.mulf %132, %133 : vector<8x32xf32>
    %135 = vector.broadcast %114 : vector<1x32xf32> to vector<8x32xf32>
    %136 = arith.addf %134, %135 : vector<8x32xf32>
    %c0_76 = arith.constant 0 : index
    %c0_77 = arith.constant 0 : index
    %c0_78 = arith.constant 0 : index
    %137 = vector.load %arg20[%c0_76, %c0_77, %c0_78] : memref<1x8x32xf32, #tpu.memory_space<vmem>>, vector<1x8x32xf32>
    %138 = vector.shape_cast %137 : vector<1x8x32xf32> to vector<8x32xf32>
    %139 = vector.shape_cast %136 : vector<8x32xf32> to vector<1x8x32xf32>
    tpu.vector_store %arg20[%c0_76, %c0_77, %c0_78], %139 {strides = array<i32>} : memref<1x8x32xf32, #tpu.memory_space<vmem>>, vector<1x8x32xf32>,
    %c0_79 = arith.constant 0 : index
    %c0_80 = arith.constant 0 : index
    %140 = vector.load %arg13[%c0_79, %c0_80] : memref<32x64xf32, #tpu.memory_space<vmem>>, vector<32x64xf32>
    %cst_81 = arith.constant dense<0.000000e+00> : vector<8x64xf32>
    %141 = tpu.matmul %136, %140, %cst_81 {dimension_numbers = #tpu.dot_dimension_numbers<[1], [0], [0], [1], [0, 0, 1, 1], [], []>} : vector<8x32xf32>, vector<32x64xf32>, vector<8x64xf32> -> vector<8x64xf32>
    %c0_82 = arith.constant 0 : index
    %c0_83 = arith.constant 0 : index
    %142 = vector.load %arg14[%c0_82, %c0_83] : memref<1x64xf32, #tpu.memory_space<vmem>>, vector<1x64xf32>
    %143 = vector.broadcast %142 : vector<1x64xf32> to vector<8x64xf32>
    %144 = arith.addf %141, %143 : vector<8x64xf32>
    %cst_84 = arith.constant 5.000000e-01 : f32
    %145 = vector.broadcast %cst_84 : f32 to vector<8x64xf32>
    %146 = arith.mulf %145, %144 : vector<8x64xf32>
    %cst_85 = arith.constant 0.707106769 : f32
    %147 = vector.broadcast %cst_85 : f32 to vector<8x64xf32>
    %148 = arith.mulf %144, %147 : vector<8x64xf32>
    %149 = math.erf %148 : vector<8x64xf32>
    %cst_86 = arith.constant 1.000000e+00 : f32
    %150 = vector.broadcast %cst_86 : f32 to vector<8x64xf32>
    %151 = arith.addf %150, %149 : vector<8x64xf32>
    %152 = arith.mulf %146, %151 : vector<8x64xf32>
    %c0_87 = arith.constant 0 : index
    %c0_88 = arith.constant 0 : index
    %153 = vector.load %arg15[%c0_87, %c0_88] : memref<64x32xf32, #tpu.memory_space<vmem>>, vector<64x32xf32>
    %cst_89 = arith.constant dense<0.000000e+00> : vector<8x32xf32>
    %154 = tpu.matmul %152, %153, %cst_89 {dimension_numbers = #tpu.dot_dimension_numbers<[1], [0], [0], [1], [0, 0, 1, 1], [], []>} : vector<8x64xf32>, vector<64x32xf32>, vector<8x32xf32> -> vector<8x32xf32>
    %c0_90 = arith.constant 0 : index
    %c0_91 = arith.constant 0 : index
    %155 = vector.load %arg16[%c0_90, %c0_91] : memref<1x32xf32, #tpu.memory_space<vmem>>, vector<1x32xf32>
    %156 = vector.broadcast %155 : vector<1x32xf32> to vector<8x32xf32>
    %157 = arith.addf %154, %156 : vector<8x32xf32>
    %158 = arith.addf %136, %157 : vector<8x32xf32>
    %c0_92 = arith.constant 0 : index
    %c0_93 = arith.constant 0 : index
    %159 = vector.load %arg17[%c0_92, %c0_93] : memref<1x32xf32, #tpu.memory_space<vmem>>, vector<1x32xf32>
    %c0_94 = arith.constant 0 : index
    %c0_95 = arith.constant 0 : index
    %160 = vector.load %arg18[%c0_94, %c0_95] : memref<1x32xf32, #tpu.memory_space<vmem>>, vector<1x32xf32>
    %cst_96 = arith.constant dense<0.000000e+00> : vector<8xf32>
    %161 = vector.multi_reduction <add>, %158, %cst_96 [1] : vector<8x32xf32> to vector<8xf32>
    %162 = vector.shape_cast %161 : vector<8xf32> to vector<8x1xf32>
    %cst_97 = arith.constant 3.200000e+01 : f32
    %163 = vector.broadcast %cst_97 : f32 to vector<8x1xf32>
    %164 = arith.divf %162, %163 : vector<8x1xf32>
    %165 = vector.broadcast %164 : vector<8x1xf32> to vector<8x32xf32>
    %166 = arith.subf %158, %165 : vector<8x32xf32>
    %167 = arith.mulf %166, %166 : vector<8x32xf32>
    %cst_98 = arith.constant dense<0.000000e+00> : vector<8xf32>
    %168 = vector.multi_reduction <add>, %167, %cst_98 [1] : vector<8x32xf32> to vector<8xf32>
    %169 = vector.shape_cast %168 : vector<8xf32> to vector<8x1xf32>
    %cst_99 = arith.constant 3.200000e+01 : f32
    %170 = vector.broadcast %cst_99 : f32 to vector<8x1xf32>
    %171 = arith.divf %169, %170 : vector<8x1xf32>
    %172 = vector.broadcast %164 : vector<8x1xf32> to vector<8x32xf32>
    %173 = arith.subf %158, %172 : vector<8x32xf32>
    %cst_100 = arith.constant 9.99999974E-6 : f32
    %174 = vector.broadcast %cst_100 : f32 to vector<8x1xf32>
    %175 = arith.addf %171, %174 : vector<8x1xf32>
    %176 = math.rsqrt %175 : vector<8x1xf32>
    %177 = vector.broadcast %176 : vector<8x1xf32> to vector<8x32xf32>
    %178 = arith.mulf %173, %177 : vector<8x32xf32>
    %179 = vector.broadcast %159 : vector<1x32xf32> to vector<8x32xf32>
    %180 = arith.mulf %178, %179 : vector<8x32xf32>
    %181 = vector.broadcast %160 : vector<1x32xf32> to vector<8x32xf32>
    %182 = arith.addf %180, %181 : vector<8x32xf32>
    %c0_101 = arith.constant 0 : index
    %c0_102 = arith.constant 0 : index
    %c0_103 = arith.constant 0 : index
    %183 = vector.load %arg19[%c0_101, %c0_102, %c0_103] : memref<1x8x32xf32, #tpu.memory_space<vmem>>, vector<1x8x32xf32>
    %184 = vector.shape_cast %183 : vector<1x8x32xf32> to vector<8x32xf32>
    %185 = vector.shape_cast %182 : vector<8x32xf32> to vector<1x8x32xf32>
    tpu.vector_store %arg19[%c0_101, %c0_102, %c0_103], %185 {strides = array<i32>} : memref<1x8x32xf32, #tpu.memory_space<vmem>>, vector<1x8x32xf32>,
    return
  }
  func.func @transform_0(%arg0: i32, %arg1: i32) -> (i32, i32, i32) {
    %c0_i32 = arith.constant 0 : i32
    %c0_i32_0 = arith.constant 0 : i32
    %c0_i32_1 = arith.constant 0 : i32
    return %arg0, %c0_i32, %c0_i32_0 : i32, i32, i32
  }
  func.func @transform_1(%arg0: i32, %arg1: i32) -> (i32, i32, i32) {
    %c0_i32 = arith.constant 0 : i32
    %c0_i32_0 = arith.constant 0 : i32
    return %arg0, %arg1, %c0_i32 : i32, i32, i32
  }
  func.func @transform_2(%arg0: i32, %arg1: i32) -> (i32, i32, i32) {
    %c0_i32 = arith.constant 0 : i32
    %c0_i32_0 = arith.constant 0 : i32
    %c0_i32_1 = arith.constant 0 : i32
    return %arg0, %c0_i32, %c0_i32_0 : i32, i32, i32
  }
  func.func @transform_3(%arg0: i32, %arg1: i32) -> (i32, i32) {
    %c0_i32 = arith.constant 0 : i32
    %c0_i32_0 = arith.constant 0 : i32
    %c0_i32_1 = arith.constant 0 : i32
    return %c0_i32, %c0_i32_0 : i32, i32
  }
  func.func @transform_4(%arg0: i32, %arg1: i32) -> (i32, i32) {
    %c0_i32 = arith.constant 0 : i32
    %c0_i32_0 = arith.constant 0 : i32
    %c0_i32_1 = arith.constant 0 : i32
    return %c0_i32, %c0_i32_0 : i32, i32
  }
  func.func @transform_5(%arg0: i32, %arg1: i32) -> (i32, i32) {
    %c0_i32 = arith.constant 0 : i32
    %c0_i32_0 = arith.constant 0 : i32
    %c0_i32_1 = arith.constant 0 : i32
    return %c0_i32, %c0_i32_0 : i32, i32
  }
  func.func @transform_6(%arg0: i32, %arg1: i32) -> (i32, i32) {
    %c0_i32 = arith.constant 0 : i32
    %c0_i32_0 = arith.constant 0 : i32
    %c0_i32_1 = arith.constant 0 : i32
    return %c0_i32, %c0_i32_0 : i32, i32
  }
  func.func @transform_7(%arg0: i32, %arg1: i32) -> (i32, i32) {
    %c0_i32 = arith.constant 0 : i32
    %c0_i32_0 = arith.constant 0 : i32
    %c0_i32_1 = arith.constant 0 : i32
    return %c0_i32, %c0_i32_0 : i32, i32
  }
  func.func @transform_8(%arg0: i32, %arg1: i32) -> (i32, i32) {
    %c0_i32 = arith.constant 0 : i32
    %c0_i32_0 = arith.constant 0 : i32
    %c0_i32_1 = arith.constant 0 : i32
    return %c0_i32, %c0_i32_0 : i32, i32
  }
  func.func @transform_9(%arg0: i32, %arg1: i32) -> (i32, i32) {
    %c0_i32 = arith.constant 0 : i32
    %c0_i32_0 = arith.constant 0 : i32
    %c0_i32_1 = arith.constant 0 : i32
    return %c0_i32, %c0_i32_0 : i32, i32
  }
  func.func @transform_10(%arg0: i32, %arg1: i32) -> (i32, i32) {
    %c0_i32 = arith.constant 0 : i32
    %c0_i32_0 = arith.constant 0 : i32
    %c0_i32_1 = arith.constant 0 : i32
    return %c0_i32, %c0_i32_0 : i32, i32
  }
  func.func @transform_11(%arg0: i32, %arg1: i32) -> (i32, i32) {
    %c0_i32 = arith.constant 0 : i32
    %c0_i32_0 = arith.constant 0 : i32
    %c0_i32_1 = arith.constant 0 : i32
    return %c0_i32, %c0_i32_0 : i32, i32
  }
  func.func @transform_12(%arg0: i32, %arg1: i32) -> (i32, i32) {
    %c0_i32 = arith.constant 0 : i32
    %c0_i32_0 = arith.constant 0 : i32
    %c0_i32_1 = arith.constant 0 : i32
    return %c0_i32, %c0_i32_0 : i32, i32
  }
  func.func @transform_13(%arg0: i32, %arg1: i32) -> (i32, i32) {
    %c0_i32 = arith.constant 0 : i32
    %c0_i32_0 = arith.constant 0 : i32
    %c0_i32_1 = arith.constant 0 : i32
    return %c0_i32, %c0_i32_0 : i32, i32
  }
  func.func @transform_14(%arg0: i32, %arg1: i32) -> (i32, i32) {
    %c0_i32 = arith.constant 0 : i32
    %c0_i32_0 = arith.constant 0 : i32
    %c0_i32_1 = arith.constant 0 : i32
    return %c0_i32, %c0_i32_0 : i32, i32
  }
  func.func @transform_15(%arg0: i32, %arg1: i32) -> (i32, i32) {
    %c0_i32 = arith.constant 0 : i32
    %c0_i32_0 = arith.constant 0 : i32
    %c0_i32_1 = arith.constant 0 : i32
    return %c0_i32, %c0_i32_0 : i32, i32
  }
  func.func @transform_16(%arg0: i32, %arg1: i32) -> (i32, i32) {
    %c0_i32 = arith.constant 0 : i32
    %c0_i32_0 = arith.constant 0 : i32
    %c0_i32_1 = arith.constant 0 : i32
    return %c0_i32, %c0_i32_0 : i32, i32
  }
  func.func @transform_17(%arg0: i32, %arg1: i32) -> (i32, i32, i32) {
    %c0_i32 = arith.constant 0 : i32
    %c0_i32_0 = arith.constant 0 : i32
    return %arg0, %arg1, %c0_i32 : i32, i32, i32
  }
  func.func @transform_18(%arg0: i32, %arg1: i32) -> (i32, i32, i32) {
    %c0_i32 = arith.constant 0 : i32
    %c0_i32_0 = arith.constant 0 : i32
    return %arg0, %arg1, %c0_i32 : i32, i32, i32
  }
  func.func @transform_19(%arg0: i32, %arg1: i32) -> (i32, i32, i32, i32) {
    %c0_i32 = arith.constant 0 : i32
    %c0_i32_0 = arith.constant 0 : i32
    %c0_i32_1 = arith.constant 0 : i32
    return %arg0, %c0_i32, %arg1, %c0_i32_0 : i32, i32, i32, i32
  }
}

module attributes {stable_mosaic.version = 11 : i64} {
  func.func @block_kernel(%arg0: i32, %arg1: i32, %arg2: memref<1x8x32xf32, #tpu.memory_space<vmem>>, %arg3: memref<1x8x32xf32, #tpu.memory_space<vmem>>, %arg4: memref<1x1x8xf32, #tpu.memory_space<vmem>>, %arg5: memref<32x32xf32, #tpu.memory_space<vmem>>, %arg6: memref<1x32xf32, #tpu.memory_space<vmem>>, %arg7: memref<32x64xf32, #tpu.memory_space<vmem>>, %arg8: memref<1x64xf32, #tpu.memory_space<vmem>>, %arg9: memref<32x32xf32, #tpu.memory_space<vmem>>, %arg10: memref<1x32xf32, #tpu.memory_space<vmem>>, %arg11: memref<1x32xf32, #tpu.memory_space<vmem>>, %arg12: memref<1x32xf32, #tpu.memory_space<vmem>>, %arg13: memref<32x64xf32, #tpu.memory_space<vmem>>, %arg14: memref<1x64xf32, #tpu.memory_space<vmem>>, %arg15: memref<64x32xf32, #tpu.memory_space<vmem>>, %arg16: memref<1x32xf32, #tpu.memory_space<vmem>>, %arg17: memref<1x32xf32, #tpu.memory_space<vmem>>, %arg18: memref<1x32xf32, #tpu.memory_space<vmem>>, %arg19: memref<1x8x32xf32, #tpu.memory_space<vmem>>, %arg20: memref<1x8x32xf32, #tpu.memory_space<vmem>>, %arg21: memref<1x4x8x8xf32, #tpu.memory_space<vmem>>, %arg22: memref<8x64xf32, #tpu.memory_space<vmem>>) attributes {dimension_semantics = [#tpu.dimension_semantics<parallel>, #tpu.dimension_semantics<arbitrary>], iteration_bounds = array<i64: 2, 1>, scalar_prefetch = 0 : i64, scratch_operands = 1 : i64, tpu.core_type = #tpu.core_type<tc>, window_params = [{transform_indices = @transform_0, window_bounds = array<i64: 1, 8, 32>}, {transform_indices = @transform_1, window_bounds = array<i64: 1, 8, 32>}, {transform_indices = @transform_2, window_bounds = array<i64: 1, 1, 8>}, {pipeline_mode = #tpu.pipeline_mode<synchronous>, transform_indices = @transform_3, window_bounds = array<i64: 32, 32>}, {pipeline_mode = #tpu.pipeline_mode<synchronous>, transform_indices = @transform_4, window_bounds = array<i64: 1, 32>}, {pipeline_mode = #tpu.pipeline_mode<synchronous>, transform_indices = @transform_5, window_bounds = array<i64: 32, 64>}, {pipeline_mode = #tpu.pipeline_mode<synchronous>, transform_indices = @transform_6, window_bounds = array<i64: 1, 64>}, {pipeline_mode = #tpu.pipeline_mode<synchronous>, transform_indices = @transform_7, window_bounds = array<i64: 32, 32>}, {pipeline_mode = #tpu.pipeline_mode<synchronous>, transform_indices = @transform_8, window_bounds = array<i64: 1, 32>}, {pipeline_mode = #tpu.pipeline_mode<synchronous>, transform_indices = @transform_9, window_bounds = array<i64: 1, 32>}, {pipeline_mode = #tpu.pipeline_mode<synchronous>, transform_indices = @transform_10, window_bounds = array<i64: 1, 32>}, {pipeline_mode = #tpu.pipeline_mode<synchronous>, transform_indices = @transform_11, window_bounds = array<i64: 32, 64>}, {pipeline_mode = #tpu.pipeline_mode<synchronous>, transform_indices = @transform_12, window_bounds = array<i64: 1, 64>}, {pipeline_mode = #tpu.pipeline_mode<synchronous>, transform_indices = @transform_13, window_bounds = array<i64: 64, 32>}, {pipeline_mode = #tpu.pipeline_mode<synchronous>, transform_indices = @transform_14, window_bounds = array<i64: 1, 32>}, {pipeline_mode = #tpu.pipeline_mode<synchronous>, transform_indices = @transform_15, window_bounds = array<i64: 1, 32>}, {pipeline_mode = #tpu.pipeline_mode<synchronous>, transform_indices = @transform_16, window_bounds = array<i64: 1, 32>}, {transform_indices = @transform_17, window_bounds = array<i64: 1, 8, 32>}, {transform_indices = @transform_18, window_bounds = array<i64: 1, 8, 32>}, {transform_indices = @transform_19, window_bounds = array<i64: 1, 4, 8, 8>}]} {
    %c0_i32 = arith.constant 0 : i32
    %0 = arith.cmpi eq, %arg1, %c0_i32 : i32
    %1 = arith.extui %0 : i1 to i32
    %c0_i32_0 = arith.constant 0 : i32
    %2 = arith.cmpi ne, %1, %c0_i32_0 : i32
    scf.if %2 {
      %c0_104 = arith.constant 0 : index
      %c0_105 = arith.constant 0 : index
      %c0_106 = arith.constant 0 : index
      %186 = vector.load %arg2[%c0_104, %c0_105, %c0_106] : memref<1x8x32xf32, #tpu.memory_space<vmem>>, vector<1x8x32xf32>
      %187 = vector.shape_cast %186 : vector<1x8x32xf32> to vector<8x32xf32>
      %c0_107 = arith.constant 0 : index
      %c0_108 = arith.constant 0 : index
      %188 = vector.load %arg7[%c0_107, %c0_108] : memref<32x64xf32, #tpu.memory_space<vmem>>, vector<32x64xf32>
      %cst_109 = arith.constant dense<0.000000e+00> : vector<8x64xf32>
      %189 = tpu.matmul %187, %188, %cst_109 {dimension_numbers = #tpu.dot_dimension_numbers<[1], [0], [0], [1], [0, 0, 1, 1], [], []>} : vector<8x32xf32>, vector<32x64xf32>, vector<8x64xf32> -> vector<8x64xf32>
      %c0_110 = arith.constant 0 : index
      %c0_111 = arith.constant 0 : index
      %190 = vector.load %arg8[%c0_110, %c0_111] : memref<1x64xf32, #tpu.memory_space<vmem>>, vector<1x64xf32>
      %191 = vector.broadcast %190 : vector<1x64xf32> to vector<8x64xf32>
      %192 = arith.addf %189, %191 : vector<8x64xf32>
      %c0_112 = arith.constant 0 : index
      %c0_113 = arith.constant 0 : index
      %193 = vector.load %arg22[%c0_112, %c0_113] : memref<8x64xf32, #tpu.memory_space<vmem>>, vector<8x64xf32>
      tpu.vector_store %arg22[%c0_112, %c0_113], %192 {strides = array<i32>} : memref<8x64xf32, #tpu.memory_space<vmem>>, vector<8x64xf32>,
    } else {
    }
    %c0 = arith.constant 0 : index
    %c0_1 = arith.constant 0 : index
    %c0_2 = arith.constant 0 : index
    %3 = vector.load %arg3[%c0, %c0_1, %c0_2] : memref<1x8x32xf32, #tpu.memory_space<vmem>>, vector<1x8x32xf32>
    %4 = vector.shape_cast %3 : vector<1x8x32xf32> to vector<8x32xf32>
    %c0_3 = arith.constant 0 : index
    %c0_4 = arith.constant 0 : index
    %c0_5 = arith.constant 0 : index
    %5 = vector.load %arg4[%c0_3, %c0_4, %c0_5] : memref<1x1x8xf32, #tpu.memory_space<vmem>>, vector<1x1x8xf32>
    %6 = vector.shape_cast %5 : vector<1x1x8xf32> to vector<1x8xf32>
    %c0_6 = arith.constant 0 : index
    %c0_7 = arith.constant 0 : index
    %7 = vector.load %arg5[%c0_6, %c0_7] : memref<32x32xf32, #tpu.memory_space<vmem>>, vector<32x32xf32>
    %cst = arith.constant dense<0.000000e+00> : vector<8x32xf32>
    %8 = tpu.matmul %4, %7, %cst {dimension_numbers = #tpu.dot_dimension_numbers<[1], [0], [0], [1], [0, 0, 1, 1], [], []>} : vector<8x32xf32>, vector<32x32xf32>, vector<8x32xf32> -> vector<8x32xf32>
    %c0_8 = arith.constant 0 : index
    %c0_9 = arith.constant 0 : index
    %9 = vector.load %arg6[%c0_8, %c0_9] : memref<1x32xf32, #tpu.memory_space<vmem>>, vector<1x32xf32>
    %10 = vector.broadcast %9 : vector<1x32xf32> to vector<8x32xf32>
    %11 = arith.addf %8, %10 : vector<8x32xf32>
    %cst_10 = arith.constant 0.000000e+00 : f32
    %12 = vector.broadcast %cst_10 : f32 to vector<8x32xf32>
    %13 = vector.extract_strided_slice %11 {offsets = [0, 0], sizes = [8, 8], strides = [1, 1]} : vector<8x32xf32> to vector<8x8xf32>
    %c0_11 = arith.constant 0 : index
    %c0_12 = arith.constant 0 : index
    %14 = vector.load %arg22[%c0_11, %c0_12] : memref<8x64xf32, #tpu.memory_space<vmem>>, vector<8x8xf32>
    %c0_13 = arith.constant 0 : index
    %c32 = arith.constant 32 : index
    %15 = vector.load %arg22[%c0_13, %c32] : memref<8x64xf32, #tpu.memory_space<vmem>>, vector<8x8xf32>
    %cst_14 = arith.constant dense<0.000000e+00> : vector<8x8xf32>
    %16 = tpu.matmul %13, %14, %cst_14 {dimension_numbers = #tpu.dot_dimension_numbers<[1], [1], [0], [0], [0, 0, 1, 0], [], []>} : vector<8x8xf32>, vector<8x8xf32>, vector<8x8xf32> -> vector<8x8xf32>
    %17 = vector.broadcast %6 : vector<1x8xf32> to vector<8x8xf32>
    %18 = arith.addf %16, %17 : vector<8x8xf32>
    %cst_15 = arith.constant dense<0xFF800000> : vector<8xf32>
    %19 = vector.multi_reduction <maximumf>, %18, %cst_15 [1] : vector<8x8xf32> to vector<8xf32>
    %20 = vector.shape_cast %19 : vector<8xf32> to vector<8x1xf32>
    %21 = vector.broadcast %20 : vector<8x1xf32> to vector<8x8xf32>
    %22 = arith.subf %18, %21 : vector<8x8xf32>
    %23 = math.exp %22 : vector<8x8xf32>
    %cst_16 = arith.constant dense<0.000000e+00> : vector<8xf32>
    %24 = vector.multi_reduction <add>, %23, %cst_16 [1] : vector<8x8xf32> to vector<8xf32>
    %25 = vector.shape_cast %24 : vector<8xf32> to vector<8x1xf32>
    %cst_17 = arith.constant 1.000000e+00 : f32
    %26 = vector.broadcast %cst_17 : f32 to vector<8x1xf32>
    %27 = arith.divf %26, %25 : vector<8x1xf32>
    %28 = vector.broadcast %27 : vector<8x1xf32> to vector<8x8xf32>
    %29 = arith.mulf %23, %28 : vector<8x8xf32>
    %c0_18 = arith.constant 0 : index
    %c0_19 = arith.constant 0 : index
    %c0_20 = arith.constant 0 : index
    %c0_21 = arith.constant 0 : index
    %30 = vector.load %arg21[%c0_18, %c0_19, %c0_20, %c0_21] : memref<1x4x8x8xf32, #tpu.memory_space<vmem>>, vector<1x1x8x8xf32>
    %31 = vector.shape_cast %30 : vector<1x1x8x8xf32> to vector<8x8xf32>
    %32 = vector.shape_cast %29 : vector<8x8xf32> to vector<1x1x8x8xf32>
    tpu.vector_store %arg21[%c0_18, %c0_19, %c0_20, %c0_21], %32 {strides = array<i32>} : memref<1x4x8x8xf32, #tpu.memory_space<vmem>>, vector<1x1x8x8xf32>,
    %cst_22 = arith.constant dense<0.000000e+00> : vector<8x8xf32>
    %33 = tpu.matmul %29, %15, %cst_22 {dimension_numbers = #tpu.dot_dimension_numbers<[1], [0], [0], [1], [0, 0, 1, 1], [], []>} : vector<8x8xf32>, vector<8x8xf32>, vector<8x8xf32> -> vector<8x8xf32>
    %c0_23 = arith.constant 0 : index
    %c0_24 = arith.constant 0 : index
    %34 = vector.load %arg9[%c0_23, %c0_24] : memref<32x32xf32, #tpu.memory_space<vmem>>, vector<8x32xf32>
    %cst_25 = arith.constant dense<0.000000e+00> : vector<8x32xf32>
    %35 = tpu.matmul %33, %34, %cst_25 {dimension_numbers = #tpu.dot_dimension_numbers<[1], [0], [0], [1], [0, 0, 1, 1], [], []>} : vector<8x8xf32>, vector<8x32xf32>, vector<8x32xf32> -> vector<8x32xf32>
    %36 = arith.addf %12, %35 : vector<8x32xf32>
    %37 = vector.extract_strided_slice %11 {offsets = [0, 8], sizes = [8, 8], strides = [1, 1]} : vector<8x32xf32> to vector<8x8xf32>
    %c0_26 = arith.constant 0 : index
    %c8 = arith.constant 8 : index
    %38 = vector.load %arg22[%c0_26, %c8] : memref<8x64xf32, #tpu.memory_space<vmem>>, vector<8x8xf32>
    %c0_27 = arith.constant 0 : index
    %c40 = arith.constant 40 : index
    %39 = vector.load %arg22[%c0_27, %c40] : memref<8x64xf32, #tpu.memory_space<vmem>>, vector<8x8xf32>
    %cst_28 = arith.constant dense<0.000000e+00> : vector<8x8xf32>
    %40 = tpu.matmul %37, %38, %cst_28 {dimension_numbers = #tpu.dot_dimension_numbers<[1], [1], [0], [0], [0, 0, 1, 0], [], []>} : vector<8x8xf32>, vector<8x8xf32>, vector<8x8xf32> -> vector<8x8xf32>
    %41 = vector.broadcast %6 : vector<1x8xf32> to vector<8x8xf32>
    %42 = arith.addf %40, %41 : vector<8x8xf32>
    %cst_29 = arith.constant dense<0xFF800000> : vector<8xf32>
    %43 = vector.multi_reduction <maximumf>, %42, %cst_29 [1] : vector<8x8xf32> to vector<8xf32>
    %44 = vector.shape_cast %43 : vector<8xf32> to vector<8x1xf32>
    %45 = vector.broadcast %44 : vector<8x1xf32> to vector<8x8xf32>
    %46 = arith.subf %42, %45 : vector<8x8xf32>
    %47 = math.exp %46 : vector<8x8xf32>
    %cst_30 = arith.constant dense<0.000000e+00> : vector<8xf32>
    %48 = vector.multi_reduction <add>, %47, %cst_30 [1] : vector<8x8xf32> to vector<8xf32>
    %49 = vector.shape_cast %48 : vector<8xf32> to vector<8x1xf32>
    %cst_31 = arith.constant 1.000000e+00 : f32
    %50 = vector.broadcast %cst_31 : f32 to vector<8x1xf32>
    %51 = arith.divf %50, %49 : vector<8x1xf32>
    %52 = vector.broadcast %51 : vector<8x1xf32> to vector<8x8xf32>
    %53 = arith.mulf %47, %52 : vector<8x8xf32>
    %c0_32 = arith.constant 0 : index
    %c1 = arith.constant 1 : index
    %c0_33 = arith.constant 0 : index
    %c0_34 = arith.constant 0 : index
    %54 = vector.load %arg21[%c0_32, %c1, %c0_33, %c0_34] : memref<1x4x8x8xf32, #tpu.memory_space<vmem>>, vector<1x1x8x8xf32>
    %55 = vector.shape_cast %54 : vector<1x1x8x8xf32> to vector<8x8xf32>
    %56 = vector.shape_cast %53 : vector<8x8xf32> to vector<1x1x8x8xf32>
    tpu.vector_store %arg21[%c0_32, %c1, %c0_33, %c0_34], %56 {strides = array<i32>} : memref<1x4x8x8xf32, #tpu.memory_space<vmem>>, vector<1x1x8x8xf32>,
    %cst_35 = arith.constant dense<0.000000e+00> : vector<8x8xf32>
    %57 = tpu.matmul %53, %39, %cst_35 {dimension_numbers = #tpu.dot_dimension_numbers<[1], [0], [0], [1], [0, 0, 1, 1], [], []>} : vector<8x8xf32>, vector<8x8xf32>, vector<8x8xf32> -> vector<8x8xf32>
    %c8_36 = arith.constant 8 : index
    %c0_37 = arith.constant 0 : index
    %58 = vector.load %arg9[%c8_36, %c0_37] : memref<32x32xf32, #tpu.memory_space<vmem>>, vector<8x32xf32>
    %cst_38 = arith.constant dense<0.000000e+00> : vector<8x32xf32>
    %59 = tpu.matmul %57, %58, %cst_38 {dimension_numbers = #tpu.dot_dimension_numbers<[1], [0], [0], [1], [0, 0, 1, 1], [], []>} : vector<8x8xf32>, vector<8x32xf32>, vector<8x32xf32> -> vector<8x32xf32>
    %60 = arith.addf %36, %59 : vector<8x32xf32>
    %61 = vector.extract_strided_slice %11 {offsets = [0, 16], sizes = [8, 8], strides = [1, 1]} : vector<8x32xf32> to vector<8x8xf32>
    %c0_39 = arith.constant 0 : index
    %c16 = arith.constant 16 : index
    %62 = vector.load %arg22[%c0_39, %c16] : memref<8x64xf32, #tpu.memory_space<vmem>>, vector<8x8xf32>
    %c0_40 = arith.constant 0 : index
    %c48 = arith.constant 48 : index
    %63 = vector.load %arg22[%c0_40, %c48] : memref<8x64xf32, #tpu.memory_space<vmem>>, vector<8x8xf32>
    %cst_41 = arith.constant dense<0.000000e+00> : vector<8x8xf32>
    %64 = tpu.matmul %61, %62, %cst_41 {dimension_numbers = #tpu.dot_dimension_numbers<[1], [1], [0], [0], [0, 0, 1, 0], [], []>} : vector<8x8xf32>, vector<8x8xf32>, vector<8x8xf32> -> vector<8x8xf32>
    %65 = vector.broadcast %6 : vector<1x8xf32> to vector<8x8xf32>
    %66 = arith.addf %64, %65 : vector<8x8xf32>
    %cst_42 = arith.constant dense<0xFF800000> : vector<8xf32>
    %67 = vector.multi_reduction <maximumf>, %66, %cst_42 [1] : vector<8x8xf32> to vector<8xf32>
    %68 = vector.shape_cast %67 : vector<8xf32> to vector<8x1xf32>
    %69 = vector.broadcast %68 : vector<8x1xf32> to vector<8x8xf32>
    %70 = arith.subf %66, %69 : vector<8x8xf32>
    %71 = math.exp %70 : vector<8x8xf32>
    %cst_43 = arith.constant dense<0.000000e+00> : vector<8xf32>
    %72 = vector.multi_reduction <add>, %71, %cst_43 [1] : vector<8x8xf32> to vector<8xf32>
    %73 = vector.shape_cast %72 : vector<8xf32> to vector<8x1xf32>
    %cst_44 = arith.constant 1.000000e+00 : f32
    %74 = vector.broadcast %cst_44 : f32 to vector<8x1xf32>
    %75 = arith.divf %74, %73 : vector<8x1xf32>
    %76 = vector.broadcast %75 : vector<8x1xf32> to vector<8x8xf32>
    %77 = arith.mulf %71, %76 : vector<8x8xf32>
    %c0_45 = arith.constant 0 : index
    %c2 = arith.constant 2 : index
    %c0_46 = arith.constant 0 : index
    %c0_47 = arith.constant 0 : index
    %78 = vector.load %arg21[%c0_45, %c2, %c0_46, %c0_47] : memref<1x4x8x8xf32, #tpu.memory_space<vmem>>, vector<1x1x8x8xf32>
    %79 = vector.shape_cast %78 : vector<1x1x8x8xf32> to vector<8x8xf32>
    %80 = vector.shape_cast %77 : vector<8x8xf32> to vector<1x1x8x8xf32>
    tpu.vector_store %arg21[%c0_45, %c2, %c0_46, %c0_47], %80 {strides = array<i32>} : memref<1x4x8x8xf32, #tpu.memory_space<vmem>>, vector<1x1x8x8xf32>,
    %cst_48 = arith.constant dense<0.000000e+00> : vector<8x8xf32>
    %81 = tpu.matmul %77, %63, %cst_48 {dimension_numbers = #tpu.dot_dimension_numbers<[1], [0], [0], [1], [0, 0, 1, 1], [], []>} : vector<8x8xf32>, vector<8x8xf32>, vector<8x8xf32> -> vector<8x8xf32>
    %c16_49 = arith.constant 16 : index
    %c0_50 = arith.constant 0 : index
    %82 = vector.load %arg9[%c16_49, %c0_50] : memref<32x32xf32, #tpu.memory_space<vmem>>, vector<8x32xf32>
    %cst_51 = arith.constant dense<0.000000e+00> : vector<8x32xf32>
    %83 = tpu.matmul %81, %82, %cst_51 {dimension_numbers = #tpu.dot_dimension_numbers<[1], [0], [0], [1], [0, 0, 1, 1], [], []>} : vector<8x8xf32>, vector<8x32xf32>, vector<8x32xf32> -> vector<8x32xf32>
    %84 = arith.addf %60, %83 : vector<8x32xf32>
    %85 = vector.extract_strided_slice %11 {offsets = [0, 24], sizes = [8, 8], strides = [1, 1]} : vector<8x32xf32> to vector<8x8xf32>
    %c0_52 = arith.constant 0 : index
    %c24 = arith.constant 24 : index
    %86 = vector.load %arg22[%c0_52, %c24] : memref<8x64xf32, #tpu.memory_space<vmem>>, vector<8x8xf32>
    %c0_53 = arith.constant 0 : index
    %c56 = arith.constant 56 : index
    %87 = vector.load %arg22[%c0_53, %c56] : memref<8x64xf32, #tpu.memory_space<vmem>>, vector<8x8xf32>
    %cst_54 = arith.constant dense<0.000000e+00> : vector<8x8xf32>
    %88 = tpu.matmul %85, %86, %cst_54 {dimension_numbers = #tpu.dot_dimension_numbers<[1], [1], [0], [0], [0, 0, 1, 0], [], []>} : vector<8x8xf32>, vector<8x8xf32>, vector<8x8xf32> -> vector<8x8xf32>
    %89 = vector.broadcast %6 : vector<1x8xf32> to vector<8x8xf32>
    %90 = arith.addf %88, %89 : vector<8x8xf32>
    %cst_55 = arith.constant dense<0xFF800000> : vector<8xf32>
    %91 = vector.multi_reduction <maximumf>, %90, %cst_55 [1] : vector<8x8xf32> to vector<8xf32>
    %92 = vector.shape_cast %91 : vector<8xf32> to vector<8x1xf32>
    %93 = vector.broadcast %92 : vector<8x1xf32> to vector<8x8xf32>
    %94 = arith.subf %90, %93 : vector<8x8xf32>
    %95 = math.exp %94 : vector<8x8xf32>
    %cst_56 = arith.constant dense<0.000000e+00> : vector<8xf32>
    %96 = vector.multi_reduction <add>, %95, %cst_56 [1] : vector<8x8xf32> to vector<8xf32>
    %97 = vector.shape_cast %96 : vector<8xf32> to vector<8x1xf32>
    %cst_57 = arith.constant 1.000000e+00 : f32
    %98 = vector.broadcast %cst_57 : f32 to vector<8x1xf32>
    %99 = arith.divf %98, %97 : vector<8x1xf32>
    %100 = vector.broadcast %99 : vector<8x1xf32> to vector<8x8xf32>
    %101 = arith.mulf %95, %100 : vector<8x8xf32>
    %c0_58 = arith.constant 0 : index
    %c3 = arith.constant 3 : index
    %c0_59 = arith.constant 0 : index
    %c0_60 = arith.constant 0 : index
    %102 = vector.load %arg21[%c0_58, %c3, %c0_59, %c0_60] : memref<1x4x8x8xf32, #tpu.memory_space<vmem>>, vector<1x1x8x8xf32>
    %103 = vector.shape_cast %102 : vector<1x1x8x8xf32> to vector<8x8xf32>
    %104 = vector.shape_cast %101 : vector<8x8xf32> to vector<1x1x8x8xf32>
    tpu.vector_store %arg21[%c0_58, %c3, %c0_59, %c0_60], %104 {strides = array<i32>} : memref<1x4x8x8xf32, #tpu.memory_space<vmem>>, vector<1x1x8x8xf32>,
    %cst_61 = arith.constant dense<0.000000e+00> : vector<8x8xf32>
    %105 = tpu.matmul %101, %87, %cst_61 {dimension_numbers = #tpu.dot_dimension_numbers<[1], [0], [0], [1], [0, 0, 1, 1], [], []>} : vector<8x8xf32>, vector<8x8xf32>, vector<8x8xf32> -> vector<8x8xf32>
    %c24_62 = arith.constant 24 : index
    %c0_63 = arith.constant 0 : index
    %106 = vector.load %arg9[%c24_62, %c0_63] : memref<32x32xf32, #tpu.memory_space<vmem>>, vector<8x32xf32>
    %cst_64 = arith.constant dense<0.000000e+00> : vector<8x32xf32>
    %107 = tpu.matmul %105, %106, %cst_64 {dimension_numbers = #tpu.dot_dimension_numbers<[1], [0], [0], [1], [0, 0, 1, 1], [], []>} : vector<8x8xf32>, vector<8x32xf32>, vector<8x32xf32> -> vector<8x32xf32>
    %108 = arith.addf %84, %107 : vector<8x32xf32>
    %c0_65 = arith.constant 0 : index
    %c0_66 = arith.constant 0 : index
    %109 = vector.load %arg10[%c0_65, %c0_66] : memref<1x32xf32, #tpu.memory_space<vmem>>, vector<1x32xf32>
    %110 = vector.broadcast %109 : vector<1x32xf32> to vector<8x32xf32>
    %111 = arith.addf %108, %110 : vector<8x32xf32>
    %112 = arith.addf %4, %111 : vector<8x32xf32>
    %c0_67 = arith.constant 0 : index
    %c0_68 = arith.constant 0 : index
    %113 = vector.load %arg11[%c0_67, %c0_68] : memref<1x32xf32, #tpu.memory_space<vmem>>, vector<1x32xf32>
    %c0_69 = arith.constant 0 : index
    %c0_70 = arith.constant 0 : index
    %114 = vector.load %arg12[%c0_69, %c0_70] : memref<1x32xf32, #tpu.memory_space<vmem>>, vector<1x32xf32>
    %cst_71 = arith.constant dense<0.000000e+00> : vector<8xf32>
    %115 = vector.multi_reduction <add>, %112, %cst_71 [1] : vector<8x32xf32> to vector<8xf32>
    %116 = vector.shape_cast %115 : vector<8xf32> to vector<8x1xf32>
    %cst_72 = arith.constant 3.200000e+01 : f32
    %117 = vector.broadcast %cst_72 : f32 to vector<8x1xf32>
    %118 = arith.divf %116, %117 : vector<8x1xf32>
    %119 = vector.broadcast %118 : vector<8x1xf32> to vector<8x32xf32>
    %120 = arith.subf %112, %119 : vector<8x32xf32>
    %121 = arith.mulf %120, %120 : vector<8x32xf32>
    %cst_73 = arith.constant dense<0.000000e+00> : vector<8xf32>
    %122 = vector.multi_reduction <add>, %121, %cst_73 [1] : vector<8x32xf32> to vector<8xf32>
    %123 = vector.shape_cast %122 : vector<8xf32> to vector<8x1xf32>
    %cst_74 = arith.constant 3.200000e+01 : f32
    %124 = vector.broadcast %cst_74 : f32 to vector<8x1xf32>
    %125 = arith.divf %123, %124 : vector<8x1xf32>
    %126 = vector.broadcast %118 : vector<8x1xf32> to vector<8x32xf32>
    %127 = arith.subf %112, %126 : vector<8x32xf32>
    %cst_75 = arith.constant 9.99999996E-13 : f32
    %128 = vector.broadcast %cst_75 : f32 to vector<8x1xf32>
    %129 = arith.addf %125, %128 : vector<8x1xf32>
    %130 = math.rsqrt %129 : vector<8x1xf32>
    %131 = vector.broadcast %130 : vector<8x1xf32> to vector<8x32xf32>
    %132 = arith.mulf %127, %131 : vector<8x32xf32>
    %133 = vector.broadcast %113 : vector<1x32xf32> to vector<8x32xf32>
    %134 = arith.mulf %132, %133 : vector<8x32xf32>
    %135 = vector.broadcast %114 : vector<1x32xf32> to vector<8x32xf32>
    %136 = arith.addf %134, %135 : vector<8x32xf32>
    %c0_76 = arith.constant 0 : index
    %c0_77 = arith.constant 0 : index
    %c0_78 = arith.constant 0 : index
    %137 = vector.load %arg20[%c0_76, %c0_77, %c0_78] : memref<1x8x32xf32, #tpu.memory_space<vmem>>, vector<1x8x32xf32>
    %138 = vector.shape_cast %137 : vector<1x8x32xf32> to vector<8x32xf32>
    %139 = vector.shape_cast %136 : vector<8x32xf32> to vector<1x8x32xf32>
    tpu.vector_store %arg20[%c0_76, %c0_77, %c0_78], %139 {strides = array<i32>} : memref<1x8x32xf32, #tpu.memory_space<vmem>>, vector<1x8x32xf32>,
    %c0_79 = arith.constant 0 : index
    %c0_80 = arith.constant 0 : index
    %140 = vector.load %arg13[%c0_79, %c0_80] : memref<32x64xf32, #tpu.memory_space<vmem>>, vector<32x64xf32>
    %cst_81 = arith.constant dense<0.000000e+00> : vector<8x64xf32>
    %141 = tpu.matmul %136, %140, %cst_81 {dimension_numbers = #tpu.dot_dimension_numbers<[1], [0], [0], [1], [0, 0, 1, 1], [], []>} : vector<8x32xf32>, vector<32x64xf32>, vector<8x64xf32> -> vector<8x64xf32>
    %c0_82 = arith.constant 0 : index
    %c0_83 = arith.constant 0 : index
    %142 = vector.load %arg14[%c0_82, %c0_83] : memref<1x64xf32, #tpu.memory_space<vmem>>, vector<1x64xf32>
    %143 = vector.broadcast %142 : vector<1x64xf32> to vector<8x64xf32>
    %144 = arith.addf %141, %143 : vector<8x64xf32>
    %cst_84 = arith.constant 5.000000e-01 : f32
    %145 = vector.broadcast %cst_84 : f32 to vector<8x64xf32>
    %146 = arith.mulf %145, %144 : vector<8x64xf32>
    %cst_85 = arith.constant 0.707106769 : f32
    %147 = vector.broadcast %cst_85 : f32 to vector<8x64xf32>
    %148 = arith.mulf %144, %147 : vector<8x64xf32>
    %149 = math.erf %148 : vector<8x64xf32>
    %cst_86 = arith.constant 1.000000e+00 : f32
    %150 = vector.broadcast %cst_86 : f32 to vector<8x64xf32>
    %151 = arith.addf %150, %149 : vector<8x64xf32>
    %152 = arith.mulf %146, %151 : vector<8x64xf32>
    %c0_87 = arith.constant 0 : index
    %c0_88 = arith.constant 0 : index
    %153 = vector.load %arg15[%c0_87, %c0_88] : memref<64x32xf32, #tpu.memory_space<vmem>>, vector<64x32xf32>
    %cst_89 = arith.constant dense<0.000000e+00> : vector<8x32xf32>
    %154 = tpu.matmul %152, %153, %cst_89 {dimension_numbers = #tpu.dot_dimension_numbers<[1], [0], [0], [1], [0, 0, 1, 1], [], []>} : vector<8x64xf32>, vector<64x32xf32>, vector<8x32xf32> -> vector<8x32xf32>
    %c0_90 = arith.constant 0 : index
    %c0_91 = arith.constant 0 : index
    %155 = vector.load %arg16[%c0_90, %c0_91] : memref<1x32xf32, #tpu.memory_space<vmem>>, vector<1x32xf32>
    %156 = vector.broadcast %155 : vector<1x32xf32> to vector<8x32xf32>
    %157 = arith.addf %154, %156 : vector<8x32xf32>
    %158 = arith.addf %136, %157 : vector<8x32xf32>
    %c0_92 = arith.constant 0 : index
    %c0_93 = arith.constant 0 : index
    %159 = vector.load %arg17[%c0_92, %c0_93] : memref<1x32xf32, #tpu.memory_space<vmem>>, vector<1x32xf32>
    %c0_94 = arith.constant 0 : index
    %c0_95 = arith.constant 0 : index
    %160 = vector.load %arg18[%c0_94, %c0_95] : memref<1x32xf32, #tpu.memory_space<vmem>>, vector<1x32xf32>
    %cst_96 = arith.constant dense<0.000000e+00> : vector<8xf32>
    %161 = vector.multi_reduction <add>, %158, %cst_96 [1] : vector<8x32xf32> to vector<8xf32>
    %162 = vector.shape_cast %161 : vector<8xf32> to vector<8x1xf32>
    %cst_97 = arith.constant 3.200000e+01 : f32
    %163 = vector.broadcast %cst_97 : f32 to vector<8x1xf32>
    %164 = arith.divf %162, %163 : vector<8x1xf32>
    %165 = vector.broadcast %164 : vector<8x1xf32> to vector<8x32xf32>
    %166 = arith.subf %158, %165 : vector<8x32xf32>
    %167 = arith.mulf %166, %166 : vector<8x32xf32>
    %cst_98 = arith.constant dense<0.000000e+00> : vector<8xf32>
    %168 = vector.multi_reduction <add>, %167, %cst_98 [1] : vector<8x32xf32> to vector<8xf32>
    %169 = vector.shape_cast %168 : vector<8xf32> to vector<8x1xf32>
    %cst_99 = arith.constant 3.200000e+01 : f32
    %170 = vector.broadcast %cst_99 : f32 to vector<8x1xf32>
    %171 = arith.divf %169, %170 : vector<8x1xf32>
    %172 = vector.broadcast %164 : vector<8x1xf32> to vector<8x32xf32>
    %173 = arith.subf %158, %172 : vector<8x32xf32>
    %cst_100 = arith.constant 9.99999974E-6 : f32
    %174 = vector.broadcast %cst_100 : f32 to vector<8x1xf32>
    %175 = arith.addf %171, %174 : vector<8x1xf32>
    %176 = math.rsqrt %175 : vector<8x1xf32>
    %177 = vector.broadcast %176 : vector<8x1xf32> to vector<8x32xf32>
    %178 = arith.mulf %173, %177 : vector<8x32xf32>
    %179 = vector.broadcast %159 : vector<1x32xf32> to vector<8x32xf32>
    %180 = arith.mulf %178, %179 : vector<8x32xf32>
    %181 = vector.broadcast %160 : vector<1x32xf32> to vector<8x32xf32>
    %182 = arith.addf %180, %181 : vector<8x32xf32>
    %c0_101 = arith.constant 0 : index
    %c0_102 = arith.constant 0 : index
    %c0_103 = arith.constant 0 : index
    %183 = vector.load %arg19[%c0_101, %c0_102, %c0_103] : memref<1x8x32xf32, #tpu.memory_space<vmem>>, vector<1x8x32xf32>
    %184 = vector.shape_cast %183 : vector<1x8x32xf32> to vector<8x32xf32>
    %185 = vector.shape_cast %182 : vector<8x32xf32> to vector<1x8x32xf32>
    tpu.vector_store %arg19[%c0_101, %c0_102, %c0_103], %185 {strides = array<i32>} : memref<1x8x32xf32, #tpu.memory_space<vmem>>, vector<1x8x32xf32>,
    return
  }
  func.func @transform_0(%arg0: i32, %arg1: i32) -> (i32, i32, i32) {
    %c0_i32 = arith.constant 0 : i32
    %c0_i32_0 = arith.constant 0 : i32
    %c0_i32_1 = arith.constant 0 : i32
    return %arg0, %c0_i32, %c0_i32_0 : i32, i32, i32
  }
  func.func @transform_1(%arg0: i32, %arg1: i32) -> (i32, i32, i32) {
    %c0_i32 = arith.constant 0 : i32
    %c0_i32_0 = arith.constant 0 : i32
    return %arg0, %arg1, %c0_i32 : i32, i32, i32
  }
  func.func @transform_2(%arg0: i32, %arg1: i32) -> (i32, i32, i32) {
    %c0_i32 = arith.constant 0 : i32
    %c0_i32_0 = arith.constant 0 : i32
    %c0_i32_1 = arith.constant 0 : i32
    return %arg0, %c0_i32, %c0_i32_0 : i32, i32, i32
  }
  func.func @transform_3(%arg0: i32, %arg1: i32) -> (i32, i32) {
    %c0_i32 = arith.constant 0 : i32
    %c0_i32_0 = arith.constant 0 : i32
    %c0_i32_1 = arith.constant 0 : i32
    return %c0_i32, %c0_i32_0 : i32, i32
  }
  func.func @transform_4(%arg0: i32, %arg1: i32) -> (i32, i32) {
    %c0_i32 = arith.constant 0 : i32
    %c0_i32_0 = arith.constant 0 : i32
    %c0_i32_1 = arith.constant 0 : i32
    return %c0_i32, %c0_i32_0 : i32, i32
  }
  func.func @transform_5(%arg0: i32, %arg1: i32) -> (i32, i32) {
    %c0_i32 = arith.constant 0 : i32
    %c0_i32_0 = arith.constant 0 : i32
    %c0_i32_1 = arith.constant 0 : i32
    return %c0_i32, %c0_i32_0 : i32, i32
  }
  func.func @transform_6(%arg0: i32, %arg1: i32) -> (i32, i32) {
    %c0_i32 = arith.constant 0 : i32
    %c0_i32_0 = arith.constant 0 : i32
    %c0_i32_1 = arith.constant 0 : i32
    return %c0_i32, %c0_i32_0 : i32, i32
  }
  func.func @transform_7(%arg0: i32, %arg1: i32) -> (i32, i32) {
    %c0_i32 = arith.constant 0 : i32
    %c0_i32_0 = arith.constant 0 : i32
    %c0_i32_1 = arith.constant 0 : i32
    return %c0_i32, %c0_i32_0 : i32, i32
  }
  func.func @transform_8(%arg0: i32, %arg1: i32) -> (i32, i32) {
    %c0_i32 = arith.constant 0 : i32
    %c0_i32_0 = arith.constant 0 : i32
    %c0_i32_1 = arith.constant 0 : i32
    return %c0_i32, %c0_i32_0 : i32, i32
  }
  func.func @transform_9(%arg0: i32, %arg1: i32) -> (i32, i32) {
    %c0_i32 = arith.constant 0 : i32
    %c0_i32_0 = arith.constant 0 : i32
    %c0_i32_1 = arith.constant 0 : i32
    return %c0_i32, %c0_i32_0 : i32, i32
  }
  func.func @transform_10(%arg0: i32, %arg1: i32) -> (i32, i32) {
    %c0_i32 = arith.constant 0 : i32
    %c0_i32_0 = arith.constant 0 : i32
    %c0_i32_1 = arith.constant 0 : i32
    return %c0_i32, %c0_i32_0 : i32, i32
  }
  func.func @transform_11(%arg0: i32, %arg1: i32) -> (i32, i32) {
    %c0_i32 = arith.constant 0 : i32
    %c0_i32_0 = arith.constant 0 : i32
    %c0_i32_1 = arith.constant 0 : i32
    return %c0_i32, %c0_i32_0 : i32, i32
  }
  func.func @transform_12(%arg0: i32, %arg1: i32) -> (i32, i32) {
    %c0_i32 = arith.constant 0 : i32
    %c0_i32_0 = arith.constant 0 : i32
    %c0_i32_1 = arith.constant 0 : i32
    return %c0_i32, %c0_i32_0 : i32, i32
  }
  func.func @transform_13(%arg0: i32, %arg1: i32) -> (i32, i32) {
    %c0_i32 = arith.constant 0 : i32
    %c0_i32_0 = arith.constant 0 : i32
    %c0_i32_1 = arith.constant 0 : i32
    return %c0_i32, %c0_i32_0 : i32, i32
  }
  func.func @transform_14(%arg0: i32, %arg1: i32) -> (i32, i32) {
    %c0_i32 = arith.constant 0 : i32
    %c0_i32_0 = arith.constant 0 : i32
    %c0_i32_1 = arith.constant 0 : i32
    return %c0_i32, %c0_i32_0 : i32, i32
  }
  func.func @transform_15(%arg0: i32, %arg1: i32) -> (i32, i32) {
    %c0_i32 = arith.constant 0 : i32
    %c0_i32_0 = arith.constant 0 : i32
    %c0_i32_1 = arith.constant 0 : i32
    return %c0_i32, %c0_i32_0 : i32, i32
  }
  func.func @transform_16(%arg0: i32, %arg1: i32) -> (i32, i32) {
    %c0_i32 = arith.constant 0 : i32
    %c0_i32_0 = arith.constant 0 : i32
    %c0_i32_1 = arith.constant 0 : i32
    return %c0_i32, %c0_i32_0 : i32, i32
  }
  func.func @transform_17(%arg0: i32, %arg1: i32) -> (i32, i32, i32) {
    %c0_i32 = arith.constant 0 : i32
    %c0_i32_0 = arith.constant 0 : i32
    return %arg0, %arg1, %c0_i32 : i32, i32, i32
  }
  func.func @transform_18(%arg0: i32, %arg1: i32) -> (i32, i32, i32) {
    %c0_i32 = arith.constant 0 : i32
    %c0_i32_0 = arith.constant 0 : i32
    return %arg0, %arg1, %c0_i32 : i32, i32, i32
  }
  func.func @transform_19(%arg0: i32, %arg1: i32) -> (i32, i32, i32, i32) {
    %c0_i32 = arith.constant 0 : i32
    %c0_i32_0 = arith.constant 0 : i32
    %c0_i32_1 = arith.constant 0 : i32
    return %arg0, %c0_i32, %arg1, %c0_i32_0 : i32, i32, i32, i32
  }
}

</mosaic_0001>

<bundles_post_ra>
// kernel: tpu_custom_call.1
= control target key start
LH: loop header
LB: loop body
LE: loop exit
PB: predicated region body
PF: predicated region fallthrough
CT: control target
= control target key end

     0   :  { %s2679_s0 = inlined_call_operand.hbm [shape: f32[2,8,32], index: 0, kind: input, shape index: {}]   ;;  %s2680_s1 = inlined_call_operand.hbm [shape: f32[2,8,32], index: 1, kind: input, shape index: {}]   ;;  %s2681_s2 = inlined_call_operand.hbm [shape: f32[2,1,8], index: 2, kind: input, shape index: {}]   ;;  %s2682_s3 = inlined_call_operand.vmem [shape: f32[32,32], index: 3, kind: input, shape index: {}]   ;;  %s2683_s4 = inlined_call_operand.vmem [shape: f32[1,32], index: 4, kind: input, shape index: {}]   ;;  %s2684_s5 = inlined_call_operand.vmem [shape: f32[32,64], index: 5, kind: input, shape index: {}]   ;;  %s2685_s6 = inlined_call_operand.vmem [shape: f32[1,64], index: 6, kind: input, shape index: {}]   ;;  %s2686_s7 = inlined_call_operand.vmem [shape: f32[32,32], index: 7, kind: input, shape index: {}]   ;;  %s2687_s8 = inlined_call_operand.vmem [shape: f32[1,32], index: 8, kind: input, shape index: {}]   ;;  %s2688_s9 = inlined_call_operand.vmem [shape: f32[1,32], index: 9, kind: input, shape index: {}]   ;;  %s2689_s10 = inlined_call_operand.vmem [shape: f32[1,32], index: 10, kind: input, shape index: {}]   ;;  %s2690_s11 = inlined_call_operand.hbm [shape: f32[32,64], index: 11, kind: input, shape index: {}]   ;;  %s2691_s12 = inlined_call_operand.vmem [shape: f32[1,64], index: 12, kind: input, shape index: {}]   ;;  %s2692_s13 = inlined_call_operand.vmem [shape: f32[64,32], index: 13, kind: input, shape index: {}]   ;;  %s2693_s14 = inlined_call_operand.vmem [shape: f32[1,32], index: 14, kind: input, shape index: {}]   ;;  %s2694_s15 = inlined_call_operand.vmem [shape: f32[1,32], index: 15, kind: input, shape index: {}]   ;;  %s2695_s16 = inlined_call_operand.vmem [shape: f32[1,32], index: 16, kind: input, shape index: {}]   ;;  %s2696_s17 = inlined_call_operand.hbm [shape: f32[2,8,32], index: 17, kind: output, shape index: {0}]   ;;  %s2697_s18 = inlined_call_operand.hbm [shape: f32[2,8,32], index: 18, kind: output, shape index: {1}]   ;;  %s2698_s19 = inlined_call_operand.hbm [shape: f32[2,4,8,8], index: 19, kind: output, shape index: {2}]  }
   0x1   :  { %2715 = sst [smem:[#allocation28_spill]] %s2679_s0 }
   0x2   :  { %2716 = sst [smem:[#allocation29_spill]] %s2680_s1 }
   0x3   :  { %2717 = sst [smem:[#allocation30_spill]] %s2681_s2 }
   0x4   :  { %2718 = sst [smem:[#allocation31_spill]] %s2682_s3 }
   0x5   :  { %2719 = sst [smem:[#allocation32_spill]] %s2688_s9 }
   0x6   :  { %2720 = sst [smem:[#allocation33_spill]] %s2689_s10 }
   0x7   :  { %2721 = sst [smem:[#allocation34_spill]] %s2690_s11 }
   0x8   :  { %2722 = sst [smem:[#allocation35_spill]] %s2691_s12 }
   0x9   :  { %2723 = sst [smem:[#allocation36_spill]] %s2692_s13 }
   0xa   :  { %2724 = sst [smem:[#allocation37_spill]] %s2693_s14 }
   0xb   :  { %2725 = sst [smem:[#allocation38_spill]] %s2694_s15 }
   0xc   :  { %2726 = sst [smem:[#allocation39_spill]] %s2695_s16 }
   0xd   :  { %2727 = sst [smem:[#allocation40_spill]] %s2696_s17 }
   0xe   :  { %2728 = sst [smem:[#allocation41_spill]] %s2697_s18 }
   0xf   :  { %2729 = sst [smem:[#allocation42_spill]] %s2698_s19 }
  0x10   :  { %25 = vsyncpa [#allocation4], 0 }
  0x11   :  { %27 = vsyncpa [#allocation4 + $0x1], 0 }
  0x12   :  { %28 = vsyncpa [#allocation7], 0 }
  0x13   :  { %30 = vsyncpa [#allocation7 + $0x1], 0 }
  0x14   :  { %31 = vsyncpa [#allocation10], 0 }
  0x15   :  { %32 = vsyncpa [#allocation5], 0 }
  0x16   :  { %34 = vsyncpa [#allocation5 + $0x1], 0 }
  0x17   :  { %35 = vsyncpa [#allocation13], 0 }
  0x18   :  { %37 = vsyncpa [#allocation13 + $0x1], 0  ;;  %s2270_s0 = smov 0   ;;  %s2272_s30 = smov 0  }
  0x19   :  { %s2274_s20 = smov 0   ;;  %s2276_s21 = smov 0  }
  0x1a   :  { %s2278_s1 = smov 0   ;;  %s2280_s22 = smov 0  }
  0x1b LB: > { %2730 = sst [smem:[#allocation20_spill]] %s2135_s0  ;;  %s2301_s2 = sadd.s32 4294967295, %s2155_s22   ;;  %s2155_s22 = sphi %s2280_s22, %s43_s22   ;;  %s2151_s1 = sphi %s2278_s1, %s2772_s1   ;;  %s2147_s21 = sphi %s2276_s21, %s2771_s21   ;;  %s2143_s20 = sphi %s2274_s20, %s2767_s20   ;;  %s2139_s30 = sphi %s2272_s30, %s2770_s30   ;;  %s2135_s0 = sphi %s2270_s0, %s2769_s0  }
  0x1c   : > { %2731 = sst [smem:[#allocation21_spill]] %s2143_s20  ;;  %s2701_s23 = sadd.s32 4294967294, %s2155_s22  }
  0x1d   : > { %2732 = sst [smem:[#allocation22_spill]] %s2147_s21  ;;  %s55_s24 = sadd.s32 1, %s2151_s1 }
  0x1e   : > { %2733 = sst [smem:[#allocation23_spill]] %s2155_s22  ;;  %s62_s25 = sadd.s32 1, %s2143_s20 }
  0x1f   : > { %p57_p0 = scmp.ge.s32.totalorder %s55_s24, 2  ;;  %p69_p1 = scmp.ne.s32.totalorder %s2143_s20, %s2139_s30 }
  0x20   : > { %p70_p2 = scmp.eq.s32.totalorder %s2155_s22, 0  ;;  %p75_p3 = scmp.ne.s32.totalorder %s2139_s30, %s2135_s0 }
  0x21   : > { %s2774_s24 = smov (%p57_p0, %s55_s24), 0  ;;  %p449_p5 = scmp.eq.s32.totalorder %s2301_s2, 1 }
  0x22   : > { %2734 = sst [smem:[#allocation24_spill]] %s2774_s24  ;;  %p2313_p4 = por %p70_p2, %p69_p1 }
  0x23   : > { %s59_s26 = ssub.s32 %s2151_s1, %s2774_s24  ;;  %p455_p6 = scmp.eq.s32.totalorder %s2701_s23, 1 }
  0x24   : > { %p60_p7 = scmp.eq.s32.totalorder %s59_s26, 0  ;;  %p2322_p8 = por %p449_p5, %p69_p1 }
  0x25   : > { %p2329_p9 = por %p455_p6, %p75_p3  ;;  %p1700_p10 = scmp.ge.s32.totalorder %s2155_s22, 2 }
  0x26   : > { %s2736_s27 = scalar_select %p2322_p8, 1, 0 }
  0x27   : > { %s2738_s28 = scalar_select %p2329_p9, 1, 0 }
  0x28   : > { %2737 = sst [smem:[#allocation25_spill]] %s2736_s27  ;;  %p1787_p11 = scmp.lt.s32.totalorder %s2155_s22, 2 }
  0x29   : > { %2739 = sst [smem:[#allocation26_spill]] %s2738_s28  ;;  %s2339_s24 = sand.u32 1, %s2143_s20  }
  0x2a   : > { %s2334_s29 = scalar_select %p60_p7, %s2143_s20, %s62_s25  }
  0x2b   : > { %s1702_s26 = sshll.u32 %s2151_s1, 3  ;;  %s2709_s23 = sshll.u32 %s2339_s24, 3 }
  0x2c   : > { %2740 = sst [smem:[#allocation27_spill]] %s2334_s29  ;;  %p2345_p12 = pnand %p1787_p11, %p2313_p4 }
  0x2d   : > { %s603_s25 = sand.u32 1, %s2155_s22   ;;  %s2742_s17 = sld [smem:[#allocation29_spill]] }
  0x2e   : > { %s607_s20 = scalar_lea.vmem [#allocation6], %s2709_s23  ;;  %s2355_s27 = scalar_lea.sflag [#allocation7], %s603_s25 }
  0x2f   : > { %s616_s19 = sshll.u32 %s607_s20, 4  ;;  %p76_p13 = scmp.eq.s32.totalorder %s2301_s2, 0  ;;  %s617_s19 = int_to_ptr.vmem [resolvable:$true] %s616_s19 }
  0x30   : > { %p1698_p0 = scmp.ge.s32.totalorder %s2155_s22, 1  ;;  %p518_p1 = scmp.lt.s32.totalorder %s2155_s22, 3 }
  0x31   : > { %p2368_p2 = por %p76_p13, %p75_p3  ;;  %s2744_s11 = sld [smem:[#allocation34_spill]] }
  0x32   : > { %p2375_p4 = pnand %p1698_p0, %p518_p1  ;;  %s2746_s20 = sld [smem:[#allocation28_spill]] }
  0x33   : > { %s612_s15 = scalar_lea.hbm %s2742_s17, %s1702_s26  ;;  %s2159_s22 = smov 8  }
  0x34   : > { %s614_s18 = sshll.u32 %s612_s15, 4  ;;  %p1762_p5 = pneg %p2375_p4  ;;  %s615_s18 = int_to_ptr.hbm [resolvable:$true] %s614_s18 }
  0x35   : > { %1772 = dma.hbm_to_vmem [thread:$0]  (!%p2345_p12), %s615_s18, 128, %s617_s19, %s2355_s27  }
  0x36   : > { %s2157_s18 = smov [#allocation9]   ;;  %p1763_p3 = pnand %p1762_p5, %p76_p13 }
  0x37   : > { %s553_s3 = sshll.u32 %s2744_s11, 4  ;;  %s555_s19 = sshll.u32 %s2157_s18, 4  ;;  %s554_s3 = int_to_ptr.hbm [resolvable:$true] %s553_s3  ;;  %s556_s19 = int_to_ptr.vmem [resolvable:$true] %s555_s19 }
  0x38   : > { %s592_s15 = scalar_lea.hbm %s2746_s20, %s1702_s26  ;;  %s2158_s11 = smov 128  }
  0x39   : > { %s594_s23 = sshll.u32 %s592_s15, 4  ;;  %s2747_s0 = sshll.u32 %s2339_s24, 3  ;;  %s595_s23 = int_to_ptr.hbm [resolvable:$true] %s594_s23 }
  0x3a   : > { %1765 = dma.hbm_to_vmem [thread:$0]  (!%p1763_p3), %s554_s3, 512, %s556_s19, [#allocation10], %s2158_s11, %s2158_s11, %s2159_s22  }
  0x3b   : > { %s588_s14 = scalar_lea.vmem [#allocation3], %s2747_s0  ;;  %s585_s13 = scalar_lea.sflag [#allocation4], %s2339_s24 }
  0x3c   : > { %s596_s21 = sshll.u32 %s588_s14, 4  ;;  %s2748_s10 = sld [smem:[#allocation30_spill]]  ;;  %s597_s21 = int_to_ptr.vmem [resolvable:$true] %s596_s21 }
  0x3d   : > { %1769 = dma.hbm_to_vmem [thread:$0]  (!%p2345_p12), %s595_s23, 128, %s597_s21, %s585_s13  }
  0x3e   : > { %s626_s29 = scalar_lea.vmem [#allocation8], %s2339_s24  ;;  %s2402_s11 = sand.u32 (!%p2375_p4), 1, %s2139_s30  }
  0x3f   : > { %s633_s26 = sshll.u32 %s626_s29, 4  ;;  %s2405_s13 = sshll.u32 (!%p2375_p4), %s2402_s11, 3  ;;  %s634_s26 = int_to_ptr.vmem [resolvable:$true] %s633_s26 }
  0x40   : > { %642 = sbr.rel (%p2375_p4) target bundleno = 2272 (0x8e0), region = 88  ;;  %s648_s12 = scalar_lea.vmem (!%p2375_p4), [#allocation3], %s2405_s13 }
  0x42   : > { %s629_s9 = scalar_lea.hbm %s2748_s10, %s2151_s1  ;;  %s645_s10 = scalar_lea.sflag (!%p2375_p4), [#allocation4], %s2402_s11 }
  0x43   : > { %s631_s25 = sshll.u32 %s629_s9, 4  ;;  %s632_s25 = int_to_ptr.hbm [resolvable:$true] %s631_s25 }
  0x44   : > { %1775 = dma.hbm_to_vmem [thread:$0]  (!%p2345_p12), %s632_s25, 16, %s634_s26, %s2355_s27  }
  0x45   : > { %2114 = dma.done.wait (%p2368_p2), %s645_s10, 128  }
  0x46   : > { %2116 = vsyncadd (%p2368_p2), %s645_s10, 4294967168  ;;  %s654_s9 = sand.u32 1, %s2301_s2   ;;  %s658_s16 = scalar_lea.vmem [#allocation6], %s2405_s13 }
  0x47   : > { %s655_s14 = scalar_lea.sflag [#allocation7], %s654_s9 }
  0x48   : > { %2118 = dma.done.wait (%p2368_p2), %s655_s14, 144  }
  0x49   : > { %2120 = vsyncadd (%p2368_p2), %s655_s14, 4294967152  ;;  %s667_s0 = scalar_lea.vmem [#allocation8], %s2402_s11 }
  0x4a   : > { %2122 = dma.done.wait (%p76_p13), [#allocation10], 512  }
  0x4b   : > { %2124 = vsyncadd (%p76_p13), [#allocation10], 4294966784  ;;  %v755_v0 = vld [vmem:[%s2684_s5 + $0x18] sm:$0xff]  ;;  %s2749_s27 = sld [smem:[#allocation31_spill]]  ;;  %v754_v2 = vld [vmem:[%s2684_s5 + $0x10] sm:$0xff]  ;;  %vm760_vm0 = vcmask 261120  }
  0x4c   : > { %776 = vmatpush.msra.mxu0 %v755_v0  ;;  %v753_v4 = vld [vmem:[%s2684_s5 + $0x8] sm:$0xff]  ;;  %v752_v6 = vld [vmem:[%s2684_s5] sm:$0xff]  ;;  %vm784_vm1 = vcmask 523264   ;;  %vm824_vm2 = vcmask 64512   ;;  %s2162_s3 = smov 96   ;;  %s2163_s28 = smov 104  }
  0x4d   : > { %v751_v8 = vld [vmem:[%s648_s12] sm:$0xff]  ;;  %v2450_v9 = vld [vmem:[%s658_s16] sm:$0xff]  ;;  %s2160_s12 = smov 120   ;;  %s2161_s16 = smov 112  }
  0x4e   : > { %777 = vmatpush.msra.mxu0 %v754_v2  ;;  %v1851_v10 = vld [vmem:[%s2685_s6] ss:$0 sm:$0xff]  ;;  %s2164_s15 = smov 88   ;;  %s2165_s18 = smov 72  }
  0x4f   : > { %v1852_v11 = vld [vmem:[%s2683_s4] ss:$0 sm:$0xff]  ;;  %s2166_s29 = smov 80   ;;  %s2751_s17 = sld [smem:[#allocation33_spill]] }
  0x50   : > { %778 = vmatpush.msra.mxu0 %v753_v4  ;;  %v2473_v19 = vld [vmem:[%s667_s0] ss:$0 sm:$0xff]  ;;  %s1711_s0 = sshll.u32 %s2402_s11, 5  ;;  %s739_s19 = scalar_lea.vmem [#allocation12], %s2405_s13 }
  0x51   : > { %v791_v1 = vld [vmem:[%s2749_s27 + $0x18] sm:$0xff]  ;;  %v790_v3 = vld [vmem:[%s2749_s27 + $0x10] sm:$0xff]  ;;  %v789_v5 = vld [vmem:[%s2749_s27 + $0x8] sm:$0xff]  ;;  %s2483_s20 = scalar_lea.vmem [#allocation14], %s1711_s0  ;;  %s2753_s10 = sld [smem:[#allocation36_spill]] }
  0x52   : > { %812 = vmatpush.msra.mxu1 %v791_v1  ;;  %v788_v7 = vld [vmem:[%s2749_s27] sm:$0xff]  ;;  %779 = vmatpush.msra.mxu0 %v752_v6  ;;  %s2754_s26 = sld [smem:[#allocation22_spill]] }
  0x53   : > { %1712 = vmatmul.msk.f32.vlgmr.msra.gmra.mxu0 %vm760_vm0, %v751_v8  ;;  %v903_v42 = vld [vmem:[%s2686_s7] sm:$0xff]  ;;  %s2755_s21 = sld [smem:[#allocation37_spill]] }
  0x54   : > { %813 = vmatpush.msra.mxu1 %v790_v3 }
  0x56   : > { %814 = vmatpush.msra.mxu1 %v789_v5 }
  0x58   : > { %815 = vmatpush.msra.mxu1 %v788_v7  ;;  %s1739_s23 = sshll.u32 %s2754_s26, 3 }
  0x59   : > { %1713 = vmatmul.msk.f32.vlgmr.msra.gmra.mxu1 %vm760_vm0, %v2450_v9 }
  0xd0   : > { %v781_v12 = vpop.f32.mrf.mxu0 }
  0xd1   : > { %v782_v14 = vadd.f32 %v1851_v10, %v781_v12 }
  0xd3   : > { %785 = vst.msk [vmem:[#allocation2] sm:$0xff] %vm784_vm1, %v782_v14 }
  0xd6   : > { %v817_v13 = vpop.f32.mrf.mxu1 }
  0xd7   : > { %v818_v15 = vadd.f32 %v1852_v11, %v817_v13 }
  0xd9   : > { %905 = vrot.lane.b32.xlu2 %v818_v15, %s2160_s12 }
  0xda   : > { %v2462_v16 = vld [vmem:[#allocation2] sm:$0xff] }
  0xdb   : > { %877 = vrot.lane.b32.xlu1 %v2462_v16, %s2162_s3  ;;  %1714 = vmatpush.xpose.msk.msra.mxu2 %vm824_vm2, %v2462_v16  ;;  %s2750_s3 = sld [smem:[#allocation32_spill]] }
  0xde   : > { %1715 = vmatmul.msk.f32.vlgmr.msra.gmra.mxu2 %vm824_vm2, %v818_v15 }
  0xe1   : > { %1038 = vrot.lane.b32.xlu2 %v2462_v16, %s2161_s16 }
  0xe3   : > { %908 = vrot.lane.b32.xlu1 %v2462_v16, %s2160_s12 }
  0xe9   : > { %1143 = vrot.lane.b32.xlu2 %v818_v15, %s2163_s28 }
  0xeb   : > { %1035 = vrot.lane.b32.xlu1 %v818_v15, %s2161_s16  ;;  %s2757_s16 = sld [smem:[#allocation41_spill]] }
 0x133   : > { %v906_v29 = vpop.permute.xlu2 %905 }
 0x13b   : > { %v1039_v34 = vpop.permute.xlu2 %1038 }
 0x143   : > { %v1144_v44 = vpop.permute.xlu2 %1143 }
 0x14d   : > { %v878_v17 = vpop.permute.xlu1 %877 }
 0x14e   : > { %898 = vmatpush.msra.mxu3 %v878_v17 }
 0x155   : > { %v909_v18 = vpop.permute.xlu1 %908 }
 0x156   : > { %1717 = vmatpush.xpose.msk.msrb.mxu3 %vm824_vm2, %v909_v18 }
 0x15d   : > { %v1036_v49 = vpop.permute.xlu1 %1035 }
 0x161   : > { %v848_v20 = vpop.f32.mrf.mxu2 }
 0x162   : > { %v849_v21 = vadd.f32 %v2473_v19, %v848_v20 }
 0x164   : > { %v851_v22 = vsel %vm824_vm2, %v849_v21, -inf }
 0x165   : > { %852 = vmax.xlane.f32.xlu0 %v851_v22 }
 0x1d8   : > { %v853_v23 = vpop.xlane.xlu0 %852 }
 0x1d9   : > { %v854_v24 = vsub.f32 %v849_v21, %v853_v23 }
 0x1db   : > { %v855_v25 = vmul.f32 1.442695, %v854_v24 }
 0x1dd   : > { %1861 = vpow2.f32 %v855_v25 }
 0x1e3   : > { %v1862_v26 = vpop.eup %1861 }
 0x1e4   : > { %v857_v27 = vsel %vm824_vm2, %v1862_v26, 0.0 }
 0x1e5   : > { %858 = vadd.xlane.f32.xlu0 %v857_v27 }
 0x1f9   : > { %1146 = vrot.lane.b32.xlu0 %v2462_v16, %s2163_s28  ;;  %s1480_s28 = sshll.u32 %s739_s19, 4  ;;  %s1481_s28 = int_to_ptr.vmem [resolvable:$true] %s1480_s28 }
 0x258   : > { %v859_v28 = vpop.xlane.xlu0 %858 }
 0x259   : > { %1863 = vrcp.f32 %v859_v28  ;;  %v871_v33 = vand.u32 2147483648, %v859_v28  ;;  %v869_v36 = vand.u32 2147483647, %v859_v28  ;;  %vm865_vm4 = vweird.f32 %v859_v28 }
 0x25b   : > { %v872_v38 = vor.u32 1.1754944e-38, %v871_v33  ;;  %vm870_vm6 = vcmp.eq.f32.partialorder %v869_v36, 8.507059e+37  ;;  %v987_v36 = vld [vmem:[%s2686_s7 + $0x8] sm:$0xff] }
 0x25c   : > { %1006 = vmatpush.msrb.mxu0 %v987_v36 }
 0x25f   : > { %v1864_v30 = vpop.eup %1863 }
 0x260   : > { %v861_v31 = vmul.f32 %v1864_v30, %v859_v28  ;;  %vm866_vm3 = vweird.f32 %v1864_v30 }
 0x261   : > { %vm867_vm5 = vmor %vm865_vm4, %vm866_vm3 }
 0x262   : > { %v862_v32 = vsub.f32 1.0, %v861_v31 }
 0x264   : > { %v863_v35 = vmul.f32 %v1864_v30, %v862_v32 }
 0x266   : > { %v864_v37 = vadd.f32 %v1864_v30, %v863_v35 }
 0x268   : > { %v868_v39 = vsel %vm867_vm5, %v1864_v30, %v864_v37  ;;  %v1117_v37 = vld [vmem:[%s2686_s7 + $0x10] sm:$0xff] }
 0x269   : > { %v873_v40 = vsel %vm870_vm6, %v872_v38, %v868_v39  ;;  %1136 = vmatpush.msra.mxu0 %v1117_v37 }
 0x26a   : > { %v875_v41 = vmul.f32 %v1862_v26, %v873_v40  ;;  %v1225_v40 = vld [vmem:[%s2686_s7 + $0x18] sm:$0xff] }
 0x26b   : > { %v1147_v43 = vpop.permute.xlu0 %1146 }
 0x26c   : > { %876 = vst.msk [vmem:[%s2483_s20] sm:$0xff] %vm824_vm2, %v875_v41  ;;  %1716 = vmatmul.msk.f32.vlgmr.msra.gmra.mxu3 %vm824_vm2, %v875_v41  ;;  %1728 = vmatpush.xpose.msk.msrb.mxu1 %vm824_vm2, %v1147_v43 }
 0x26d   : > { %1029 = vmatpush.msra.mxu3 %v903_v42 }
 0x26f   : > { %1729 = vmatmul.msk.f32.vlgmr.msrb.gmra.mxu1 %vm824_vm2, %v1144_v44 }
 0x274   : > { %1718 = vmatmul.msk.f32.vlgmr.msrb.gmra.mxu3 %vm824_vm2, %v906_v29 }
 0x275   : > { %1723 = vmatpush.xpose.msk.msrb.mxu3 %vm824_vm2, %v1039_v34 }
 0x2ec   : > { %v1169_v45 = vpop.f32.mrf.mxu1 }
 0x2ed   : > { %v1170_v46 = vadd.f32 %v2473_v19, %v1169_v45 }
 0x2ef   : > { %v900_v47 = vpop.f32.mrf.mxu3  ;;  %v1172_v48 = vsel %vm824_vm2, %v1170_v46, -inf }
 0x2f0   : > { %1722 = vmatmul.msk.f32.vlgmr.msra.gmra.mxu3 %vm824_vm2, %v900_v47  ;;  %1173 = vmax.xlane.f32.xlu2 %v1172_v48 }
 0x2f7   : > { %v931_v50 = vpop.f32.mrf.mxu3 }
 0x2f8   : > { %v932_v51 = vadd.f32 %v2473_v19, %v931_v50  ;;  %1724 = vmatmul.msk.f32.vlgmr.msrb.gmra.mxu3 %vm824_vm2, %v1036_v49 }
 0x2fa   : > { %v934_v52 = vsel %vm824_vm2, %v932_v51, -inf }
 0x2fb   : > { %935 = vmax.xlane.f32.xlu1 %v934_v52 }
 0x363   : > { %v1174_v53 = vpop.xlane.xlu2 %1173 }
 0x364   : > { %v1175_v54 = vsub.f32 %v1170_v46, %v1174_v53 }
 0x366   : > { %v1176_v55 = vmul.f32 1.442695, %v1175_v54 }
 0x368   : > { %1865 = vpow2.f32 %v1176_v55 }
 0x36e   : > { %v1866_v56 = vpop.eup %1865  ;;  %v936_v57 = vpop.xlane.xlu1 %935 }
 0x36f   : > { %v937_v58 = vsub.f32 %v932_v51, %v936_v57  ;;  %v1178_v59 = vsel %vm824_vm2, %v1866_v56, 0.0 }
 0x370   : > { %1179 = vadd.xlane.f32.xlu1 %v1178_v59 }
 0x371   : > { %v938_v60 = vmul.f32 1.442695, %v937_v58  ;;  %v1854_v58 = vld [vmem:[%s2687_s8] ss:$0 sm:$0xff] }
 0x373   : > { %1867 = vpow2.f32 %v938_v60  ;;  %v2499_v61 = vpop.f32.mrf.mxu3 }
 0x379   : > { %v1868_v62 = vpop.eup %1867 }
 0x37a   : > { %v940_v63 = vsel %vm824_vm2, %v1868_v62, 0.0 }
 0x37b   : > { %v1061_v0 = vpop.f32.mrf.mxu3  ;;  %941 = vadd.xlane.f32.xlu2 %v940_v63 }
 0x37c   : > { %v1062_v1 = vadd.f32 %v2473_v19, %v1061_v0 }
 0x37e   : > { %v1064_v2 = vsel %vm824_vm2, %v1062_v1, -inf }
 0x37f   : > { %1065 = vmax.xlane.f32.xlu0 %v1064_v2 }
 0x389   : > { %961 = vrot.lane.b32.xlu1 %v2462_v16, %s2164_s15  ;;  %s2601_s15 = scalar_lea.sflag [#allocation13], %s654_s9 }
 0x393   : > { %1199 = vrot.lane.b32.xlu0 %v2462_v16, %s2165_s18 }
 0x3e3   : > { %v1180_v3 = vpop.xlane.xlu1 %1179 }
 0x3e4   : > { %1869 = vrcp.f32 %v1180_v3  ;;  %v1192_v7 = vand.u32 2147483648, %v1180_v3  ;;  %v1190_v11 = vand.u32 2147483647, %v1180_v3  ;;  %vm1186_vm8 = vweird.f32 %v1180_v3 }
 0x3e6   : > { %v1193_v13 = vor.u32 1.1754944e-38, %v1192_v7  ;;  %vm1191_vm10 = vcmp.eq.f32.partialorder %v1190_v11, 8.507059e+37 }
 0x3ea   : > { %v1870_v4 = vpop.eup %1869 }
 0x3eb   : > { %v1182_v5 = vmul.f32 %v1870_v4, %v1180_v3  ;;  %vm1187_vm7 = vweird.f32 %v1870_v4 }
 0x3ec   : > { %vm1188_vm9 = vmor %vm1186_vm8, %vm1187_vm7 }
 0x3ed   : > { %v1183_v6 = vsub.f32 1.0, %v1182_v5 }
 0x3ee   : > { %v942_v8 = vpop.xlane.xlu2 %941 }
 0x3ef   : > { %v1184_v10 = vmul.f32 %v1870_v4, %v1183_v6  ;;  %1871 = vrcp.f32 %v942_v8  ;;  %v954_v24 = vand.u32 2147483648, %v942_v8  ;;  %v952_v26 = vand.u32 2147483647, %v942_v8 }
 0x3f0   : > { %vm948_vm12 = vweird.f32 %v942_v8 }
 0x3f1   : > { %v1185_v12 = vadd.f32 %v1870_v4, %v1184_v10  ;;  %v955_v30 = vor.u32 1.1754944e-38, %v954_v24  ;;  %vm953_vm14 = vcmp.eq.f32.partialorder %v952_v26, 8.507059e+37  ;;  %v1855_v26 = vld [vmem:[%s2750_s3] ss:$0 sm:$0xff]  ;;  %s1478_s3 = scalar_lea.hbm %s2757_s16, %s1739_s23 }
 0x3f2   : > { %v1066_v14 = vpop.xlane.xlu0 %1065  ;;  %s1482_s0 = sshll.u32 %s1478_s3, 4  ;;  %s1483_s0 = int_to_ptr.hbm [resolvable:$true] %s1482_s0 }
 0x3f3   : > { %v1189_v15 = vsel %vm1188_vm9, %v1870_v4, %v1185_v12  ;;  %v1067_v17 = vsub.f32 %v1062_v1, %v1066_v14  ;;  %v2167_v1 = vmov 32.0   ;;  %v1299_v12 = vld [vmem:[#allocation9 + $0x18] sm:$0xff]  ;;  %v1297_v14 = vld [vmem:[#allocation9 + $0x8] sm:$0xff]  ;;  %s2019_s18 = sshra.s32 %s1483_s0, 4  ;;  %s2020_s18 = int_to_ptr.hbm [resolvable:$true] %s2019_s18 }
 0x3f4   : > { %v1194_v18 = vsel %vm1191_vm10, %v1193_v13, %v1189_v15  ;;  %v1298_v13 = vld [vmem:[#allocation9 + $0x10] sm:$0xff]  ;;  %v1296_v15 = vld [vmem:[#allocation9] sm:$0xff]  ;;  %p2026_p12 = scmp.lt.s32.totalorder %s2020_s18, %s2757_s16 }
 0x3f5   : > { %v1872_v19 = vpop.eup %1871  ;;  %v1068_v20 = vmul.f32 1.442695, %v1067_v17  ;;  %v1196_v21 = vmul.f32 %v1866_v56, %v1194_v18 }
 0x3f6   : > { %v944_v22 = vmul.f32 %v1872_v19, %v942_v8  ;;  %vm949_vm11 = vweird.f32 %v1872_v19 }
 0x3f7   : > { %1873 = vpow2.f32 %v1068_v20  ;;  %1730 = vst.msk [vmem:[%s2483_s20 + $0x18] sm:$0xff] %vm824_vm2, %v1196_v21  ;;  %vm950_vm13 = vmor %vm948_vm12, %vm949_vm11 }
 0x3f8   : > { %v945_v23 = vsub.f32 1.0, %v944_v22 }
 0x3fa   : > { %v946_v25 = vmul.f32 %v1872_v19, %v945_v23 }
 0x3fb   : > { %v962_v27 = vpop.permute.xlu1 %961 }
 0x3fc   : > { %v947_v28 = vadd.f32 %v1872_v19, %v946_v25  ;;  %982 = vmatpush.msrb.mxu2 %v962_v27 }
 0x3fd   : > { %v1874_v29 = vpop.eup %1873 }
 0x3fe   : > { %v1070_v31 = vsel %vm824_vm2, %v1874_v29, 0.0  ;;  %v951_v32 = vsel %vm950_vm13, %v1872_v19, %v947_v28 }
 0x3ff   : > { %1071 = vadd.xlane.f32.xlu2 %v1070_v31  ;;  %v956_v33 = vsel %vm953_vm14, %v955_v30, %v951_v32 }
 0x400   : > { %v958_v34 = vmul.f32 %v1868_v62, %v956_v33 }
 0x402   : > { %1719 = vst.msk [vmem:[%s2483_s20 + $0x8] sm:$0xff] %vm824_vm2, %v958_v34  ;;  %1720 = vmatmul.msk.f32.vlgmr.msrb.gmra.mxu2 %vm824_vm2, %v958_v34 }
 0x405   : > { %v1200_v35 = vpop.permute.xlu0 %1199 }
 0x406   : > { %1220 = vmatpush.msra.mxu3 %v1200_v35 }
 0x407   : > { %1731 = vmatmul.msk.f32.vlgmr.msra.gmra.mxu3 %vm824_vm2, %v1196_v21 }
 0x417   : > { %1091 = vrot.lane.b32.xlu2 %v2462_v16, %s2166_s29  ;;  %s2752_s29 = sld [smem:[#allocation35_spill]] }
 0x41d   : > { %v1857_v32 = vld [vmem:[%s2752_s29] ss:$0 sm:$0xff]  ;;  %s2021_s29 = scalar_lea.hbm %s2020_s18, 8 }
 0x41e   : > { %p2022_p6 = scmp.ne.s32.totalorder %s2020_s18, %s2021_s29 }
 0x420   : > { %p2023_p7 = pnand %p2022_p6, %p2322_p8 }
 0x422   : > { %p2024_p11 = pneg %p2023_p7 }
 0x472   : > { %v1072_v38 = vpop.xlane.xlu2 %1071 }
 0x473   : > { %1875 = vrcp.f32 %v1072_v38  ;;  %v1084_v43 = vand.u32 2147483648, %v1072_v38  ;;  %v1082_v45 = vand.u32 2147483647, %v1072_v38  ;;  %vm1078_vm3 = vweird.f32 %v1072_v38 }
 0x474   : > { %1877 = vrcp.f32 %v2167_v1 }
 0x475   : > { %v1085_v47 = vor.u32 1.1754944e-38, %v1084_v43  ;;  %vm1083_vm5 = vcmp.eq.f32.partialorder %v1082_v45, 8.507059e+37  ;;  %v1376_v43 = vld [vmem:[%s2753_s10 + $0x28] sm:$0xff] }
 0x479   : > { %v1876_v39 = vpop.eup %1875 }
 0x47a   : > { %v1074_v41 = vmul.f32 %v1876_v39, %v1072_v38  ;;  %v1092_v42 = vpop.permute.xlu2 %1091  ;;  %vm1079_vm15 = vweird.f32 %v1876_v39  ;;  %v1878_v2 = vpop.eup %1877  ;;  %v1378_v38 = vld [vmem:[%s2753_s10 + $0x38] sm:$0xff] }
 0x47b   : > { %1112 = vmatpush.msra.mxu2 %v1092_v42  ;;  %vm1080_vm4 = vmor %vm1078_vm3, %vm1079_vm15  ;;  %v1262_v3 = vmul.f32 32.0, %v1878_v2  ;;  %1395 = vmatpush.msra.mxu1 %v1378_v38 }
 0x47c   : > { %v1075_v16 = vsub.f32 1.0, %v1074_v41  ;;  %v1377_v41 = vld [vmem:[%s2753_s10 + $0x30] sm:$0xff] }
 0x47d   : > { %1244 = vmatpush.msrb.mxu2 %v1225_v40  ;;  %v1263_v4 = vsub.f32 1.0, %v1262_v3  ;;  %1396 = vmatpush.msra.mxu1 %v1377_v41 }
 0x47e   : > { %v1076_v44 = vmul.f32 %v1876_v39, %v1075_v16 }
 0x47f   : > { %1397 = vmatpush.msra.mxu1 %v1376_v43 }
 0x480   : > { %v1077_v46 = vadd.f32 %v1876_v39, %v1076_v44 }
 0x482   : > { %v1081_v48 = vsel %vm1080_vm4, %v1876_v39, %v1077_v46  ;;  %v1375_v46 = vld [vmem:[%s2753_s10 + $0x20] sm:$0xff] }
 0x483   : > { %v1086_v49 = vsel %vm1083_vm5, %v1085_v47, %v1081_v48  ;;  %1398 = vmatpush.msra.mxu1 %v1375_v46  ;;  %v1374_v48 = vld [vmem:[%s2753_s10 + $0x18] sm:$0xff] }
 0x484   : > { %v1088_v50 = vmul.f32 %v1874_v29, %v1086_v49  ;;  %v1856_v29 = vld [vmem:[%s2751_s17] ss:$0 sm:$0xff]  ;;  %s1495_s17 = sshll.u32 %s2483_s20, 4  ;;  %s1496_s17 = int_to_ptr.vmem [resolvable:$true] %s1495_s17 }
 0x485   : > { %v984_v51 = vpop.f32.mrf.mxu2  ;;  %1399 = vmatpush.msra.mxu1 %v1374_v48 }
 0x486   : > { %1721 = vmatmul.msk.f32.vlgmr.msrb.gmra.mxu0 %vm824_vm2, %v984_v51  ;;  %1725 = vst.msk [vmem:[%s2483_s20 + $0x10] sm:$0xff] %vm824_vm2, %v1088_v50  ;;  %1726 = vmatmul.msk.f32.vlgmr.msra.gmra.mxu2 %vm824_vm2, %v1088_v50  ;;  %v1373_v51 = vld [vmem:[%s2753_s10 + $0x10] sm:$0xff] }
 0x487   : > { %1319 = vmatpush.msrb.mxu0 %v1299_v12  ;;  %1400 = vmatpush.msra.mxu1 %v1373_v51 }
 0x489   : > { %1320 = vmatpush.msrb.mxu0 %v1298_v13 }
 0x48a   : > { %v1222_v52 = vpop.f32.mrf.mxu3 }
 0x48b   : > { %1321 = vmatpush.msrb.mxu0 %v1297_v14 }
 0x48d   : > { %1322 = vmatpush.msrb.mxu0 %v1296_v15 }
 0x48e   : > { %1732 = vmatmul.msk.f32.vlgmr.msrb.gmra.mxu2 %vm824_vm2, %v1222_v52 }
 0x503   : > { %v1008_v54 = vpop.f32.mrf.mxu0 }
 0x504   : > { %v1032_v55 = vadd.f32 %v2499_v61, %v1008_v54  ;;  %v1264_v61 = vmul.f32 %v1878_v2, %v1263_v4 }
 0x506   : > { %v1265_v5 = vadd.f32 %v1878_v2, %v1264_v61 }
 0x509   : > { %v1114_v53 = vpop.f32.mrf.mxu2 }
 0x50a   : > { %1727 = vmatmul.msk.f32.vlgmr.msra.gmra.mxu0 %vm824_vm2, %v1114_v53  ;;  %vm1266_vm2 = vweird.f32 %v1878_v2  ;;  %v1372_v53 = vld [vmem:[%s2753_s10 + $0x8] sm:$0xff] }
 0x50b   : > { %v2535_v6 = vsel %vm1266_vm2, %v1878_v2, %v1265_v5  ;;  %1401 = vmatpush.msra.mxu1 %v1372_v53 }
 0x511   : > { %v1246_v59 = vpop.f32.mrf.mxu2 }
 0x587   : > { %v1138_v56 = vpop.f32.mrf.mxu0 }
 0x588   : > { %v1141_v57 = vadd.f32 %v1138_v56, %v1032_v55  ;;  %v1371_v55 = vld [vmem:[%s2753_s10] sm:$0xff] }
 0x589   : > { %1402 = vmatpush.msra.mxu1 %v1371_v55 }
 0x58a   : > { %v1249_v60 = vadd.f32 %v1246_v59, %v1141_v57 }
 0x58c   : > { %v1254_v62 = vadd.f32 %v1854_v58, %v1249_v60 }
 0x58e   : > { %v1255_v63 = vadd.f32 %v1254_v62, %v2450_v9 }
 0x590   : > { %v1258_v0 = vsel %vm760_vm0, %v1255_v63, 0.0 }
 0x591   : > { %1259 = vadd.xlane.f32.xlu0 %v1258_v0 }
 0x604   : > { %v1260_v7 = vpop.xlane.xlu0 %1259 }
 0x605   : > { %v1268_v8 = vmul.f32 %v2535_v6, %v1260_v7 }
 0x607   : > { %v1269_v10 = vsub.f32 %v1255_v63, %v1268_v8 }
 0x609   : > { %v1270_v11 = vmul.f32 %v1269_v10, %v1269_v10 }
 0x60b   : > { %v1271_v9 = vsel %vm760_vm0, %v1270_v11, 0.0 }
 0x60c   : > { %1272 = vadd.xlane.f32.xlu1 %v1271_v9 }
 0x67f   : > { %v1273_v17 = vpop.xlane.xlu1 %1272 }
 0x680   : > { %v1274_v18 = vmul.f32 %v1273_v17, %v2535_v6 }
 0x682   : > { %v1275_v19 = vadd.f32 1e-12, %v1274_v18 }
 0x684   : > { %1879 = vrsqrt.f32 %v1275_v19  ;;  %vm1282_vm7 = vweird.f32 %v1275_v19 }
 0x68a   : > { %v1880_v20 = vpop.eup %1879 }
 0x68b   : > { %v1277_v21 = vmul.f32 %v1880_v20, %v1275_v19  ;;  %vm1283_vm6 = vweird.f32 %v1880_v20  ;;  %v1858_v19 = vld [vmem:[%s2755_s21] ss:$0 sm:$0xff]  ;;  %s2025_s21 = scalar_lea.hbm %s2757_s16, 16 }
 0x68c   : > { %vm1284_vm8 = vmor %vm1282_vm7, %vm1283_vm6  ;;  %p2027_p13 = scmp.lt.s32.totalorder %s2025_s21, %s2021_s29 }
 0x68d   : > { %v1278_v22 = vmul.f32 %v1880_v20, %v1277_v21 }
 0x68e   : > { %p2028_p0 = por %p2027_p13, %p2026_p12 }
 0x68f   : > { %v1279_v23 = vmul.f32 0.5, %v1278_v22 }
 0x690   : > { %p2029_p1 = pnand %p2028_p0, %p2024_p11 }
 0x691   : > { %v1280_v24 = vsub.f32 1.5, %v1279_v23 }
 0x693   : > { %v1281_v25 = vmul.f32 %v1880_v20, %v1280_v24 }
 0x695   : > { %v1285_v27 = vsel %vm1284_vm8, %v1880_v20, %v1281_v25 }
 0x696   : > { %v1286_v28 = vmul.f32 %v1285_v27, %v1269_v10 }
 0x698   : > { %v1290_v30 = vmul.f32 %v1855_v26, %v1286_v28 }
 0x69a   : > { %v2546_v31 = vadd.f32 %v1856_v29, %v1290_v30 }
 0x69c   : > { %1733 = vmatmul.msk.f32.vlgmr.msrb.gmra.mxu0 %vm760_vm0, %v2546_v31  ;;  %1295 = vst.msk [vmem:[%s739_s19] sm:$0xff] %vm760_vm0, %v2546_v31 }
 0x719   : > { %v1324_v33 = vpop.f32.mrf.mxu0 }
 0x71a   : > { %v1325_v34 = vadd.f32 %v1857_v32, %v1324_v33 }
 0x71c   : > { %v1328_v35 = vmul.f32 0.70710677, %v1325_v34  ;;  %v1327_v15 = vmul.f32 0.5, %v1325_v34 }
 0x71e   : > { %v1329_v36 = vmul.f32 %v1328_v35, %v1328_v35 }
 0x720   : > { %v1330_v37 = vmin.f32 %v1329_v36, 16.0 }
 0x722   : > { %v1331_v39 = vmul.f32 2.1237322e-06, %v1330_v37  ;;  %v1342_v40 = vmul.f32 3.8918573e-05, %v1330_v37 }
 0x724   : > { %v1332_v42 = vadd.f32 0.00028619796, %v1331_v39  ;;  %v1343_v16 = vadd.f32 0.001143296, %v1342_v40 }
 0x726   : > { %v1333_v44 = vmul.f32 %v1332_v42, %v1330_v37  ;;  %v1344_v45 = vmul.f32 %v1343_v16, %v1330_v37 }
 0x728   : > { %v1345_v47 = vadd.f32 0.014752088, %v1344_v45  ;;  %v1334_v49 = vadd.f32 0.0036580483, %v1333_v44 }
 0x72a   : > { %v1346_v50 = vmul.f32 %v1345_v47, %v1330_v37  ;;  %v1335_v54 = vmul.f32 %v1334_v49, %v1330_v37 }
 0x72c   : > { %v1347_v52 = vadd.f32 0.112945676, %v1346_v50  ;;  %v1336_v58 = vadd.f32 0.05243302, %v1335_v54 }
 0x72e   : > { %v1348_v56 = vmul.f32 %v1347_v52, %v1330_v37  ;;  %v1337_v62 = vmul.f32 %v1336_v58, %v1330_v37 }
 0x730   : > { %v1349_v57 = vadd.f32 0.4994258, %v1348_v56  ;;  %v1338_v63 = vadd.f32 0.18741608, %v1337_v62 }
 0x732   : > { %v1350_v59 = vmul.f32 %v1349_v57, %v1330_v37  ;;  %v1339_v1 = vmul.f32 %v1338_v63, %v1330_v37 }
 0x734   : > { %v1351_v60 = vadd.f32 1.0, %v1350_v59  ;;  %v1340_v61 = vadd.f32 1.1283791, %v1339_v1 }
 0x736   : > { %1881 = vrcp.f32 %v1351_v60  ;;  %v1363_v4 = vand.u32 2147483648, %v1351_v60  ;;  %v1361_v7 = vand.u32 2147483647, %v1351_v60  ;;  %vm1357_vm10 = vweird.f32 %v1351_v60 }
 0x737   : > { %v1341_v11 = vmul.f32 %v1340_v61, %v1328_v35 }
 0x738   : > { %v1364_v10 = vor.u32 1.1754944e-38, %v1363_v4  ;;  %vm1362_vm12 = vcmp.eq.f32.partialorder %v1361_v7, 8.507059e+37 }
 0x73c   : > { %v1882_v0 = vpop.eup %1881 }
 0x73d   : > { %v1353_v2 = vmul.f32 %v1882_v0, %v1351_v60  ;;  %vm1358_vm9 = vweird.f32 %v1882_v0 }
 0x73e   : > { %vm1359_vm11 = vmor %vm1357_vm10, %vm1358_vm9 }
 0x73f   : > { %v1354_v3 = vsub.f32 1.0, %v1353_v2 }
 0x741   : > { %v1355_v5 = vmul.f32 %v1882_v0, %v1354_v3 }
 0x743   : > { %v1356_v8 = vadd.f32 %v1882_v0, %v1355_v5 }
 0x745   : > { %v1360_v9 = vsel %vm1359_vm11, %v1882_v0, %v1356_v8 }
 0x746   : > { %v1365_v12 = vsel %vm1362_vm12, %v1364_v10, %v1360_v9 }
 0x747   : > { %v1366_v13 = vmul.f32 %v1365_v12, %v1341_v11 }
 0x749   : > { %v1734_v14 = vclamps-f32 %v1366_v13, 1.0 }
 0x74b   : > { %v1369_v17 = vadd.f32 1.0, %v1734_v14 }
 0x74d   : > { %v1370_v18 = vmul.f32 %v1369_v17, %v1327_v15 }
 0x74f   : > { %1735 = vmatmul.msk.f32.vlgmr.msra.gmra.mxu1 %vm784_vm1, %v1370_v18 }
 0x7cc   : > { %v1404_v20 = vpop.f32.mrf.mxu1 }
 0x7cd   : > { %v1405_v21 = vadd.f32 %v1858_v19, %v1404_v20 }
 0x7cf   : > { %v1407_v22 = vadd.f32 %v1405_v21, %v2546_v31 }
 0x7d1   : > { %v1410_v23 = vsel %vm760_vm0, %v1407_v22, 0.0 }
 0x7d2   : > { %1411 = vadd.xlane.f32.xlu2 %v1410_v23 }
 0x845   : > { %v1412_v24 = vpop.xlane.xlu2 %1411 }
 0x846   : > { %v1413_v25 = vmul.f32 %v1412_v24, %v2535_v6 }
 0x848   : > { %v1414_v26 = vsub.f32 %v1407_v22, %v1413_v25 }
 0x84a   : > { %v1415_v27 = vmul.f32 %v1414_v26, %v1414_v26 }
 0x84c   : > { %v1416_v28 = vsel %vm760_vm0, %v1415_v27, 0.0 }
 0x84d   : > { %1417 = vadd.xlane.f32.xlu0 %v1416_v28 }
 0x84e   : > { %2032 = shalt.err (!%p2029_p1)
}
 0x84f   : > { %1757 = dma.vmem_to_hbm [thread:$0]  (%p2322_p8), %s1481_s28, 128, %s1483_s0, %s2601_s15  }
 0x850   : > { %s1745_s2 = sshll.u32 %s2754_s26, 5  ;;  %s2758_s12 = sld [smem:[#allocation42_spill]] }
 0x856   : > { %s1494_s3 = scalar_lea.hbm %s2758_s12, %s1745_s2  ;;  %s2053_s24 = scalar_lea.hbm %s2758_s12, 64 }
 0x857   : > { %s1497_s25 = sshll.u32 %s1494_s3, 4  ;;  %s1498_s25 = int_to_ptr.hbm [resolvable:$true] %s1497_s25 }
 0x858   : > { %s2047_s14 = sshra.s32 %s1498_s25, 4  ;;  %s2048_s14 = int_to_ptr.hbm [resolvable:$true] %s2047_s14 }
 0x859   : > { %s2049_s18 = scalar_lea.hbm %s2048_s14, 32  ;;  %p2054_p3 = scmp.lt.s32.totalorder %s2048_s14, %s2758_s12 }
 0x85a   : > { %p2050_p2 = scmp.ne.s32.totalorder %s2048_s14, %s2049_s18  ;;  %p2055_p6 = scmp.lt.s32.totalorder %s2053_s24, %s2049_s18 }
 0x85c   : > { %p2051_p4 = pnand %p2050_p2, %p2322_p8  ;;  %p2056_p7 = por %p2055_p6, %p2054_p3 }
 0x85e   : > { %p2052_p5 = pneg %p2051_p4 }
 0x860   : > { %p2057_p11 = pnand %p2056_p7, %p2052_p5 }
 0x862   : > { %2060 = shalt.err (!%p2057_p11)
}
 0x863   : > { %s2168_s19 = smov 128   ;;  %s2169_s2 = smov 8  }
 0x864   : > { %1758 = dma.vmem_to_hbm [thread:$0]  (%p2322_p8), %s1496_s17, 512, %s1498_s25, %s2601_s15, %s2168_s19, %s2168_s19, %s2169_s2  }
 0x865   : > { %s2759_s3 = sld [smem:[#allocation38_spill]]  ;;  %s732_s24 = scalar_lea.vmem [#allocation11], %s2405_s13 }
 0x866   : > { %s2760_s25 = sld [smem:[#allocation40_spill]]  ;;  %s1465_s28 = sshll.u32 %s732_s24, 4  ;;  %s1466_s28 = int_to_ptr.vmem [resolvable:$true] %s1465_s28 }
 0x867   : > { %s2761_s21 = sld [smem:[#allocation39_spill]]  ;;  %s1442_s26 = scalar_lea.sflag [#allocation5], %s2402_s11 }
 0x86b   : > { %v1859_v38 = vld [vmem:[%s2759_s3] ss:$0 sm:$0xff] }
 0x86c   : > { %s1463_s14 = scalar_lea.hbm %s2760_s25, %s1739_s23  ;;  %s2081_s13 = scalar_lea.hbm %s2760_s25, 16 }
 0x86d   : > { %v1860_v40 = vld [vmem:[%s2761_s21] ss:$0 sm:$0xff]  ;;  %s1467_s0 = sshll.u32 %s1463_s14, 4  ;;  %s1468_s0 = int_to_ptr.hbm [resolvable:$true] %s1467_s0 }
 0x86e   : > { %s2075_s19 = sshra.s32 %s1468_s0, 4  ;;  %s2076_s19 = int_to_ptr.hbm [resolvable:$true] %s2075_s19 }
 0x86f   : > { %s2077_s23 = scalar_lea.hbm %s2076_s19, 8  ;;  %p2082_p1 = scmp.lt.s32.totalorder %s2076_s19, %s2760_s25 }
 0x870   : > { %p2078_p12 = scmp.ne.s32.totalorder %s2076_s19, %s2077_s23  ;;  %p2083_p2 = scmp.lt.s32.totalorder %s2081_s13, %s2077_s23 }
 0x872   : > { %p2079_p13 = pnand %p2078_p12, %p2322_p8  ;;  %p2084_p4 = por %p2083_p2, %p2082_p1 }
 0x874   : > { %p2080_p0 = pneg %p2079_p13 }
 0x876   : > { %p2085_p5 = pnand %p2084_p4, %p2080_p0 }
 0x8c0   : > { %v1418_v29 = vpop.xlane.xlu0 %1417 }
 0x8c1   : > { %v1419_v30 = vmul.f32 %v1418_v29, %v2535_v6 }
 0x8c3   : > { %v1420_v31 = vadd.f32 1e-05, %v1419_v30 }
 0x8c5   : > { %1883 = vrsqrt.f32 %v1420_v31  ;;  %vm1427_vm13 = vweird.f32 %v1420_v31 }
 0x8cb   : > { %v1884_v32 = vpop.eup %1883 }
 0x8cc   : > { %v1422_v33 = vmul.f32 %v1884_v32, %v1420_v31  ;;  %vm1428_vm1 = vweird.f32 %v1884_v32 }
 0x8cd   : > { %vm1429_vm14 = vmor %vm1427_vm13, %vm1428_vm1 }
 0x8ce   : > { %v1423_v34 = vmul.f32 %v1884_v32, %v1422_v33 }
 0x8d0   : > { %v1424_v35 = vmul.f32 0.5, %v1423_v34 }
 0x8d2   : > { %v1425_v36 = vsub.f32 1.5, %v1424_v35 }
 0x8d4   : > { %v1426_v37 = vmul.f32 %v1884_v32, %v1425_v36 }
 0x8d6   : > { %v1430_v6 = vsel %vm1429_vm14, %v1884_v32, %v1426_v37 }
 0x8d7   : > { %v1431_v39 = vmul.f32 %v1430_v6, %v1414_v26 }
 0x8d9   : > { %v1435_v41 = vmul.f32 %v1859_v38, %v1431_v39 }
 0x8db   : > { %v1439_v42 = vadd.f32 %v1860_v40, %v1435_v41 }
 0x8dd   : > { %1440 = vst.msk [vmem:[%s732_s24] sm:$0xff] %vm760_vm0, %v1439_v42 }
 0x8de   : > { %2088 = shalt.err (!%p2085_p5)
}
 0x8df   : > { %1756 = dma.vmem_to_hbm [thread:$0]  (%p2322_p8), %s1466_s28, 128, %s1468_s0, %s1442_s26  }
 0x8e0 PF: > { %s2762_s11 = sld [smem:[#allocation20_spill]]  ;;  %p1777_p3 = pnand %p1700_p10, %p2329_p9 }
 0x8e1   : > { %s2764_s15 = sld [smem:[#allocation23_spill]] }
 0x8e2   : > { %p1778_p6 = pneg %p1777_p3 }
 0x8e6   : > { %s1512_s14 = sand.u32 1, %s2762_s11  }
 0x8e7   : > { %s1513_s18 = scalar_lea.sflag [#allocation5], %s1512_s14 }
 0x8e8   : > { %2126 = dma.done.wait (%p1778_p6), %s1513_s18, 128  }
 0x8e9   : > { %2128 = vsyncadd (%p1778_p6), %s1513_s18, 4294967168  ;;  %s2765_s29 = sadd.s32 4294967294, %s2764_s15  }
 0x8ea   : > { %s1522_s21 = sand.u32 1, %s2765_s29  }
 0x8eb   : > { %s1523_s24 = scalar_lea.sflag [#allocation13], %s1522_s21 }
 0x8ec   : > { %2130 = dma.done.wait (%p1778_p6), %s1523_s24, 640  }
 0x8ed   : > { %2132 = vsyncadd (%p1778_p6), %s1523_s24, 4294966656  ;;  %s43_s22 = sadd.s32 1, %s2764_s15   ;;  %s2766_s28 = sld [smem:[#allocation21_spill]] }
 0x8ee   : > { %p40_p8 = scmp.ge.s32.totalorder %s43_s22, 4   ;;  %s2767_s20 = sld [smem:[#allocation27_spill]] }
 0x8ef   : > { %s2768_s26 = sld [smem:[#allocation24_spill]]  ;;  %s2769_s0 = smov %s2139_s30 }
 0x8f0   : > { %s2771_s21 = smov %s2151_s1 }
 0x8f1   :  { %42 = sbr.rel (!%p40_p8) target bundleno = 27 (0x1b), region = 200 }
 0x8f3   : > { %s2770_s30 = smov %s2766_s28 }
 0x8f5   : > { %s2772_s1 = smov %s2768_s26 }
 0x8f6   :  { %1539 = vsyncpa [#allocation4], 1 }
 0x8f7   :  { %1541 = vsyncpa [#allocation4 + $0x1], 1 }
 0x8f8   :  { %1542 = vsyncpa [#allocation7], 1 }
 0x8f9   :  { %1544 = vsyncpa [#allocation7 + $0x1], 1 }
 0x8fa   :  { %1545 = vsyncpa [#allocation10], 1 }
 0x8fb   :  { %1546 = vsyncpa [#allocation5], 1 }
 0x8fc   :  { %1548 = vsyncpa [#allocation5 + $0x1], 1 }
 0x8fd   :  { %1549 = vsyncpa [#allocation13], 1 }
 0x8fe   :  { %1551 = vsyncpa [#allocation13 + $0x1], 1 }

// kernel: tpu_custom_call.1
= control target key start
LH: loop header
LB: loop body
LE: loop exit
PB: predicated region body
PF: predicated region fallthrough
CT: control target
= control target key end

     0   :  { %s2679_s0 = inlined_call_operand.hbm [shape: f32[2,8,32], index: 0, kind: input, shape index: {}]   ;;  %s2680_s1 = inlined_call_operand.hbm [shape: f32[2,8,32], index: 1, kind: input, shape index: {}]   ;;  %s2681_s2 = inlined_call_operand.hbm [shape: f32[2,1,8], index: 2, kind: input, shape index: {}]   ;;  %s2682_s3 = inlined_call_operand.vmem [shape: f32[32,32], index: 3, kind: input, shape index: {}]   ;;  %s2683_s4 = inlined_call_operand.vmem [shape: f32[1,32], index: 4, kind: input, shape index: {}]   ;;  %s2684_s5 = inlined_call_operand.vmem [shape: f32[32,64], index: 5, kind: input, shape index: {}]   ;;  %s2685_s6 = inlined_call_operand.vmem [shape: f32[1,64], index: 6, kind: input, shape index: {}]   ;;  %s2686_s7 = inlined_call_operand.vmem [shape: f32[32,32], index: 7, kind: input, shape index: {}]   ;;  %s2687_s8 = inlined_call_operand.vmem [shape: f32[1,32], index: 8, kind: input, shape index: {}]   ;;  %s2688_s9 = inlined_call_operand.vmem [shape: f32[1,32], index: 9, kind: input, shape index: {}]   ;;  %s2689_s10 = inlined_call_operand.vmem [shape: f32[1,32], index: 10, kind: input, shape index: {}]   ;;  %s2690_s11 = inlined_call_operand.hbm [shape: f32[32,64], index: 11, kind: input, shape index: {}]   ;;  %s2691_s12 = inlined_call_operand.vmem [shape: f32[1,64], index: 12, kind: input, shape index: {}]   ;;  %s2692_s13 = inlined_call_operand.vmem [shape: f32[64,32], index: 13, kind: input, shape index: {}]   ;;  %s2693_s14 = inlined_call_operand.vmem [shape: f32[1,32], index: 14, kind: input, shape index: {}]   ;;  %s2694_s15 = inlined_call_operand.vmem [shape: f32[1,32], index: 15, kind: input, shape index: {}]   ;;  %s2695_s16 = inlined_call_operand.vmem [shape: f32[1,32], index: 16, kind: input, shape index: {}]   ;;  %s2696_s17 = inlined_call_operand.hbm [shape: f32[2,8,32], index: 17, kind: output, shape index: {0}]   ;;  %s2697_s18 = inlined_call_operand.hbm [shape: f32[2,8,32], index: 18, kind: output, shape index: {1}]   ;;  %s2698_s19 = inlined_call_operand.hbm [shape: f32[2,4,8,8], index: 19, kind: output, shape index: {2}]  }
   0x1   :  { %2715 = sst [smem:[#allocation28_spill]] %s2679_s0 }
   0x2   :  { %2716 = sst [smem:[#allocation29_spill]] %s2680_s1 }
   0x3   :  { %2717 = sst [smem:[#allocation30_spill]] %s2681_s2 }
   0x4   :  { %2718 = sst [smem:[#allocation31_spill]] %s2682_s3 }
   0x5   :  { %2719 = sst [smem:[#allocation32_spill]] %s2688_s9 }
   0x6   :  { %2720 = sst [smem:[#allocation33_spill]] %s2689_s10 }
   0x7   :  { %2721 = sst [smem:[#allocation34_spill]] %s2690_s11 }
   0x8   :  { %2722 = sst [smem:[#allocation35_spill]] %s2691_s12 }
   0x9   :  { %2723 = sst [smem:[#allocation36_spill]] %s2692_s13 }
   0xa   :  { %2724 = sst [smem:[#allocation37_spill]] %s2693_s14 }
   0xb   :  { %2725 = sst [smem:[#allocation38_spill]] %s2694_s15 }
   0xc   :  { %2726 = sst [smem:[#allocation39_spill]] %s2695_s16 }
   0xd   :  { %2727 = sst [smem:[#allocation40_spill]] %s2696_s17 }
   0xe   :  { %2728 = sst [smem:[#allocation41_spill]] %s2697_s18 }
   0xf   :  { %2729 = sst [smem:[#allocation42_spill]] %s2698_s19 }
  0x10   :  { %25 = vsyncpa [#allocation4], 0 }
  0x11   :  { %27 = vsyncpa [#allocation4 + $0x1], 0 }
  0x12   :  { %28 = vsyncpa [#allocation7], 0 }
  0x13   :  { %30 = vsyncpa [#allocation7 + $0x1], 0 }
  0x14   :  { %31 = vsyncpa [#allocation10], 0 }
  0x15   :  { %32 = vsyncpa [#allocation5], 0 }
  0x16   :  { %34 = vsyncpa [#allocation5 + $0x1], 0 }
  0x17   :  { %35 = vsyncpa [#allocation13], 0 }
  0x18   :  { %37 = vsyncpa [#allocation13 + $0x1], 0  ;;  %s2270_s0 = smov 0   ;;  %s2272_s30 = smov 0  }
  0x19   :  { %s2274_s20 = smov 0   ;;  %s2276_s21 = smov 0  }
  0x1a   :  { %s2278_s1 = smov 0   ;;  %s2280_s22 = smov 0  }
  0x1b LB: > { %2730 = sst [smem:[#allocation20_spill]] %s2135_s0  ;;  %s2301_s2 = sadd.s32 4294967295, %s2155_s22   ;;  %s2155_s22 = sphi %s2280_s22, %s43_s22   ;;  %s2151_s1 = sphi %s2278_s1, %s2772_s1   ;;  %s2147_s21 = sphi %s2276_s21, %s2771_s21   ;;  %s2143_s20 = sphi %s2274_s20, %s2767_s20   ;;  %s2139_s30 = sphi %s2272_s30, %s2770_s30   ;;  %s2135_s0 = sphi %s2270_s0, %s2769_s0  }
  0x1c   : > { %2731 = sst [smem:[#allocation21_spill]] %s2143_s20  ;;  %s2701_s23 = sadd.s32 4294967294, %s2155_s22  }
  0x1d   : > { %2732 = sst [smem:[#allocation22_spill]] %s2147_s21  ;;  %s55_s24 = sadd.s32 1, %s2151_s1 }
  0x1e   : > { %2733 = sst [smem:[#allocation23_spill]] %s2155_s22  ;;  %s62_s25 = sadd.s32 1, %s2143_s20 }
  0x1f   : > { %p57_p0 = scmp.ge.s32.totalorder %s55_s24, 2  ;;  %p69_p1 = scmp.ne.s32.totalorder %s2143_s20, %s2139_s30 }
  0x20   : > { %p70_p2 = scmp.eq.s32.totalorder %s2155_s22, 0  ;;  %p75_p3 = scmp.ne.s32.totalorder %s2139_s30, %s2135_s0 }
  0x21   : > { %s2774_s24 = smov (%p57_p0, %s55_s24), 0  ;;  %p449_p5 = scmp.eq.s32.totalorder %s2301_s2, 1 }
  0x22   : > { %2734 = sst [smem:[#allocation24_spill]] %s2774_s24  ;;  %p2313_p4 = por %p70_p2, %p69_p1 }
  0x23   : > { %s59_s26 = ssub.s32 %s2151_s1, %s2774_s24  ;;  %p455_p6 = scmp.eq.s32.totalorder %s2701_s23, 1 }
  0x24   : > { %p60_p7 = scmp.eq.s32.totalorder %s59_s26, 0  ;;  %p2322_p8 = por %p449_p5, %p69_p1 }
  0x25   : > { %p2329_p9 = por %p455_p6, %p75_p3  ;;  %p1700_p10 = scmp.ge.s32.totalorder %s2155_s22, 2 }
  0x26   : > { %s2736_s27 = scalar_select %p2322_p8, 1, 0 }
  0x27   : > { %s2738_s28 = scalar_select %p2329_p9, 1, 0 }
  0x28   : > { %2737 = sst [smem:[#allocation25_spill]] %s2736_s27  ;;  %p1787_p11 = scmp.lt.s32.totalorder %s2155_s22, 2 }
  0x29   : > { %2739 = sst [smem:[#allocation26_spill]] %s2738_s28  ;;  %s2339_s24 = sand.u32 1, %s2143_s20  }
  0x2a   : > { %s2334_s29 = scalar_select %p60_p7, %s2143_s20, %s62_s25  }
  0x2b   : > { %s1702_s26 = sshll.u32 %s2151_s1, 3  ;;  %s2709_s23 = sshll.u32 %s2339_s24, 3 }
  0x2c   : > { %2740 = sst [smem:[#allocation27_spill]] %s2334_s29  ;;  %p2345_p12 = pnand %p1787_p11, %p2313_p4 }
  0x2d   : > { %s603_s25 = sand.u32 1, %s2155_s22   ;;  %s2742_s17 = sld [smem:[#allocation29_spill]] }
  0x2e   : > { %s607_s20 = scalar_lea.vmem [#allocation6], %s2709_s23  ;;  %s2355_s27 = scalar_lea.sflag [#allocation7], %s603_s25 }
  0x2f   : > { %s616_s19 = sshll.u32 %s607_s20, 4  ;;  %p76_p13 = scmp.eq.s32.totalorder %s2301_s2, 0  ;;  %s617_s19 = int_to_ptr.vmem [resolvable:$true] %s616_s19 }
  0x30   : > { %p1698_p0 = scmp.ge.s32.totalorder %s2155_s22, 1  ;;  %p518_p1 = scmp.lt.s32.totalorder %s2155_s22, 3 }
  0x31   : > { %p2368_p2 = por %p76_p13, %p75_p3  ;;  %s2744_s11 = sld [smem:[#allocation34_spill]] }
  0x32   : > { %p2375_p4 = pnand %p1698_p0, %p518_p1  ;;  %s2746_s20 = sld [smem:[#allocation28_spill]] }
  0x33   : > { %s612_s15 = scalar_lea.hbm %s2742_s17, %s1702_s26  ;;  %s2159_s22 = smov 8  }
  0x34   : > { %s614_s18 = sshll.u32 %s612_s15, 4  ;;  %p1762_p5 = pneg %p2375_p4  ;;  %s615_s18 = int_to_ptr.hbm [resolvable:$true] %s614_s18 }
  0x35   : > { %1772 = dma.hbm_to_vmem [thread:$0]  (!%p2345_p12), %s615_s18, 128, %s617_s19, %s2355_s27  }
  0x36   : > { %s2157_s18 = smov [#allocation9]   ;;  %p1763_p3 = pnand %p1762_p5, %p76_p13 }
  0x37   : > { %s553_s3 = sshll.u32 %s2744_s11, 4  ;;  %s555_s19 = sshll.u32 %s2157_s18, 4  ;;  %s554_s3 = int_to_ptr.hbm [resolvable:$true] %s553_s3  ;;  %s556_s19 = int_to_ptr.vmem [resolvable:$true] %s555_s19 }
  0x38   : > { %s592_s15 = scalar_lea.hbm %s2746_s20, %s1702_s26  ;;  %s2158_s11 = smov 128  }
  0x39   : > { %s594_s23 = sshll.u32 %s592_s15, 4  ;;  %s2747_s0 = sshll.u32 %s2339_s24, 3  ;;  %s595_s23 = int_to_ptr.hbm [resolvable:$true] %s594_s23 }
  0x3a   : > { %1765 = dma.hbm_to_vmem [thread:$0]  (!%p1763_p3), %s554_s3, 512, %s556_s19, [#allocation10], %s2158_s11, %s2158_s11, %s2159_s22  }
  0x3b   : > { %s588_s14 = scalar_lea.vmem [#allocation3], %s2747_s0  ;;  %s585_s13 = scalar_lea.sflag [#allocation4], %s2339_s24 }
  0x3c   : > { %s596_s21 = sshll.u32 %s588_s14, 4  ;;  %s2748_s10 = sld [smem:[#allocation30_spill]]  ;;  %s597_s21 = int_to_ptr.vmem [resolvable:$true] %s596_s21 }
  0x3d   : > { %1769 = dma.hbm_to_vmem [thread:$0]  (!%p2345_p12), %s595_s23, 128, %s597_s21, %s585_s13  }
  0x3e   : > { %s626_s29 = scalar_lea.vmem [#allocation8], %s2339_s24  ;;  %s2402_s11 = sand.u32 (!%p2375_p4), 1, %s2139_s30  }
  0x3f   : > { %s633_s26 = sshll.u32 %s626_s29, 4  ;;  %s2405_s13 = sshll.u32 (!%p2375_p4), %s2402_s11, 3  ;;  %s634_s26 = int_to_ptr.vmem [resolvable:$true] %s633_s26 }
  0x40   : > { %642 = sbr.rel (%p2375_p4) target bundleno = 2272 (0x8e0), region = 88  ;;  %s648_s12 = scalar_lea.vmem (!%p2375_p4), [#allocation3], %s2405_s13 }
  0x42   : > { %s629_s9 = scalar_lea.hbm %s2748_s10, %s2151_s1  ;;  %s645_s10 = scalar_lea.sflag (!%p2375_p4), [#allocation4], %s2402_s11 }
  0x43   : > { %s631_s25 = sshll.u32 %s629_s9, 4  ;;  %s632_s25 = int_to_ptr.hbm [resolvable:$true] %s631_s25 }
  0x44   : > { %1775 = dma.hbm_to_vmem [thread:$0]  (!%p2345_p12), %s632_s25, 16, %s634_s26, %s2355_s27  }
  0x45   : > { %2114 = dma.done.wait (%p2368_p2), %s645_s10, 128  }
  0x46   : > { %2116 = vsyncadd (%p2368_p2), %s645_s10, 4294967168  ;;  %s654_s9 = sand.u32 1, %s2301_s2   ;;  %s658_s16 = scalar_lea.vmem [#allocation6], %s2405_s13 }
  0x47   : > { %s655_s14 = scalar_lea.sflag [#allocation7], %s654_s9 }
  0x48   : > { %2118 = dma.done.wait (%p2368_p2), %s655_s14, 144  }
  0x49   : > { %2120 = vsyncadd (%p2368_p2), %s655_s14, 4294967152  ;;  %s667_s0 = scalar_lea.vmem [#allocation8], %s2402_s11 }
  0x4a   : > { %2122 = dma.done.wait (%p76_p13), [#allocation10], 512  }
  0x4b   : > { %2124 = vsyncadd (%p76_p13), [#allocation10], 4294966784  ;;  %v755_v0 = vld [vmem:[%s2684_s5 + $0x18] sm:$0xff]  ;;  %s2749_s27 = sld [smem:[#allocation31_spill]]  ;;  %v754_v2 = vld [vmem:[%s2684_s5 + $0x10] sm:$0xff]  ;;  %vm760_vm0 = vcmask 261120  }
  0x4c   : > { %776 = vmatpush.msra.mxu0 %v755_v0  ;;  %v753_v4 = vld [vmem:[%s2684_s5 + $0x8] sm:$0xff]  ;;  %v752_v6 = vld [vmem:[%s2684_s5] sm:$0xff]  ;;  %vm784_vm1 = vcmask 523264   ;;  %vm824_vm2 = vcmask 64512   ;;  %s2162_s3 = smov 96   ;;  %s2163_s28 = smov 104  }
  0x4d   : > { %v751_v8 = vld [vmem:[%s648_s12] sm:$0xff]  ;;  %v2450_v9 = vld [vmem:[%s658_s16] sm:$0xff]  ;;  %s2160_s12 = smov 120   ;;  %s2161_s16 = smov 112  }
  0x4e   : > { %777 = vmatpush.msra.mxu0 %v754_v2  ;;  %v1851_v10 = vld [vmem:[%s2685_s6] ss:$0 sm:$0xff]  ;;  %s2164_s15 = smov 88   ;;  %s2165_s18 = smov 72  }
  0x4f   : > { %v1852_v11 = vld [vmem:[%s2683_s4] ss:$0 sm:$0xff]  ;;  %s2166_s29 = smov 80   ;;  %s2751_s17 = sld [smem:[#allocation33_spill]] }
  0x50   : > { %778 = vmatpush.msra.mxu0 %v753_v4  ;;  %v2473_v19 = vld [vmem:[%s667_s0] ss:$0 sm:$0xff]  ;;  %s1711_s0 = sshll.u32 %s2402_s11, 5  ;;  %s739_s19 = scalar_lea.vmem [#allocation12], %s2405_s13 }
  0x51   : > { %v791_v1 = vld [vmem:[%s2749_s27 + $0x18] sm:$0xff]  ;;  %v790_v3 = vld [vmem:[%s2749_s27 + $0x10] sm:$0xff]  ;;  %v789_v5 = vld [vmem:[%s2749_s27 + $0x8] sm:$0xff]  ;;  %s2483_s20 = scalar_lea.vmem [#allocation14], %s1711_s0  ;;  %s2753_s10 = sld [smem:[#allocation36_spill]] }
  0x52   : > { %812 = vmatpush.msra.mxu1 %v791_v1  ;;  %v788_v7 = vld [vmem:[%s2749_s27] sm:$0xff]  ;;  %779 = vmatpush.msra.mxu0 %v752_v6  ;;  %s2754_s26 = sld [smem:[#allocation22_spill]] }
  0x53   : > { %1712 = vmatmul.msk.f32.vlgmr.msra.gmra.mxu0 %vm760_vm0, %v751_v8  ;;  %v903_v42 = vld [vmem:[%s2686_s7] sm:$0xff]  ;;  %s2755_s21 = sld [smem:[#allocation37_spill]] }
  0x54   : > { %813 = vmatpush.msra.mxu1 %v790_v3 }
  0x56   : > { %814 = vmatpush.msra.mxu1 %v789_v5 }
  0x58   : > { %815 = vmatpush.msra.mxu1 %v788_v7  ;;  %s1739_s23 = sshll.u32 %s2754_s26, 3 }
  0x59   : > { %1713 = vmatmul.msk.f32.vlgmr.msra.gmra.mxu1 %vm760_vm0, %v2450_v9 }
  0xd0   : > { %v781_v12 = vpop.f32.mrf.mxu0 }
  0xd1   : > { %v782_v14 = vadd.f32 %v1851_v10, %v781_v12 }
  0xd3   : > { %785 = vst.msk [vmem:[#allocation2] sm:$0xff] %vm784_vm1, %v782_v14 }
  0xd6   : > { %v817_v13 = vpop.f32.mrf.mxu1 }
  0xd7   : > { %v818_v15 = vadd.f32 %v1852_v11, %v817_v13 }
  0xd9   : > { %905 = vrot.lane.b32.xlu2 %v818_v15, %s2160_s12 }
  0xda   : > { %v2462_v16 = vld [vmem:[#allocation2] sm:$0xff] }
  0xdb   : > { %877 = vrot.lane.b32.xlu1 %v2462_v16, %s2162_s3  ;;  %1714 = vmatpush.xpose.msk.msra.mxu2 %vm824_vm2, %v2462_v16  ;;  %s2750_s3 = sld [smem:[#allocation32_spill]] }
  0xde   : > { %1715 = vmatmul.msk.f32.vlgmr.msra.gmra.mxu2 %vm824_vm2, %v818_v15 }
  0xe1   : > { %1038 = vrot.lane.b32.xlu2 %v2462_v16, %s2161_s16 }
  0xe3   : > { %908 = vrot.lane.b32.xlu1 %v2462_v16, %s2160_s12 }
  0xe9   : > { %1143 = vrot.lane.b32.xlu2 %v818_v15, %s2163_s28 }
  0xeb   : > { %1035 = vrot.lane.b32.xlu1 %v818_v15, %s2161_s16  ;;  %s2757_s16 = sld [smem:[#allocation41_spill]] }
 0x133   : > { %v906_v29 = vpop.permute.xlu2 %905 }
 0x13b   : > { %v1039_v34 = vpop.permute.xlu2 %1038 }
 0x143   : > { %v1144_v44 = vpop.permute.xlu2 %1143 }
 0x14d   : > { %v878_v17 = vpop.permute.xlu1 %877 }
 0x14e   : > { %898 = vmatpush.msra.mxu3 %v878_v17 }
 0x155   : > { %v909_v18 = vpop.permute.xlu1 %908 }
 0x156   : > { %1717 = vmatpush.xpose.msk.msrb.mxu3 %vm824_vm2, %v909_v18 }
 0x15d   : > { %v1036_v49 = vpop.permute.xlu1 %1035 }
 0x161   : > { %v848_v20 = vpop.f32.mrf.mxu2 }
 0x162   : > { %v849_v21 = vadd.f32 %v2473_v19, %v848_v20 }
 0x164   : > { %v851_v22 = vsel %vm824_vm2, %v849_v21, -inf }
 0x165   : > { %852 = vmax.xlane.f32.xlu0 %v851_v22 }
 0x1d8   : > { %v853_v23 = vpop.xlane.xlu0 %852 }
 0x1d9   : > { %v854_v24 = vsub.f32 %v849_v21, %v853_v23 }
 0x1db   : > { %v855_v25 = vmul.f32 1.442695, %v854_v24 }
 0x1dd   : > { %1861 = vpow2.f32 %v855_v25 }
 0x1e3   : > { %v1862_v26 = vpop.eup %1861 }
 0x1e4   : > { %v857_v27 = vsel %vm824_vm2, %v1862_v26, 0.0 }
 0x1e5   : > { %858 = vadd.xlane.f32.xlu0 %v857_v27 }
 0x1f9   : > { %1146 = vrot.lane.b32.xlu0 %v2462_v16, %s2163_s28  ;;  %s1480_s28 = sshll.u32 %s739_s19, 4  ;;  %s1481_s28 = int_to_ptr.vmem [resolvable:$true] %s1480_s28 }
 0x258   : > { %v859_v28 = vpop.xlane.xlu0 %858 }
 0x259   : > { %1863 = vrcp.f32 %v859_v28  ;;  %v871_v33 = vand.u32 2147483648, %v859_v28  ;;  %v869_v36 = vand.u32 2147483647, %v859_v28  ;;  %vm865_vm4 = vweird.f32 %v859_v28 }
 0x25b   : > { %v872_v38 = vor.u32 1.1754944e-38, %v871_v33  ;;  %vm870_vm6 = vcmp.eq.f32.partialorder %v869_v36, 8.507059e+37  ;;  %v987_v36 = vld [vmem:[%s2686_s7 + $0x8] sm:$0xff] }
 0x25c   : > { %1006 = vmatpush.msrb.mxu0 %v987_v36 }
 0x25f   : > { %v1864_v30 = vpop.eup %1863 }
 0x260   : > { %v861_v31 = vmul.f32 %v1864_v30, %v859_v28  ;;  %vm866_vm3 = vweird.f32 %v1864_v30 }
 0x261   : > { %vm867_vm5 = vmor %vm865_vm4, %vm866_vm3 }
 0x262   : > { %v862_v32 = vsub.f32 1.0, %v861_v31 }
 0x264   : > { %v863_v35 = vmul.f32 %v1864_v30, %v862_v32 }
 0x266   : > { %v864_v37 = vadd.f32 %v1864_v30, %v863_v35 }
 0x268   : > { %v868_v39 = vsel %vm867_vm5, %v1864_v30, %v864_v37  ;;  %v1117_v37 = vld [vmem:[%s2686_s7 + $0x10] sm:$0xff] }
 0x269   : > { %v873_v40 = vsel %vm870_vm6, %v872_v38, %v868_v39  ;;  %1136 = vmatpush.msra.mxu0 %v1117_v37 }
 0x26a   : > { %v875_v41 = vmul.f32 %v1862_v26, %v873_v40  ;;  %v1225_v40 = vld [vmem:[%s2686_s7 + $0x18] sm:$0xff] }
 0x26b   : > { %v1147_v43 = vpop.permute.xlu0 %1146 }
 0x26c   : > { %876 = vst.msk [vmem:[%s2483_s20] sm:$0xff] %vm824_vm2, %v875_v41  ;;  %1716 = vmatmul.msk.f32.vlgmr.msra.gmra.mxu3 %vm824_vm2, %v875_v41  ;;  %1728 = vmatpush.xpose.msk.msrb.mxu1 %vm824_vm2, %v1147_v43 }
 0x26d   : > { %1029 = vmatpush.msra.mxu3 %v903_v42 }
 0x26f   : > { %1729 = vmatmul.msk.f32.vlgmr.msrb.gmra.mxu1 %vm824_vm2, %v1144_v44 }
 0x274   : > { %1718 = vmatmul.msk.f32.vlgmr.msrb.gmra.mxu3 %vm824_vm2, %v906_v29 }
 0x275   : > { %1723 = vmatpush.xpose.msk.msrb.mxu3 %vm824_vm2, %v1039_v34 }
 0x2ec   : > { %v1169_v45 = vpop.f32.mrf.mxu1 }
 0x2ed   : > { %v1170_v46 = vadd.f32 %v2473_v19, %v1169_v45 }
 0x2ef   : > { %v900_v47 = vpop.f32.mrf.mxu3  ;;  %v1172_v48 = vsel %vm824_vm2, %v1170_v46, -inf }
 0x2f0   : > { %1722 = vmatmul.msk.f32.vlgmr.msra.gmra.mxu3 %vm824_vm2, %v900_v47  ;;  %1173 = vmax.xlane.f32.xlu2 %v1172_v48 }
 0x2f7   : > { %v931_v50 = vpop.f32.mrf.mxu3 }
 0x2f8   : > { %v932_v51 = vadd.f32 %v2473_v19, %v931_v50  ;;  %1724 = vmatmul.msk.f32.vlgmr.msrb.gmra.mxu3 %vm824_vm2, %v1036_v49 }
 0x2fa   : > { %v934_v52 = vsel %vm824_vm2, %v932_v51, -inf }
 0x2fb   : > { %935 = vmax.xlane.f32.xlu1 %v934_v52 }
 0x363   : > { %v1174_v53 = vpop.xlane.xlu2 %1173 }
 0x364   : > { %v1175_v54 = vsub.f32 %v1170_v46, %v1174_v53 }
 0x366   : > { %v1176_v55 = vmul.f32 1.442695, %v1175_v54 }
 0x368   : > { %1865 = vpow2.f32 %v1176_v55 }
 0x36e   : > { %v1866_v56 = vpop.eup %1865  ;;  %v936_v57 = vpop.xlane.xlu1 %935 }
 0x36f   : > { %v937_v58 = vsub.f32 %v932_v51, %v936_v57  ;;  %v1178_v59 = vsel %vm824_vm2, %v1866_v56, 0.0 }
 0x370   : > { %1179 = vadd.xlane.f32.xlu1 %v1178_v59 }
 0x371   : > { %v938_v60 = vmul.f32 1.442695, %v937_v58  ;;  %v1854_v58 = vld [vmem:[%s2687_s8] ss:$0 sm:$0xff] }
 0x373   : > { %1867 = vpow2.f32 %v938_v60  ;;  %v2499_v61 = vpop.f32.mrf.mxu3 }
 0x379   : > { %v1868_v62 = vpop.eup %1867 }
 0x37a   : > { %v940_v63 = vsel %vm824_vm2, %v1868_v62, 0.0 }
 0x37b   : > { %v1061_v0 = vpop.f32.mrf.mxu3  ;;  %941 = vadd.xlane.f32.xlu2 %v940_v63 }
 0x37c   : > { %v1062_v1 = vadd.f32 %v2473_v19, %v1061_v0 }
 0x37e   : > { %v1064_v2 = vsel %vm824_vm2, %v1062_v1, -inf }
 0x37f   : > { %1065 = vmax.xlane.f32.xlu0 %v1064_v2 }
 0x389   : > { %961 = vrot.lane.b32.xlu1 %v2462_v16, %s2164_s15  ;;  %s2601_s15 = scalar_lea.sflag [#allocation13], %s654_s9 }
 0x393   : > { %1199 = vrot.lane.b32.xlu0 %v2462_v16, %s2165_s18 }
 0x3e3   : > { %v1180_v3 = vpop.xlane.xlu1 %1179 }
 0x3e4   : > { %1869 = vrcp.f32 %v1180_v3  ;;  %v1192_v7 = vand.u32 2147483648, %v1180_v3  ;;  %v1190_v11 = vand.u32 2147483647, %v1180_v3  ;;  %vm1186_vm8 = vweird.f32 %v1180_v3 }
 0x3e6   : > { %v1193_v13 = vor.u32 1.1754944e-38, %v1192_v7  ;;  %vm1191_vm10 = vcmp.eq.f32.partialorder %v1190_v11, 8.507059e+37 }
 0x3ea   : > { %v1870_v4 = vpop.eup %1869 }
 0x3eb   : > { %v1182_v5 = vmul.f32 %v1870_v4, %v1180_v3  ;;  %vm1187_vm7 = vweird.f32 %v1870_v4 }
 0x3ec   : > { %vm1188_vm9 = vmor %vm1186_vm8, %vm1187_vm7 }
 0x3ed   : > { %v1183_v6 = vsub.f32 1.0, %v1182_v5 }
 0x3ee   : > { %v942_v8 = vpop.xlane.xlu2 %941 }
 0x3ef   : > { %v1184_v10 = vmul.f32 %v1870_v4, %v1183_v6  ;;  %1871 = vrcp.f32 %v942_v8  ;;  %v954_v24 = vand.u32 2147483648, %v942_v8  ;;  %v952_v26 = vand.u32 2147483647, %v942_v8 }
 0x3f0   : > { %vm948_vm12 = vweird.f32 %v942_v8 }
 0x3f1   : > { %v1185_v12 = vadd.f32 %v1870_v4, %v1184_v10  ;;  %v955_v30 = vor.u32 1.1754944e-38, %v954_v24  ;;  %vm953_vm14 = vcmp.eq.f32.partialorder %v952_v26, 8.507059e+37  ;;  %v1855_v26 = vld [vmem:[%s2750_s3] ss:$0 sm:$0xff]  ;;  %s1478_s3 = scalar_lea.hbm %s2757_s16, %s1739_s23 }
 0x3f2   : > { %v1066_v14 = vpop.xlane.xlu0 %1065  ;;  %s1482_s0 = sshll.u32 %s1478_s3, 4  ;;  %s1483_s0 = int_to_ptr.hbm [resolvable:$true] %s1482_s0 }
 0x3f3   : > { %v1189_v15 = vsel %vm1188_vm9, %v1870_v4, %v1185_v12  ;;  %v1067_v17 = vsub.f32 %v1062_v1, %v1066_v14  ;;  %v2167_v1 = vmov 32.0   ;;  %v1299_v12 = vld [vmem:[#allocation9 + $0x18] sm:$0xff]  ;;  %v1297_v14 = vld [vmem:[#allocation9 + $0x8] sm:$0xff]  ;;  %s2019_s18 = sshra.s32 %s1483_s0, 4  ;;  %s2020_s18 = int_to_ptr.hbm [resolvable:$true] %s2019_s18 }
 0x3f4   : > { %v1194_v18 = vsel %vm1191_vm10, %v1193_v13, %v1189_v15  ;;  %v1298_v13 = vld [vmem:[#allocation9 + $0x10] sm:$0xff]  ;;  %v1296_v15 = vld [vmem:[#allocation9] sm:$0xff]  ;;  %p2026_p12 = scmp.lt.s32.totalorder %s2020_s18, %s2757_s16 }
 0x3f5   : > { %v1872_v19 = vpop.eup %1871  ;;  %v1068_v20 = vmul.f32 1.442695, %v1067_v17  ;;  %v1196_v21 = vmul.f32 %v1866_v56, %v1194_v18 }
 0x3f6   : > { %v944_v22 = vmul.f32 %v1872_v19, %v942_v8  ;;  %vm949_vm11 = vweird.f32 %v1872_v19 }
 0x3f7   : > { %1873 = vpow2.f32 %v1068_v20  ;;  %1730 = vst.msk [vmem:[%s2483_s20 + $0x18] sm:$0xff] %vm824_vm2, %v1196_v21  ;;  %vm950_vm13 = vmor %vm948_vm12, %vm949_vm11 }
 0x3f8   : > { %v945_v23 = vsub.f32 1.0, %v944_v22 }
 0x3fa   : > { %v946_v25 = vmul.f32 %v1872_v19, %v945_v23 }
 0x3fb   : > { %v962_v27 = vpop.permute.xlu1 %961 }
 0x3fc   : > { %v947_v28 = vadd.f32 %v1872_v19, %v946_v25  ;;  %982 = vmatpush.msrb.mxu2 %v962_v27 }
 0x3fd   : > { %v1874_v29 = vpop.eup %1873 }
 0x3fe   : > { %v1070_v31 = vsel %vm824_vm2, %v1874_v29, 0.0  ;;  %v951_v32 = vsel %vm950_vm13, %v1872_v19, %v947_v28 }
 0x3ff   : > { %1071 = vadd.xlane.f32.xlu2 %v1070_v31  ;;  %v956_v33 = vsel %vm953_vm14, %v955_v30, %v951_v32 }
 0x400   : > { %v958_v34 = vmul.f32 %v1868_v62, %v956_v33 }
 0x402   : > { %1719 = vst.msk [vmem:[%s2483_s20 + $0x8] sm:$0xff] %vm824_vm2, %v958_v34  ;;  %1720 = vmatmul.msk.f32.vlgmr.msrb.gmra.mxu2 %vm824_vm2, %v958_v34 }
 0x405   : > { %v1200_v35 = vpop.permute.xlu0 %1199 }
 0x406   : > { %1220 = vmatpush.msra.mxu3 %v1200_v35 }
 0x407   : > { %1731 = vmatmul.msk.f32.vlgmr.msra.gmra.mxu3 %vm824_vm2, %v1196_v21 }
 0x417   : > { %1091 = vrot.lane.b32.xlu2 %v2462_v16, %s2166_s29  ;;  %s2752_s29 = sld [smem:[#allocation35_spill]] }
 0x41d   : > { %v1857_v32 = vld [vmem:[%s2752_s29] ss:$0 sm:$0xff]  ;;  %s2021_s29 = scalar_lea.hbm %s2020_s18, 8 }
 0x41e   : > { %p2022_p6 = scmp.ne.s32.totalorder %s2020_s18, %s2021_s29 }
 0x420   : > { %p2023_p7 = pnand %p2022_p6, %p2322_p8 }
 0x422   : > { %p2024_p11 = pneg %p2023_p7 }
 0x472   : > { %v1072_v38 = vpop.xlane.xlu2 %1071 }
 0x473   : > { %1875 = vrcp.f32 %v1072_v38  ;;  %v1084_v43 = vand.u32 2147483648, %v1072_v38  ;;  %v1082_v45 = vand.u32 2147483647, %v1072_v38  ;;  %vm1078_vm3 = vweird.f32 %v1072_v38 }
 0x474   : > { %1877 = vrcp.f32 %v2167_v1 }
 0x475   : > { %v1085_v47 = vor.u32 1.1754944e-38, %v1084_v43  ;;  %vm1083_vm5 = vcmp.eq.f32.partialorder %v1082_v45, 8.507059e+37  ;;  %v1376_v43 = vld [vmem:[%s2753_s10 + $0x28] sm:$0xff] }
 0x479   : > { %v1876_v39 = vpop.eup %1875 }
 0x47a   : > { %v1074_v41 = vmul.f32 %v1876_v39, %v1072_v38  ;;  %v1092_v42 = vpop.permute.xlu2 %1091  ;;  %vm1079_vm15 = vweird.f32 %v1876_v39  ;;  %v1878_v2 = vpop.eup %1877  ;;  %v1378_v38 = vld [vmem:[%s2753_s10 + $0x38] sm:$0xff] }
 0x47b   : > { %1112 = vmatpush.msra.mxu2 %v1092_v42  ;;  %vm1080_vm4 = vmor %vm1078_vm3, %vm1079_vm15  ;;  %v1262_v3 = vmul.f32 32.0, %v1878_v2  ;;  %1395 = vmatpush.msra.mxu1 %v1378_v38 }
 0x47c   : > { %v1075_v16 = vsub.f32 1.0, %v1074_v41  ;;  %v1377_v41 = vld [vmem:[%s2753_s10 + $0x30] sm:$0xff] }
 0x47d   : > { %1244 = vmatpush.msrb.mxu2 %v1225_v40  ;;  %v1263_v4 = vsub.f32 1.0, %v1262_v3  ;;  %1396 = vmatpush.msra.mxu1 %v1377_v41 }
 0x47e   : > { %v1076_v44 = vmul.f32 %v1876_v39, %v1075_v16 }
 0x47f   : > { %1397 = vmatpush.msra.mxu1 %v1376_v43 }
 0x480   : > { %v1077_v46 = vadd.f32 %v1876_v39, %v1076_v44 }
 0x482   : > { %v1081_v48 = vsel %vm1080_vm4, %v1876_v39, %v1077_v46  ;;  %v1375_v46 = vld [vmem:[%s2753_s10 + $0x20] sm:$0xff] }
 0x483   : > { %v1086_v49 = vsel %vm1083_vm5, %v1085_v47, %v1081_v48  ;;  %1398 = vmatpush.msra.mxu1 %v1375_v46  ;;  %v1374_v48 = vld [vmem:[%s2753_s10 + $0x18] sm:$0xff] }
 0x484   : > { %v1088_v50 = vmul.f32 %v1874_v29, %v1086_v49  ;;  %v1856_v29 = vld [vmem:[%s2751_s17] ss:$0 sm:$0xff]  ;;  %s1495_s17 = sshll.u32 %s2483_s20, 4  ;;  %s1496_s17 = int_to_ptr.vmem [resolvable:$true] %s1495_s17 }
 0x485   : > { %v984_v51 = vpop.f32.mrf.mxu2  ;;  %1399 = vmatpush.msra.mxu1 %v1374_v48 }
 0x486   : > { %1721 = vmatmul.msk.f32.vlgmr.msrb.gmra.mxu0 %vm824_vm2, %v984_v51  ;;  %1725 = vst.msk [vmem:[%s2483_s20 + $0x10] sm:$0xff] %vm824_vm2, %v1088_v50  ;;  %1726 = vmatmul.msk.f32.vlgmr.msra.gmra.mxu2 %vm824_vm2, %v1088_v50  ;;  %v1373_v51 = vld [vmem:[%s2753_s10 + $0x10] sm:$0xff] }
 0x487   : > { %1319 = vmatpush.msrb.mxu0 %v1299_v12  ;;  %1400 = vmatpush.msra.mxu1 %v1373_v51 }
 0x489   : > { %1320 = vmatpush.msrb.mxu0 %v1298_v13 }
 0x48a   : > { %v1222_v52 = vpop.f32.mrf.mxu3 }
 0x48b   : > { %1321 = vmatpush.msrb.mxu0 %v1297_v14 }
 0x48d   : > { %1322 = vmatpush.msrb.mxu0 %v1296_v15 }
 0x48e   : > { %1732 = vmatmul.msk.f32.vlgmr.msrb.gmra.mxu2 %vm824_vm2, %v1222_v52 }
 0x503   : > { %v1008_v54 = vpop.f32.mrf.mxu0 }
 0x504   : > { %v1032_v55 = vadd.f32 %v2499_v61, %v1008_v54  ;;  %v1264_v61 = vmul.f32 %v1878_v2, %v1263_v4 }
 0x506   : > { %v1265_v5 = vadd.f32 %v1878_v2, %v1264_v61 }
 0x509   : > { %v1114_v53 = vpop.f32.mrf.mxu2 }
 0x50a   : > { %1727 = vmatmul.msk.f32.vlgmr.msra.gmra.mxu0 %vm824_vm2, %v1114_v53  ;;  %vm1266_vm2 = vweird.f32 %v1878_v2  ;;  %v1372_v53 = vld [vmem:[%s2753_s10 + $0x8] sm:$0xff] }
 0x50b   : > { %v2535_v6 = vsel %vm1266_vm2, %v1878_v2, %v1265_v5  ;;  %1401 = vmatpush.msra.mxu1 %v1372_v53 }
 0x511   : > { %v1246_v59 = vpop.f32.mrf.mxu2 }
 0x587   : > { %v1138_v56 = vpop.f32.mrf.mxu0 }
 0x588   : > { %v1141_v57 = vadd.f32 %v1138_v56, %v1032_v55  ;;  %v1371_v55 = vld [vmem:[%s2753_s10] sm:$0xff] }
 0x589   : > { %1402 = vmatpush.msra.mxu1 %v1371_v55 }
 0x58a   : > { %v1249_v60 = vadd.f32 %v1246_v59, %v1141_v57 }
 0x58c   : > { %v1254_v62 = vadd.f32 %v1854_v58, %v1249_v60 }
 0x58e   : > { %v1255_v63 = vadd.f32 %v1254_v62, %v2450_v9 }
 0x590   : > { %v1258_v0 = vsel %vm760_vm0, %v1255_v63, 0.0 }
 0x591   : > { %1259 = vadd.xlane.f32.xlu0 %v1258_v0 }
 0x604   : > { %v1260_v7 = vpop.xlane.xlu0 %1259 }
 0x605   : > { %v1268_v8 = vmul.f32 %v2535_v6, %v1260_v7 }
 0x607   : > { %v1269_v10 = vsub.f32 %v1255_v63, %v1268_v8 }
 0x609   : > { %v1270_v11 = vmul.f32 %v1269_v10, %v1269_v10 }
 0x60b   : > { %v1271_v9 = vsel %vm760_vm0, %v1270_v11, 0.0 }
 0x60c   : > { %1272 = vadd.xlane.f32.xlu1 %v1271_v9 }
 0x67f   : > { %v1273_v17 = vpop.xlane.xlu1 %1272 }
 0x680   : > { %v1274_v18 = vmul.f32 %v1273_v17, %v2535_v6 }
 0x682   : > { %v1275_v19 = vadd.f32 1e-12, %v1274_v18 }
 0x684   : > { %1879 = vrsqrt.f32 %v1275_v19  ;;  %vm1282_vm7 = vweird.f32 %v1275_v19 }
 0x68a   : > { %v1880_v20 = vpop.eup %1879 }
 0x68b   : > { %v1277_v21 = vmul.f32 %v1880_v20, %v1275_v19  ;;  %vm1283_vm6 = vweird.f32 %v1880_v20  ;;  %v1858_v19 = vld [vmem:[%s2755_s21] ss:$0 sm:$0xff]  ;;  %s2025_s21 = scalar_lea.hbm %s2757_s16, 16 }
 0x68c   : > { %vm1284_vm8 = vmor %vm1282_vm7, %vm1283_vm6  ;;  %p2027_p13 = scmp.lt.s32.totalorder %s2025_s21, %s2021_s29 }
 0x68d   : > { %v1278_v22 = vmul.f32 %v1880_v20, %v1277_v21 }
 0x68e   : > { %p2028_p0 = por %p2027_p13, %p2026_p12 }
 0x68f   : > { %v1279_v23 = vmul.f32 0.5, %v1278_v22 }
 0x690   : > { %p2029_p1 = pnand %p2028_p0, %p2024_p11 }
 0x691   : > { %v1280_v24 = vsub.f32 1.5, %v1279_v23 }
 0x693   : > { %v1281_v25 = vmul.f32 %v1880_v20, %v1280_v24 }
 0x695   : > { %v1285_v27 = vsel %vm1284_vm8, %v1880_v20, %v1281_v25 }
 0x696   : > { %v1286_v28 = vmul.f32 %v1285_v27, %v1269_v10 }
 0x698   : > { %v1290_v30 = vmul.f32 %v1855_v26, %v1286_v28 }
 0x69a   : > { %v2546_v31 = vadd.f32 %v1856_v29, %v1290_v30 }
 0x69c   : > { %1733 = vmatmul.msk.f32.vlgmr.msrb.gmra.mxu0 %vm760_vm0, %v2546_v31  ;;  %1295 = vst.msk [vmem:[%s739_s19] sm:$0xff] %vm760_vm0, %v2546_v31 }
 0x719   : > { %v1324_v33 = vpop.f32.mrf.mxu0 }
 0x71a   : > { %v1325_v34 = vadd.f32 %v1857_v32, %v1324_v33 }
 0x71c   : > { %v1328_v35 = vmul.f32 0.70710677, %v1325_v34  ;;  %v1327_v15 = vmul.f32 0.5, %v1325_v34 }
 0x71e   : > { %v1329_v36 = vmul.f32 %v1328_v35, %v1328_v35 }
 0x720   : > { %v1330_v37 = vmin.f32 %v1329_v36, 16.0 }
 0x722   : > { %v1331_v39 = vmul.f32 2.1237322e-06, %v1330_v37  ;;  %v1342_v40 = vmul.f32 3.8918573e-05, %v1330_v37 }
 0x724   : > { %v1332_v42 = vadd.f32 0.00028619796, %v1331_v39  ;;  %v1343_v16 = vadd.f32 0.001143296, %v1342_v40 }
 0x726   : > { %v1333_v44 = vmul.f32 %v1332_v42, %v1330_v37  ;;  %v1344_v45 = vmul.f32 %v1343_v16, %v1330_v37 }
 0x728   : > { %v1345_v47 = vadd.f32 0.014752088, %v1344_v45  ;;  %v1334_v49 = vadd.f32 0.0036580483, %v1333_v44 }
 0x72a   : > { %v1346_v50 = vmul.f32 %v1345_v47, %v1330_v37  ;;  %v1335_v54 = vmul.f32 %v1334_v49, %v1330_v37 }
 0x72c   : > { %v1347_v52 = vadd.f32 0.112945676, %v1346_v50  ;;  %v1336_v58 = vadd.f32 0.05243302, %v1335_v54 }
 0x72e   : > { %v1348_v56 = vmul.f32 %v1347_v52, %v1330_v37  ;;  %v1337_v62 = vmul.f32 %v1336_v58, %v1330_v37 }
 0x730   : > { %v1349_v57 = vadd.f32 0.4994258, %v1348_v56  ;;  %v1338_v63 = vadd.f32 0.18741608, %v1337_v62 }
 0x732   : > { %v1350_v59 = vmul.f32 %v1349_v57, %v1330_v37  ;;  %v1339_v1 = vmul.f32 %v1338_v63, %v1330_v37 }
 0x734   : > { %v1351_v60 = vadd.f32 1.0, %v1350_v59  ;;  %v1340_v61 = vadd.f32 1.1283791, %v1339_v1 }
 0x736   : > { %1881 = vrcp.f32 %v1351_v60  ;;  %v1363_v4 = vand.u32 2147483648, %v1351_v60  ;;  %v1361_v7 = vand.u32 2147483647, %v1351_v60  ;;  %vm1357_vm10 = vweird.f32 %v1351_v60 }
 0x737   : > { %v1341_v11 = vmul.f32 %v1340_v61, %v1328_v35 }
 0x738   : > { %v1364_v10 = vor.u32 1.1754944e-38, %v1363_v4  ;;  %vm1362_vm12 = vcmp.eq.f32.partialorder %v1361_v7, 8.507059e+37 }
 0x73c   : > { %v1882_v0 = vpop.eup %1881 }
 0x73d   : > { %v1353_v2 = vmul.f32 %v1882_v0, %v1351_v60  ;;  %vm1358_vm9 = vweird.f32 %v1882_v0 }
 0x73e   : > { %vm1359_vm11 = vmor %vm1357_vm10, %vm1358_vm9 }
 0x73f   : > { %v1354_v3 = vsub.f32 1.0, %v1353_v2 }
 0x741   : > { %v1355_v5 = vmul.f32 %v1882_v0, %v1354_v3 }
 0x743   : > { %v1356_v8 = vadd.f32 %v1882_v0, %v1355_v5 }
 0x745   : > { %v1360_v9 = vsel %vm1359_vm11, %v1882_v0, %v1356_v8 }
 0x746   : > { %v1365_v12 = vsel %vm1362_vm12, %v1364_v10, %v1360_v9 }
 0x747   : > { %v1366_v13 = vmul.f32 %v1365_v12, %v1341_v11 }
 0x749   : > { %v1734_v14 = vclamps-f32 %v1366_v13, 1.0 }
 0x74b   : > { %v1369_v17 = vadd.f32 1.0, %v1734_v14 }
 0x74d   : > { %v1370_v18 = vmul.f32 %v1369_v17, %v1327_v15 }
 0x74f   : > { %1735 = vmatmul.msk.f32.vlgmr.msra.gmra.mxu1 %vm784_vm1, %v1370_v18 }
 0x7cc   : > { %v1404_v20 = vpop.f32.mrf.mxu1 }
 0x7cd   : > { %v1405_v21 = vadd.f32 %v1858_v19, %v1404_v20 }
 0x7cf   : > { %v1407_v22 = vadd.f32 %v1405_v21, %v2546_v31 }
 0x7d1   : > { %v1410_v23 = vsel %vm760_vm0, %v1407_v22, 0.0 }
 0x7d2   : > { %1411 = vadd.xlane.f32.xlu2 %v1410_v23 }
 0x845   : > { %v1412_v24 = vpop.xlane.xlu2 %1411 }
 0x846   : > { %v1413_v25 = vmul.f32 %v1412_v24, %v2535_v6 }
 0x848   : > { %v1414_v26 = vsub.f32 %v1407_v22, %v1413_v25 }
 0x84a   : > { %v1415_v27 = vmul.f32 %v1414_v26, %v1414_v26 }
 0x84c   : > { %v1416_v28 = vsel %vm760_vm0, %v1415_v27, 0.0 }
 0x84d   : > { %1417 = vadd.xlane.f32.xlu0 %v1416_v28 }
 0x84e   : > { %2032 = shalt.err (!%p2029_p1)
}
 0x84f   : > { %1757 = dma.vmem_to_hbm [thread:$0]  (%p2322_p8), %s1481_s28, 128, %s1483_s0, %s2601_s15  }
 0x850   : > { %s1745_s2 = sshll.u32 %s2754_s26, 5  ;;  %s2758_s12 = sld [smem:[#allocation42_spill]] }
 0x856   : > { %s1494_s3 = scalar_lea.hbm %s2758_s12, %s1745_s2  ;;  %s2053_s24 = scalar_lea.hbm %s2758_s12, 64 }
 0x857   : > { %s1497_s25 = sshll.u32 %s1494_s3, 4  ;;  %s1498_s25 = int_to_ptr.hbm [resolvable:$true] %s1497_s25 }
 0x858   : > { %s2047_s14 = sshra.s32 %s1498_s25, 4  ;;  %s2048_s14 = int_to_ptr.hbm [resolvable:$true] %s2047_s14 }
 0x859   : > { %s2049_s18 = scalar_lea.hbm %s2048_s14, 32  ;;  %p2054_p3 = scmp.lt.s32.totalorder %s2048_s14, %s2758_s12 }
 0x85a   : > { %p2050_p2 = scmp.ne.s32.totalorder %s2048_s14, %s2049_s18  ;;  %p2055_p6 = scmp.lt.s32.totalorder %s2053_s24, %s2049_s18 }
 0x85c   : > { %p2051_p4 = pnand %p2050_p2, %p2322_p8  ;;  %p2056_p7 = por %p2055_p6, %p2054_p3 }
 0x85e   : > { %p2052_p5 = pneg %p2051_p4 }
 0x860   : > { %p2057_p11 = pnand %p2056_p7, %p2052_p5 }
 0x862   : > { %2060 = shalt.err (!%p2057_p11)
}
 0x863   : > { %s2168_s19 = smov 128   ;;  %s2169_s2 = smov 8  }
 0x864   : > { %1758 = dma.vmem_to_hbm [thread:$0]  (%p2322_p8), %s1496_s17, 512, %s1498_s25, %s2601_s15, %s2168_s19, %s2168_s19, %s2169_s2  }
 0x865   : > { %s2759_s3 = sld [smem:[#allocation38_spill]]  ;;  %s732_s24 = scalar_lea.vmem [#allocation11], %s2405_s13 }
 0x866   : > { %s2760_s25 = sld [smem:[#allocation40_spill]]  ;;  %s1465_s28 = sshll.u32 %s732_s24, 4  ;;  %s1466_s28 = int_to_ptr.vmem [resolvable:$true] %s1465_s28 }
 0x867   : > { %s2761_s21 = sld [smem:[#allocation39_spill]]  ;;  %s1442_s26 = scalar_lea.sflag [#allocation5], %s2402_s11 }
 0x86b   : > { %v1859_v38 = vld [vmem:[%s2759_s3] ss:$0 sm:$0xff] }
 0x86c   : > { %s1463_s14 = scalar_lea.hbm %s2760_s25, %s1739_s23  ;;  %s2081_s13 = scalar_lea.hbm %s2760_s25, 16 }
 0x86d   : > { %v1860_v40 = vld [vmem:[%s2761_s21] ss:$0 sm:$0xff]  ;;  %s1467_s0 = sshll.u32 %s1463_s14, 4  ;;  %s1468_s0 = int_to_ptr.hbm [resolvable:$true] %s1467_s0 }
 0x86e   : > { %s2075_s19 = sshra.s32 %s1468_s0, 4  ;;  %s2076_s19 = int_to_ptr.hbm [resolvable:$true] %s2075_s19 }
 0x86f   : > { %s2077_s23 = scalar_lea.hbm %s2076_s19, 8  ;;  %p2082_p1 = scmp.lt.s32.totalorder %s2076_s19, %s2760_s25 }
 0x870   : > { %p2078_p12 = scmp.ne.s32.totalorder %s2076_s19, %s2077_s23  ;;  %p2083_p2 = scmp.lt.s32.totalorder %s2081_s13, %s2077_s23 }
 0x872   : > { %p2079_p13 = pnand %p2078_p12, %p2322_p8  ;;  %p2084_p4 = por %p2083_p2, %p2082_p1 }
 0x874   : > { %p2080_p0 = pneg %p2079_p13 }
 0x876   : > { %p2085_p5 = pnand %p2084_p4, %p2080_p0 }
 0x8c0   : > { %v1418_v29 = vpop.xlane.xlu0 %1417 }
 0x8c1   : > { %v1419_v30 = vmul.f32 %v1418_v29, %v2535_v6 }
 0x8c3   : > { %v1420_v31 = vadd.f32 1e-05, %v1419_v30 }
 0x8c5   : > { %1883 = vrsqrt.f32 %v1420_v31  ;;  %vm1427_vm13 = vweird.f32 %v1420_v31 }
 0x8cb   : > { %v1884_v32 = vpop.eup %1883 }
 0x8cc   : > { %v1422_v33 = vmul.f32 %v1884_v32, %v1420_v31  ;;  %vm1428_vm1 = vweird.f32 %v1884_v32 }
 0x8cd   : > { %vm1429_vm14 = vmor %vm1427_vm13, %vm1428_vm1 }
 0x8ce   : > { %v1423_v34 = vmul.f32 %v1884_v32, %v1422_v33 }
 0x8d0   : > { %v1424_v35 = vmul.f32 0.5, %v1423_v34 }
 0x8d2   : > { %v1425_v36 = vsub.f32 1.5, %v1424_v35 }
 0x8d4   : > { %v1426_v37 = vmul.f32 %v1884_v32, %v1425_v36 }
 0x8d6   : > { %v1430_v6 = vsel %vm1429_vm14, %v1884_v32, %v1426_v37 }
 0x8d7   : > { %v1431_v39 = vmul.f32 %v1430_v6, %v1414_v26 }
 0x8d9   : > { %v1435_v41 = vmul.f32 %v1859_v38, %v1431_v39 }
 0x8db   : > { %v1439_v42 = vadd.f32 %v1860_v40, %v1435_v41 }
 0x8dd   : > { %1440 = vst.msk [vmem:[%s732_s24] sm:$0xff] %vm760_vm0, %v1439_v42 }
 0x8de   : > { %2088 = shalt.err (!%p2085_p5)
}
 0x8df   : > { %1756 = dma.vmem_to_hbm [thread:$0]  (%p2322_p8), %s1466_s28, 128, %s1468_s0, %s1442_s26  }
 0x8e0 PF: > { %s2762_s11 = sld [smem:[#allocation20_spill]]  ;;  %p1777_p3 = pnand %p1700_p10, %p2329_p9 }
 0x8e1   : > { %s2764_s15 = sld [smem:[#allocation23_spill]] }
 0x8e2   : > { %p1778_p6 = pneg %p1777_p3 }
 0x8e6   : > { %s1512_s14 = sand.u32 1, %s2762_s11  }
 0x8e7   : > { %s1513_s18 = scalar_lea.sflag [#allocation5], %s1512_s14 }
 0x8e8   : > { %2126 = dma.done.wait (%p1778_p6), %s1513_s18, 128  }
 0x8e9   : > { %2128 = vsyncadd (%p1778_p6), %s1513_s18, 4294967168  ;;  %s2765_s29 = sadd.s32 4294967294, %s2764_s15  }
 0x8ea   : > { %s1522_s21 = sand.u32 1, %s2765_s29  }
 0x8eb   : > { %s1523_s24 = scalar_lea.sflag [#allocation13], %s1522_s21 }
 0x8ec   : > { %2130 = dma.done.wait (%p1778_p6), %s1523_s24, 640  }
 0x8ed   : > { %2132 = vsyncadd (%p1778_p6), %s1523_s24, 4294966656  ;;  %s43_s22 = sadd.s32 1, %s2764_s15   ;;  %s2766_s28 = sld [smem:[#allocation21_spill]] }
 0x8ee   : > { %p40_p8 = scmp.ge.s32.totalorder %s43_s22, 4   ;;  %s2767_s20 = sld [smem:[#allocation27_spill]] }
 0x8ef   : > { %s2768_s26 = sld [smem:[#allocation24_spill]]  ;;  %s2769_s0 = smov %s2139_s30 }
 0x8f0   : > { %s2771_s21 = smov %s2151_s1 }
 0x8f1   :  { %42 = sbr.rel (!%p40_p8) target bundleno = 27 (0x1b), region = 200 }
 0x8f3   : > { %s2770_s30 = smov %s2766_s28 }
 0x8f5   : > { %s2772_s1 = smov %s2768_s26 }
 0x8f6   :  { %1539 = vsyncpa [#allocation4], 1 }
 0x8f7   :  { %1541 = vsyncpa [#allocation4 + $0x1], 1 }
 0x8f8   :  { %1542 = vsyncpa [#allocation7], 1 }
 0x8f9   :  { %1544 = vsyncpa [#allocation7 + $0x1], 1 }
 0x8fa   :  { %1545 = vsyncpa [#allocation10], 1 }
 0x8fb   :  { %1546 = vsyncpa [#allocation5], 1 }
 0x8fc   :  { %1548 = vsyncpa [#allocation5 + $0x1], 1 }
 0x8fd   :  { %1549 = vsyncpa [#allocation13], 1 }
 0x8fe   :  { %1551 = vsyncpa [#allocation13 + $0x1], 1 }

</bundles_post_ra>
